<compile_context>
chip_gen: v5e
topology: v5e:2x2
jax: 0.10.0
libtpu: 0.0.40
codegen_flags: <defaults>
</compile_context>

<pallas_src>
import jax
import jax.numpy as jnp
import numpy as np
from jax import lax
from jax.experimental import pallas as pl
from jax.experimental.pallas import tpu as pltpu

# ---- module constants (from the PyTorch source) ----
d_Q = 64
d_V = 64
d_model = 256
n_head = 1
d_ff = 256
n_layers = 6
d_feature = 3
LN_EPS = 1e-5
N_ATTN = 7                      # 6 block-mask attentions + 1 link-mask attention per layer
N_PROJ = 3 * N_ATTN             # 21 stacked projection weights (Q/K/V x 7 heads)


def _layernorm(y):
    # PyTorch nn.LayerNorm(d_model) with default weight=1, bias=0, eps=1e-5 (last axis)
    mean = jnp.mean(y, axis=-1, keepdims=True)
    var = jnp.mean((y - mean) ** 2, axis=-1, keepdims=True)
    return (y - mean) * lax.rsqrt(var + LN_EPS)


def encoder_kernel(x_ref, bias_ref, keep_ref, wqkv_ref, wf_ref, w1_ref, w2_ref, o_ref):
    """One EncoderLayer for one batch block.  Grid = (batch_blocks, n_layer_steps).

    x_ref:    (BB, S, d_model)              float32   (resident across layer axis)
    bias_ref: (N_ATTN, BB, S, S)            bfloat16  additive mask bias (-1e9 / 0), resident
    keep_ref: (N_ATTN, BB, S, S)            bfloat16  multiplicative keep mask (0 / 1), resident
    wqkv_ref: (1, 21, d_model, d_Q)         bfloat16  stacked [Q_0..6, K_0..6, V_0..6] (streamed)
    wf_ref:   (1, N_ATTN, d_V, d_model)     bfloat16
    w1_ref:   (1, d_model, d_ff)            bfloat16
    w2_ref:   (1, d_ff, d_model)            bfloat16
    o_ref:    (BB, S, d_model)              float32   (resident; last layer wins)
    """
    BB, S, _ = x_ref.shape
    M = BB * S
    HB = N_ATTN * BB
    scale = jnp.float32(1.0 / np.sqrt(d_Q))

    x2 = x_ref[...].reshape(M, d_model)                       # (M, 256) f32
    x_bf = x2.astype(jnp.bfloat16)

    # Head-batched Q/K/V projection: one 21-way batched matmul.  Results come out
    # head-major, so no unaligned 64-lane slicing / stacking is needed afterwards.
    xb = jnp.broadcast_to(x_bf[None], (N_PROJ, M, d_model))
    qkv = lax.dot_general(xb, wqkv_ref[0],
                          dimension_numbers=(((2,), (1,)), ((0,), (0,))),
                          preferred_element_type=jnp.float32)  # (21, M, 64)
    qkv = qkv.astype(jnp.bfloat16)
    q = qkv[0:N_ATTN].reshape(HB, S, d_Q)                      # (7*BB, S, 64)
    k = qkv[N_ATTN:2 * N_ATTN].reshape(HB, S, d_Q)
    v = qkv[2 * N_ATTN:].reshape(HB, S, d_V)

    # (head, batch)-batched attention: 2 batched matmuls replace the former per-head loop.
    score = jnp.einsum('bqd,bkd->bqk', q, k,
                       preferred_element_type=jnp.float32) * scale
    score = score + bias_ref[...].reshape(HB, S, S)            # additive -1e9 mask bias

    smax = jnp.max(score, axis=-1, keepdims=True)
    p = jnp.exp(score - smax)
    inv = pl.reciprocal(jnp.sum(p, axis=-1, keepdims=True), approx=True)   # EUP, not VALU div
    attn = p * inv * keep_ref[...].reshape(HB, S, S)           # multiplicative keep mask

    ctx = jnp.einsum('bqk,bkd->bqd', attn.astype(jnp.bfloat16), v,
                     preferred_element_type=jnp.float32)       # (7*BB, S, 64)

    # Batched per-head output projection: (7, M, 64) x (7, 64, 256) -> (7, M, 256)
    ctx_h = ctx.reshape(N_ATTN, M, d_V).astype(jnp.bfloat16)
    out_h = lax.dot_general(ctx_h, wf_ref[0],
                            dimension_numbers=(((2,), (1,)), ((0,), (0,))),
                            preferred_element_type=jnp.float32)

    # Per-head LayerNorm(out + residual), then sum over heads (fp32 VPU math).
    acc = jnp.sum(_layernorm(out_h + x2[None]), axis=0)        # (M, 256)

    # Position-wise FFN + LayerNorm.
    h1 = jnp.maximum(
        jnp.dot(acc.astype(jnp.bfloat16), w1_ref[0],
                preferred_element_type=jnp.float32), 0.0)
    ff = jnp.dot(h1.astype(jnp.bfloat16), w2_ref[0],
                 preferred_element_type=jnp.float32)
    o_ref[...] = _layernorm(ff + acc).reshape(BB, S, d_model).astype(o_ref.dtype)


def _vmem_limit_bytes(batch_block, S):
    """Conservative scoped-VMEM sizing (resident blocks + double-buffered weights +
    fp32 intermediates), clamped to stay safe on v5e (16 MiB default scoped) and
    v7x (64 MiB physical)."""
    M = batch_block * S
    act = 2 * M * d_model * 4                                   # x + out blocks (f32)
    msk = 2 * N_ATTN * batch_block * S * S * 2                  # bias + keep (bf16)
    w_layer = (N_PROJ * d_model * d_Q + N_ATTN * d_V * d_model
               + d_model * d_ff + d_ff * d_model) * 2           # bf16 weights / layer
    interm = (N_PROJ * M * d_model * 2                          # broadcast x (bf16)
              + N_PROJ * M * d_Q * 6                            # qkv f32 + bf16
              + N_ATTN * batch_block * S * S * 4 * 4            # score / p / attn
              + N_ATTN * M * d_model * 4 * 2                    # per-head out + LN temps
              + M * (d_model + d_ff) * 4 * 4)                   # acc / FFN temps
    est = 2 * (act + msk) + 2 * w_layer + interm                # x2: double-buffered blocks
    return int(min(max(4 * est, 16 * 2 ** 20), 48 * 2 ** 20))


def run_encoder_stack(x, bias, keep, wqkv, wf, w1, w2, *, batch_block=None):
    """x: [B, S, d_model] f32; bias/keep: [N_ATTN, B, S, S] bf16 (head-major, precomputed).

    Per-layer weights carry a leading layer dim and are streamed by the 'arbitrary'
    layer grid axis (resident activations / masks / output stay in VMEM)."""
    B, S, _ = x.shape
    L = wqkv.shape[0]
    if batch_block is None:
        # Extent-2 parallel batch axis by default so both v7x TensorCores get work
        # (no effect on single-TC v5e / v6e).
        batch_block = B // 2 if (B % 2 == 0 and B >= 2) else B
    assert B % batch_block == 0
    nb = B // batch_block

    return pl.pallas_call(
        encoder_kernel,
        out_shape=jax.ShapeDtypeStruct((B, S, d_model), jnp.float32),
        grid_spec=pltpu.PrefetchScalarGridSpec(
            num_scalar_prefetch=0,
            grid=(nb, L),
            in_specs=[
                pl.BlockSpec((batch_block, S, d_model), lambda b, l: (b, 0, 0)),
                pl.BlockSpec((N_ATTN, batch_block, S, S), lambda b, l: (0, b, 0, 0)),
                pl.BlockSpec((N_ATTN, batch_block, S, S), lambda b, l: (0, b, 0, 0)),
                pl.BlockSpec((1, N_PROJ, d_model, d_Q), lambda b, l: (l, 0, 0, 0)),
                pl.BlockSpec((1, N_ATTN, d_V, d_model), lambda b, l: (l, 0, 0, 0)),
                pl.BlockSpec((1, d_model, d_ff), lambda b, l: (l, 0, 0)),
                pl.BlockSpec((1, d_ff, d_model), lambda b, l: (l, 0, 0)),
            ],
            out_specs=pl.BlockSpec((batch_block, S, d_model), lambda b, l: (b, 0, 0)),
        ),
        compiler_params=pltpu.CompilerParams(
            dimension_semantics=("parallel", "arbitrary"),
            vmem_limit_bytes=_vmem_limit_bytes(batch_block, S)),
    )(x, bias, keep, wqkv, wf, w1, w2)


def init_params(key):
    """Deterministic synthetic parameters, stacked over layers (fp32 'checkpoint')."""
    keys = jax.random.split(key, 8)
    params = {
        # position2embedding: Linear(d_feature, d_model) with bias
        "pos_w": 0.1 * jax.random.normal(keys[0], (d_feature, d_model), jnp.float32),
        "pos_b": 0.1 * jax.random.normal(keys[1], (d_model,), jnp.float32),
        # Head order: [attn_1 ... attn_6 (block masks), attn_0 (link mask)]
        "wq": 0.05 * jax.random.normal(keys[2], (n_layers, N_ATTN, d_model, d_Q), jnp.float32),
        "wk": 0.05 * jax.random.normal(keys[3], (n_layers, N_ATTN, d_model, d_Q), jnp.float32),
        "wv": 0.05 * jax.random.normal(keys[4], (n_layers, N_ATTN, d_model, d_V), jnp.float32),
        "wf": 0.05 * jax.random.normal(keys[5], (n_layers, N_ATTN, d_V, d_model), jnp.float32),
        "w1": 0.05 * jax.random.normal(keys[6], (n_layers, d_model, d_ff), jnp.float32),
        "w2": 0.05 * jax.random.normal(keys[7], (n_layers, d_ff, d_model), jnp.float32),
    }
    return params


def _stack_qkv_heads(wq, wk, wv):
    """(L, 7, d_model, d) each -> (L, 21, d_model, d): [Q_0..Q_6, K_0..K_6, V_0..V_6]."""
    return jnp.concatenate([wq, wk, wv], axis=1)


def encoder_forward(params, position, blockM, linkM, *,
                    batch_block=None, compute_all_layers=False):
    """Pallas-backed Encoder.forward."""
    # glue: tiny Linear(3, d_model) + bias (plain JAX)
    x = (jnp.dot(position, params["pos_w"]) + params["pos_b"]).astype(jnp.float32)

    # graph_attn_mask: masked where source == 0.  Precompute the additive bias and the
    # multiplicative keep mask (bf16, head-major) so no per-layer mask math runs in-kernel.
    block_mask = (blockM == 0)                                   # [B, 6, S, S]
    link_mask = (linkM == 0)[:, None]                            # [B, 1, S, S]
    mask = jnp.concatenate([block_mask, link_mask], axis=1)      # [B, 7, S, S]
    mask_h = jnp.transpose(mask, (1, 0, 2, 3))                   # [7, B, S, S]
    bias = jnp.where(mask_h, jnp.float32(-1e9), jnp.float32(0.0)).astype(jnp.bfloat16)
    keep = jnp.logical_not(mask_h).astype(jnp.bfloat16)

    # Weights: head-stacked, cast to bf16 (fp32 accumulation in-kernel).
    wqkv = _stack_qkv_heads(params["wq"], params["wk"], params["wv"]).astype(jnp.bfloat16)
    wf = params["wf"].astype(jnp.bfloat16)
    w1 = params["w1"].astype(jnp.bfloat16)
    w2 = params["w2"].astype(jnp.bfloat16)

    if not compute_all_layers:
        # Faithful to the PyTorch loop: layers do NOT chain (each consumes the position
        # embeddings) and only the last layer's output is returned, so computing just the
        # last layer is output-identical and 6x cheaper.
        # TODO(synk): set compute_all_layers=True to also execute the 5 unobservable layers.
        wqkv, wf, w1, w2 = wqkv[-1:], wf[-1:], w1[-1:], w2[-1:]

    return run_encoder_stack(x, bias, keep, wqkv, wf, w1, w2, batch_block=batch_block)


def encoder_forward_ref(params, position, blockM, linkM):
    """Pure-JAX fp32 reference for correctness checking (runs all 6 layers)."""
    x = jnp.dot(position, params["pos_w"]) + params["pos_b"]
    block_mask = (blockM == 0)
    link_mask = (linkM == 0)[:, None]
    mask = jnp.concatenate([block_mask, link_mask], axis=1)      # [B, 7, S, S]

    out = None
    for l in range(n_layers):
        acc = jnp.zeros_like(x)
        for h in range(N_ATTN):
            q = x @ params["wq"][l, h]
            k = x @ params["wk"][l, h]
            v = x @ params["wv"][l, h]
            score = jnp.einsum('bqd,bkd->bqk', q, k) / np.sqrt(d_Q)
            m = mask[:, h]
            score = jnp.where(m, -1e9, score)
            attn = jax.nn.softmax(score, axis=-1)
            attn = jnp.where(m, 0.0, attn)
            ctx = attn @ v
            acc = acc + _layernorm(ctx @ params["wf"][l, h] + x)
        ff = jnp.maximum(acc @ params["w1"][l], 0.0) @ params["w2"][l]
        out = _layernorm(ff + acc)
    return out


if __name__ == "__main__":
    B, S = 2, 8  # small batch / sequence length

    key = jax.random.PRNGKey(0)
    kp, kpos, kblk, klnk = jax.random.split(key, 4)

    params = init_params(kp)
    position = jax.random.normal(kpos, (B, S, d_feature), jnp.float32)
    blockM = jax.random.bernoulli(kblk, 0.6, (B, 6, S, S)).astype(jnp.float32)
    linkM = jax.random.bernoulli(klnk, 0.6, (B, S, S)).astype(jnp.float32)

    out = jax.block_until_ready(encoder_forward(params, position, blockM, linkM))
    ref = encoder_forward_ref(params, position, blockM, linkM)

    np_out = np.asarray(out)
    np_ref = np.asarray(ref)
    assert np_out.shape == (B, S, d_model)
    # bf16 matmul operands (fp32 accumulation) + approx reciprocal => loosened tolerance.
    np.testing.assert_allclose(np_out, np_ref, rtol=3e-2, atol=3e-2)

    print("KERNEL_OK")
</pallas_src>

<mosaic_0001>
module attributes {stable_mosaic.version = 11 : i64} {
  func.func @encoder_kernel(%arg0: i32, %arg1: i32, %arg2: memref<1x8x256xf32, #tpu.memory_space<vmem>>, %arg3: memref<7x1x8x8xbf16, #tpu.memory_space<vmem>>, %arg4: memref<7x1x8x8xbf16, #tpu.memory_space<vmem>>, %arg5: memref<1x21x256x64xbf16, #tpu.memory_space<vmem>>, %arg6: memref<1x7x64x256xbf16, #tpu.memory_space<vmem>>, %arg7: memref<1x256x256xbf16, #tpu.memory_space<vmem>>, %arg8: memref<1x256x256xbf16, #tpu.memory_space<vmem>>, %arg9: memref<1x8x256xf32, #tpu.memory_space<vmem>>) attributes {dimension_semantics = [#tpu.dimension_semantics<parallel>, #tpu.dimension_semantics<arbitrary>], iteration_bounds = array<i64: 2, 1>, scalar_prefetch = 0 : i64, scratch_operands = 0 : i64, tpu.core_type = #tpu.core_type<tc>, window_params = [{transform_indices = @transform_0, window_bounds = array<i64: 1, 8, 256>}, {transform_indices = @transform_1, window_bounds = array<i64: 7, 1, 8, 8>}, {transform_indices = @transform_2, window_bounds = array<i64: 7, 1, 8, 8>}, {transform_indices = @transform_3, window_bounds = array<i64: 1, 21, 256, 64>}, {transform_indices = @transform_4, window_bounds = array<i64: 1, 7, 64, 256>}, {transform_indices = @transform_5, window_bounds = array<i64: 1, 256, 256>}, {transform_indices = @transform_6, window_bounds = array<i64: 1, 256, 256>}, {transform_indices = @transform_7, window_bounds = array<i64: 1, 8, 256>}]} {
    %c0 = arith.constant 0 : index
    %c0_0 = arith.constant 0 : index
    %c0_1 = arith.constant 0 : index
    %0 = vector.load %arg2[%c0, %c0_0, %c0_1] : memref<1x8x256xf32, #tpu.memory_space<vmem>>, vector<1x8x256xf32>
    %1 = vector.shape_cast %0 : vector<1x8x256xf32> to vector<8x256xf32>
    %2 = arith.truncf %1 : vector<8x256xf32> to vector<8x256xbf16>
    %3 = vector.shape_cast %2 : vector<8x256xbf16> to vector<1x8x256xbf16>
    %4 = vector.shape_cast %3 : vector<1x8x256xbf16> to vector<1x8x256xbf16>
    %5 = vector.broadcast %4 : vector<1x8x256xbf16> to vector<21x8x256xbf16>
    %c0_2 = arith.constant 0 : index
    %c0_3 = arith.constant 0 : index
    %c0_4 = arith.constant 0 : index
    %c0_5 = arith.constant 0 : index
    %6 = vector.load %arg5[%c0_2, %c0_3, %c0_4, %c0_5] : memref<1x21x256x64xbf16, #tpu.memory_space<vmem>>, vector<1x21x256x64xbf16>
    %7 = vector.shape_cast %6 : vector<1x21x256x64xbf16> to vector<21x256x64xbf16>
    %cst = arith.constant dense<0.000000e+00> : vector<21x8x64xf32>
    %8 = tpu.matmul %5, %7, %cst {dimension_numbers = #tpu.dot_dimension_numbers<[2], [1], [1], [2], [0, 0, 0, 1, 1, 2], [0], [0]>} : vector<21x8x256xbf16>, vector<21x256x64xbf16>, vector<21x8x64xf32> -> vector<21x8x64xf32>
    %9 = arith.truncf %8 : vector<21x8x64xf32> to vector<21x8x64xbf16>
    %10 = vector.extract_strided_slice %9 {offsets = [0, 0, 0], sizes = [7, 8, 64], strides = [1, 1, 1]} : vector<21x8x64xbf16> to vector<7x8x64xbf16>
    %11 = vector.extract_strided_slice %9 {offsets = [7, 0, 0], sizes = [7, 8, 64], strides = [1, 1, 1]} : vector<21x8x64xbf16> to vector<7x8x64xbf16>
    %12 = vector.extract_strided_slice %9 {offsets = [14, 0, 0], sizes = [7, 8, 64], strides = [1, 1, 1]} : vector<21x8x64xbf16> to vector<7x8x64xbf16>
    "tpu.trace_start"() <{level = 10 : i32, message = "bqd,bkd->bqk"}> : () -> ()
    %cst_6 = arith.constant dense<0.000000e+00> : vector<7x8x8xf32>
    %13 = tpu.matmul %10, %11, %cst_6 {dimension_numbers = #tpu.dot_dimension_numbers<[2], [2], [1], [1], [0, 0, 0, 1, 1, 1], [0], [0]>} : vector<7x8x64xbf16>, vector<7x8x64xbf16>, vector<7x8x8xf32> -> vector<7x8x8xf32>
    "tpu.trace_stop"() : () -> ()
    %cst_7 = arith.constant 1.250000e-01 : f32
    %14 = vector.broadcast %cst_7 : f32 to vector<7x8x8xf32>
    %15 = arith.mulf %13, %14 : vector<7x8x8xf32>
    %c0_8 = arith.constant 0 : index
    %c0_9 = arith.constant 0 : index
    %c0_10 = arith.constant 0 : index
    %c0_11 = arith.constant 0 : index
    %16 = vector.load %arg3[%c0_8, %c0_9, %c0_10, %c0_11] : memref<7x1x8x8xbf16, #tpu.memory_space<vmem>>, vector<7x1x8x8xbf16>
    %17 = vector.shape_cast %16 : vector<7x1x8x8xbf16> to vector<7x8x8xbf16>
    %18 = arith.extf %17 : vector<7x8x8xbf16> to vector<7x8x8xf32>
    %19 = arith.addf %15, %18 : vector<7x8x8xf32>
    %cst_12 = arith.constant dense<0xFF800000> : vector<7x8xf32>
    %20 = vector.multi_reduction <maximumf>, %19, %cst_12 [2] : vector<7x8x8xf32> to vector<7x8xf32>
    %21 = vector.shape_cast %20 : vector<7x8xf32> to vector<7x8x1xf32>
    %22 = vector.broadcast %21 : vector<7x8x1xf32> to vector<7x8x8xf32>
    %23 = arith.subf %19, %22 : vector<7x8x8xf32>
    %24 = math.exp %23 : vector<7x8x8xf32>
    %cst_13 = arith.constant dense<0.000000e+00> : vector<7x8xf32>
    %25 = vector.multi_reduction <add>, %24, %cst_13 [2] : vector<7x8x8xf32> to vector<7x8xf32>
    %26 = vector.shape_cast %25 : vector<7x8xf32> to vector<7x8x1xf32>
    %27 = tpu.reciprocal %26 {approx = true} : vector<7x8x1xf32> -> vector<7x8x1xf32>
    %28 = vector.broadcast %27 : vector<7x8x1xf32> to vector<7x8x8xf32>
    %29 = arith.mulf %24, %28 : vector<7x8x8xf32>
    %c0_14 = arith.constant 0 : index
    %c0_15 = arith.constant 0 : index
    %c0_16 = arith.constant 0 : index
    %c0_17 = arith.constant 0 : index
    %30 = vector.load %arg4[%c0_14, %c0_15, %c0_16, %c0_17] : memref<7x1x8x8xbf16, #tpu.memory_space<vmem>>, vector<7x1x8x8xbf16>
    %31 = vector.shape_cast %30 : vector<7x1x8x8xbf16> to vector<7x8x8xbf16>
    %32 = arith.extf %31 : vector<7x8x8xbf16> to vector<7x8x8xf32>
    %33 = arith.mulf %29, %32 : vector<7x8x8xf32>
    %34 = arith.truncf %33 : vector<7x8x8xf32> to vector<7x8x8xbf16>
    "tpu.trace_start"() <{level = 10 : i32, message = "bqk,bkd->bqd"}> : () -> ()
    %cst_18 = arith.constant dense<0.000000e+00> : vector<7x8x64xf32>
    %35 = tpu.matmul %34, %12, %cst_18 {dimension_numbers = #tpu.dot_dimension_numbers<[2], [1], [1], [2], [0, 0, 0, 1, 1, 2], [0], [0]>} : vector<7x8x8xbf16>, vector<7x8x64xbf16>, vector<7x8x64xf32> -> vector<7x8x64xf32>
    "tpu.trace_stop"() : () -> ()
    %36 = arith.truncf %35 : vector<7x8x64xf32> to vector<7x8x64xbf16>
    %c0_19 = arith.constant 0 : index
    %c0_20 = arith.constant 0 : index
    %c0_21 = arith.constant 0 : index
    %c0_22 = arith.constant 0 : index
    %37 = vector.load %arg6[%c0_19, %c0_20, %c0_21, %c0_22] : memref<1x7x64x256xbf16, #tpu.memory_space<vmem>>, vector<1x7x64x256xbf16>
    %38 = vector.shape_cast %37 : vector<1x7x64x256xbf16> to vector<7x64x256xbf16>
    %cst_23 = arith.constant dense<0.000000e+00> : vector<7x8x256xf32>
    %39 = tpu.matmul %36, %38, %cst_23 {dimension_numbers = #tpu.dot_dimension_numbers<[2], [1], [1], [2], [0, 0, 0, 1, 1, 2], [0], [0]>} : vector<7x8x64xbf16>, vector<7x64x256xbf16>, vector<7x8x256xf32> -> vector<7x8x256xf32>
    %40 = vector.shape_cast %1 : vector<8x256xf32> to vector<1x8x256xf32>
    %41 = vector.broadcast %40 : vector<1x8x256xf32> to vector<7x8x256xf32>
    %42 = arith.addf %39, %41 : vector<7x8x256xf32>
    %cst_24 = arith.constant dense<0.000000e+00> : vector<7x8xf32>
    %43 = vector.multi_reduction <add>, %42, %cst_24 [2] : vector<7x8x256xf32> to vector<7x8xf32>
    %44 = vector.shape_cast %43 : vector<7x8xf32> to vector<7x8x1xf32>
    %cst_25 = arith.constant 2.560000e+02 : f32
    %45 = vector.broadcast %cst_25 : f32 to vector<7x8x1xf32>
    %46 = arith.divf %44, %45 : vector<7x8x1xf32>
    %47 = vector.broadcast %46 : vector<7x8x1xf32> to vector<7x8x256xf32>
    %48 = arith.subf %42, %47 : vector<7x8x256xf32>
    %49 = arith.mulf %48, %48 : vector<7x8x256xf32>
    %cst_26 = arith.constant dense<0.000000e+00> : vector<7x8xf32>
    %50 = vector.multi_reduction <add>, %49, %cst_26 [2] : vector<7x8x256xf32> to vector<7x8xf32>
    %51 = vector.shape_cast %50 : vector<7x8xf32> to vector<7x8x1xf32>
    %cst_27 = arith.constant 2.560000e+02 : f32
    %52 = vector.broadcast %cst_27 : f32 to vector<7x8x1xf32>
    %53 = arith.divf %51, %52 : vector<7x8x1xf32>
    %54 = vector.broadcast %46 : vector<7x8x1xf32> to vector<7x8x256xf32>
    %55 = arith.subf %42, %54 : vector<7x8x256xf32>
    %cst_28 = arith.constant 9.99999974E-6 : f32
    %56 = vector.broadcast %cst_28 : f32 to vector<7x8x1xf32>
    %57 = arith.addf %53, %56 : vector<7x8x1xf32>
    %58 = math.rsqrt %57 : vector<7x8x1xf32>
    %59 = vector.broadcast %58 : vector<7x8x1xf32> to vector<7x8x256xf32>
    %60 = arith.mulf %55, %59 : vector<7x8x256xf32>
    %cst_29 = arith.constant dense<0.000000e+00> : vector<8x256xf32>
    %61 = vector.multi_reduction <add>, %60, %cst_29 [0] : vector<7x8x256xf32> to vector<8x256xf32>
    %62 = arith.truncf %61 : vector<8x256xf32> to vector<8x256xbf16>
    %c0_30 = arith.constant 0 : index
    %c0_31 = arith.constant 0 : index
    %c0_32 = arith.constant 0 : index
    %63 = vector.load %arg7[%c0_30, %c0_31, %c0_32] : memref<1x256x256xbf16, #tpu.memory_space<vmem>>, vector<1x256x256xbf16>
    %64 = vector.shape_cast %63 : vector<1x256x256xbf16> to vector<256x256xbf16>
    %cst_33 = arith.constant dense<0.000000e+00> : vector<8x256xf32>
    %65 = tpu.matmul %62, %64, %cst_33 {dimension_numbers = #tpu.dot_dimension_numbers<[1], [0], [0], [1], [0, 0, 1, 1], [], []>} : vector<8x256xbf16>, vector<256x256xbf16>, vector<8x256xf32> -> vector<8x256xf32>
    %cst_34 = arith.constant 0.000000e+00 : f32
    %66 = vector.broadcast %cst_34 : f32 to vector<8x256xf32>
    %67 = arith.maximumf %65, %66 : vector<8x256xf32>
    %68 = arith.truncf %67 : vector<8x256xf32> to vector<8x256xbf16>
    %c0_35 = arith.constant 0 : index
    %c0_36 = arith.constant 0 : index
    %c0_37 = arith.constant 0 : index
    %69 = vector.load %arg8[%c0_35, %c0_36, %c0_37] : memref<1x256x256xbf16, #tpu.memory_space<vmem>>, vector<1x256x256xbf16>
    %70 = vector.shape_cast %69 : vector<1x256x256xbf16> to vector<256x256xbf16>
    %cst_38 = arith.constant dense<0.000000e+00> : vector<8x256xf32>
    %71 = tpu.matmul %68, %70, %cst_38 {dimension_numbers = #tpu.dot_dimension_numbers<[1], [0], [0], [1], [0, 0, 1, 1], [], []>} : vector<8x256xbf16>, vector<256x256xbf16>, vector<8x256xf32> -> vector<8x256xf32>
    %72 = arith.addf %71, %61 : vector<8x256xf32>
    %cst_39 = arith.constant dense<0.000000e+00> : vector<8xf32>
    %73 = vector.multi_reduction <add>, %72, %cst_39 [1] : vector<8x256xf32> to vector<8xf32>
    %74 = vector.shape_cast %73 : vector<8xf32> to vector<8x1xf32>
    %cst_40 = arith.constant 2.560000e+02 : f32
    %75 = vector.broadcast %cst_40 : f32 to vector<8x1xf32>
    %76 = arith.divf %74, %75 : vector<8x1xf32>
    %77 = vector.broadcast %76 : vector<8x1xf32> to vector<8x256xf32>
    %78 = arith.subf %72, %77 : vector<8x256xf32>
    %79 = arith.mulf %78, %78 : vector<8x256xf32>
    %cst_41 = arith.constant dense<0.000000e+00> : vector<8xf32>
    %80 = vector.multi_reduction <add>, %79, %cst_41 [1] : vector<8x256xf32> to vector<8xf32>
    %81 = vector.shape_cast %80 : vector<8xf32> to vector<8x1xf32>
    %cst_42 = arith.constant 2.560000e+02 : f32
    %82 = vector.broadcast %cst_42 : f32 to vector<8x1xf32>
    %83 = arith.divf %81, %82 : vector<8x1xf32>
    %84 = vector.broadcast %76 : vector<8x1xf32> to vector<8x256xf32>
    %85 = arith.subf %72, %84 : vector<8x256xf32>
    %cst_43 = arith.constant 9.99999974E-6 : f32
    %86 = vector.broadcast %cst_43 : f32 to vector<8x1xf32>
    %87 = arith.addf %83, %86 : vector<8x1xf32>
    %88 = math.rsqrt %87 : vector<8x1xf32>
    %89 = vector.broadcast %88 : vector<8x1xf32> to vector<8x256xf32>
    %90 = arith.mulf %85, %89 : vector<8x256xf32>
    %91 = vector.shape_cast %90 : vector<8x256xf32> to vector<1x8x256xf32>
    %c0_44 = arith.constant 0 : index
    %c0_45 = arith.constant 0 : index
    %c0_46 = arith.constant 0 : index
    %92 = vector.load %arg9[%c0_44, %c0_45, %c0_46] : memref<1x8x256xf32, #tpu.memory_space<vmem>>, vector<1x8x256xf32>
    tpu.vector_store %arg9[%c0_44, %c0_45, %c0_46], %91 {strides = array<i32>} : memref<1x8x256xf32, #tpu.memory_space<vmem>>, vector<1x8x256xf32>,
    return
  }
  func.func @transform_0(%arg0: i32, %arg1: i32) -> (i32, i32, i32) {
    %c0_i32 = arith.constant 0 : i32
    %c0_i32_0 = arith.constant 0 : i32
    %c0_i32_1 = arith.constant 0 : i32
    return %arg0, %c0_i32, %c0_i32_0 : i32, i32, i32
  }
  func.func @transform_1(%arg0: i32, %arg1: i32) -> (i32, i32, i32, i32) {
    %c0_i32 = arith.constant 0 : i32
    %c0_i32_0 = arith.constant 0 : i32
    %c0_i32_1 = arith.constant 0 : i32
    %c0_i32_2 = arith.constant 0 : i32
    return %c0_i32, %arg0, %c0_i32_0, %c0_i32_1 : i32, i32, i32, i32
  }
  func.func @transform_2(%arg0: i32, %arg1: i32) -> (i32, i32, i32, i32) {
    %c0_i32 = arith.constant 0 : i32
    %c0_i32_0 = arith.constant 0 : i32
    %c0_i32_1 = arith.constant 0 : i32
    %c0_i32_2 = arith.constant 0 : i32
    return %c0_i32, %arg0, %c0_i32_0, %c0_i32_1 : i32, i32, i32, i32
  }
  func.func @transform_3(%arg0: i32, %arg1: i32) -> (i32, i32, i32, i32) {
    %c0_i32 = arith.constant 0 : i32
    %c0_i32_0 = arith.constant 0 : i32
    %c0_i32_1 = arith.constant 0 : i32
    %c0_i32_2 = arith.constant 0 : i32
    return %arg1, %c0_i32, %c0_i32_0, %c0_i32_1 : i32, i32, i32, i32
  }
  func.func @transform_4(%arg0: i32, %arg1: i32) -> (i32, i32, i32, i32) {
    %c0_i32 = arith.constant 0 : i32
    %c0_i32_0 = arith.constant 0 : i32
    %c0_i32_1 = arith.constant 0 : i32
    %c0_i32_2 = arith.constant 0 : i32
    return %arg1, %c0_i32, %c0_i32_0, %c0_i32_1 : i32, i32, i32, i32
  }
  func.func @transform_5(%arg0: i32, %arg1: i32) -> (i32, i32, i32) {
    %c0_i32 = arith.constant 0 : i32
    %c0_i32_0 = arith.constant 0 : i32
    %c0_i32_1 = arith.constant 0 : i32
    return %arg1, %c0_i32, %c0_i32_0 : i32, i32, i32
  }
  func.func @transform_6(%arg0: i32, %arg1: i32) -> (i32, i32, i32) {
    %c0_i32 = arith.constant 0 : i32
    %c0_i32_0 = arith.constant 0 : i32
    %c0_i32_1 = arith.constant 0 : i32
    return %arg1, %c0_i32, %c0_i32_0 : i32, i32, i32
  }
  func.func @transform_7(%arg0: i32, %arg1: i32) -> (i32, i32, i32) {
    %c0_i32 = arith.constant 0 : i32
    %c0_i32_0 = arith.constant 0 : i32
    %c0_i32_1 = arith.constant 0 : i32
    return %arg0, %c0_i32, %c0_i32_0 : i32, i32, i32
  }
}

</mosaic_0001>

<bundles_post_ra>
// kernel: tpu_custom_call.1
= control target key start
LH: loop header
LB: loop body
LE: loop exit
PB: predicated region body
PF: predicated region fallthrough
CT: control target
= control target key end

     0   :  { %s10541_s0 = inlined_call_operand.vmem [shape: f32[2,8,256], index: 0, kind: input, shape index: {}]   ;;  %s10542_s1 = inlined_call_operand.vmem [shape: bf16[7,2,8,8], index: 1, kind: input, shape index: {}]   ;;  %s10543_s2 = inlined_call_operand.vmem [shape: bf16[7,2,8,8], index: 2, kind: input, shape index: {}]   ;;  %s10544_s3 = inlined_call_operand.vmem [shape: bf16[1,21,256,64], index: 3, kind: input, shape index: {}]   ;;  %s10545_s4 = inlined_call_operand.vmem [shape: bf16[1,7,64,256], index: 4, kind: input, shape index: {}]   ;;  %s10546_s5 = inlined_call_operand.vmem [shape: bf16[1,256,256], index: 5, kind: input, shape index: {}]   ;;  %s10547_s6 = inlined_call_operand.vmem [shape: bf16[1,256,256], index: 6, kind: input, shape index: {}]   ;;  %s10548_s7 = inlined_call_operand.hbm [shape: f32[2,8,256], index: 7, kind: output, shape index: {}]  }
   0x1   :  { %10549 = sst [smem:[#allocation7_spill]] %s10541_s0 }
   0x2   :  { %12 = vsyncpa [#allocation5], 0 }
   0x3   :  { %14 = vsyncpa [#allocation5 + $0x1], 0  ;;  %s8237_s24 = smov 0   ;;  %s8239_s25 = smov 0  }
   0x4   :  { %s8241_s26 = smov 0   ;;  %s8243_s27 = smov 0  }
   0x5   :  { %s8245_s28 = smov 0   ;;  %s8247_s29 = smov 0  }
   0x6 LB: > { %s5652_s30 = sadd.s32 4294967295, %s8194_s29   ;;  %s5653_s8 = sadd.s32 4294967294, %s8194_s29   ;;  %s8194_s29 = sphi %s8247_s29, %s20_s29   ;;  %s8190_s28 = sphi %s8245_s28, %s10566_s28   ;;  %s8186_s27 = sphi %s8243_s27, %s10565_s27   ;;  %s8182_s26 = sphi %s8241_s26, %s10564_s26   ;;  %s8178_s25 = sphi %s8239_s25, %s10563_s25   ;;  %s8174_s24 = sphi %s8237_s24, %s10562_s24  }
   0x7   : > { %s32_s9 = sadd.s32 1, %s8190_s28  ;;  %s65_s10 = sadd.s32 1, %s8182_s26 }
   0x8   : > { %p34_p0 = scmp.ge.s32.totalorder %s32_s9, 2  ;;  %p72_p1 = scmp.ne.s32.totalorder %s8182_s26, %s8178_s25 }
   0x9   : > { %p73_p2 = scmp.eq.s32.totalorder %s8194_s29, 0  ;;  %p232_p3 = scmp.eq.s32.totalorder %s5652_s30, 1 }
   0xa   : > { %s10568_s9 = smov (%p34_p0, %s32_s9), 0  ;;  %p237_p6 = scmp.ne.s32.totalorder %s8178_s25, %s8174_s24 }
   0xb   : > { %p8276_p4 = por %p73_p2, %p72_p1  ;;  %p8280_p5 = por %p232_p3, %p72_p1 }
   0xc   : > { %s62_s13 = ssub.s32 %s8190_s28, %s10568_s9  ;;  %p238_p8 = scmp.eq.s32.totalorder %s5653_s8, 1 }
   0xd   : > { %p63_p7 = scmp.eq.s32.totalorder %s62_s13, 0  ;;  %p5659_p10 = scmp.ge.s32.totalorder %s8194_s29, 2 }
   0xe   : > { %p8291_p9 = por %p238_p8, %p237_p6 }
   0xf   : > { %s8289_s14 = scalar_select %p63_p7, %s8182_s26, %s65_s10  }
  0x10   : > { %286 = sbr.rel (%p5659_p10) target bundleno = 45 (0x2d), region = 32 }
  0x15   : > { %297 = sbr.rel (!%p8276_p4) target bundleno = 33 (0x21), region = 40  ;;  %s299_s16 = sand.u32 (%p8276_p4), 1, %s8182_s26  }
  0x16   : > { %s5660_s17 = sshll.u32 (%p8276_p4), %s8190_s28, 2  ;;  %s8009_s18 = smul.u32 (%p8276_p4), 28, %s299_s16 }
  0x17   : > { %s303_s21 = scalar_lea.vmem (%p8276_p4), %s10542_s1, %s5660_s17 }
  0x18   : > { %v320_v0 = vld [vmem:[%s303_s21] sm:$0xf] (%p8276_p4)  ;;  %v322_v1 = vld [vmem:[%s303_s21 + $0x8] sm:$0xf] (%p8276_p4)  ;;  %v324_v2 = vld [vmem:[%s303_s21 + $0x10] sm:$0xf] (%p8276_p4) }
  0x19   : > { %s301_s22 = scalar_lea.vmem (%p8276_p4), [#allocation2], %s8009_s18  ;;  %v326_v3 = vld [vmem:[%s303_s21 + $0x18] sm:$0xf] (%p8276_p4)  ;;  %v328_v4 = vld [vmem:[%s303_s21 + $0x20] sm:$0xf] (%p8276_p4) }
  0x1a   : > { %321 = vst [vmem:[%s301_s22] sm:$0xf] %v320_v0  ;;  %v330_v5 = vld [vmem:[%s303_s21 + $0x28] sm:$0xf]  ;;  %v332_v6 = vld [vmem:[%s303_s21 + $0x30] sm:$0xf] }
  0x1b   : > { %323 = vst [vmem:[%s301_s22 + $0x4] sm:$0xf] %v322_v1 }
  0x1c   : > { %325 = vst [vmem:[%s301_s22 + $0x8] sm:$0xf] %v324_v2 }
  0x1d   : > { %327 = vst [vmem:[%s301_s22 + $0xc] sm:$0xf] %v326_v3 }
  0x1e   : > { %329 = vst [vmem:[%s301_s22 + $0x10] sm:$0xf] %v328_v4 }
  0x1f   : > { %331 = vst [vmem:[%s301_s22 + $0x14] sm:$0xf] %v330_v5 }
  0x20   : > { %333 = vst [vmem:[%s301_s22 + $0x18] sm:$0xf] %v332_v6 }
  0x21 PF: > { %371 = sbr.rel (!%p8276_p4) target bundleno = 45 (0x2d), region = 81  ;;  %s373_s23 = sand.u32 (%p8276_p4), 1, %s8182_s26  }
  0x22   : > { %s5661_s30 = sshll.u32 (%p8276_p4), %s8190_s28, 2  ;;  %s8010_s8 = smul.u32 (%p8276_p4), 28, %s373_s23 }
  0x23   : > { %s377_s16 = scalar_lea.vmem (%p8276_p4), %s10543_s2, %s5661_s30 }
  0x24   : > { %v394_v7 = vld [vmem:[%s377_s16] sm:$0xf] (%p8276_p4)  ;;  %v396_v8 = vld [vmem:[%s377_s16 + $0x8] sm:$0xf] (%p8276_p4)  ;;  %v398_v9 = vld [vmem:[%s377_s16 + $0x10] sm:$0xf] (%p8276_p4) }
  0x25   : > { %s375_s17 = scalar_lea.vmem (%p8276_p4), [#allocation3], %s8010_s8  ;;  %v400_v10 = vld [vmem:[%s377_s16 + $0x18] sm:$0xf] (%p8276_p4)  ;;  %v402_v11 = vld [vmem:[%s377_s16 + $0x20] sm:$0xf] (%p8276_p4) }
  0x26   : > { %395 = vst [vmem:[%s375_s17] sm:$0xf] %v394_v7  ;;  %v404_v12 = vld [vmem:[%s377_s16 + $0x28] sm:$0xf]  ;;  %v406_v13 = vld [vmem:[%s377_s16 + $0x30] sm:$0xf] }
  0x27   : > { %397 = vst [vmem:[%s375_s17 + $0x4] sm:$0xf] %v396_v8 }
  0x28   : > { %399 = vst [vmem:[%s375_s17 + $0x8] sm:$0xf] %v398_v9 }
  0x29   : > { %401 = vst [vmem:[%s375_s17 + $0xc] sm:$0xf] %v400_v10 }
  0x2a   : > { %403 = vst [vmem:[%s375_s17 + $0x10] sm:$0xf] %v402_v11 }
  0x2b   : > { %405 = vst [vmem:[%s375_s17 + $0x14] sm:$0xf] %v404_v12 }
  0x2c   : > { %407 = vst [vmem:[%s375_s17 + $0x18] sm:$0xf] %v406_v13 }
  0x2d PF: > { %p5662_p11 = scmp.ge.s32.totalorder %s8194_s29, 1  ;;  %p444_p12 = scmp.lt.s32.totalorder %s8194_s29, 3 }
  0x2f   : > { %p445_p13 = pnand %p5662_p11, %p444_p12 }
  0x30   : > { %p518_p0 = scmp.lt.s32.totalorder (!%p445_p13), %s8186_s27, 1  ;;  %s10553_s0 = sld [smem:[#allocation7_spill]] (!%p445_p13) }
  0x31   : > { %448 = sbr.rel (%p445_p13) target bundleno = 1915 (0x77b), region = 122  ;;  %s9431_s19 = sand.u32 (!%p445_p13), 1, %s8178_s25  }
  0x32   : > { %s8011_s20 = smul.u32 (!%p445_p13), 28, %s9431_s19  ;;  %s7980_s23 = sshll.u32 (!%p445_p13), %s8186_s27, 4 }
  0x34   : > { %s9472_s21 = scalar_lea.vmem (!%p445_p13), [#allocation3], %s8011_s20 }
  0x36   : > { %v7531_v14 = vld [vmem:[%s10544_s3 + $0x38] sm:$0xff]  ;;  %v7530_v18 = vld [vmem:[%s10544_s3 + $0x30] sm:$0xff]  ;;  %v7529_v22 = vld [vmem:[%s10544_s3 + $0x28] sm:$0xff]  ;;  %s519_s16 = scalar_select %p518_p0, %s8186_s27, 1  ;;  %vm3809_vm0 = vcmask 523264   ;;  %vm4080_vm1 = vcmask 1043456  }
  0x37   : > { %v7539_v15 = vld [vmem:[%s10544_s3 + $0x78] sm:$0xff]  ;;  %1322 = vmatpush.bf16.msra.mxu0 %v7531_v14  ;;  %v7538_v19 = vld [vmem:[%s10544_s3 + $0x70] sm:$0xff]  ;;  %v7537_v23 = vld [vmem:[%s10544_s3 + $0x68] sm:$0xff]  ;;  %vm3971_vm2 = vcmask 64512   ;;  %s5473_s27 = scalar_lea.sflag [#allocation5], %s9431_s19 }
  0x38   : > { %v7547_v16 = vld [vmem:[%s10544_s3 + $0xb8] sm:$0xff]  ;;  %1335 = vmatpush.bf16.msra.mxu1 %v7539_v15  ;;  %v7546_v20 = vld [vmem:[%s10544_s3 + $0xb0] sm:$0xff]  ;;  %v7545_v24 = vld [vmem:[%s10544_s3 + $0xa8] sm:$0xff]  ;;  %s7523_s30 = sshll.u32 %s519_s16, 4  ;;  %s9437_s16 = scalar_lea.vmem [#allocation2], %s8011_s20 }
  0x39   : > { %v7555_v17 = vld [vmem:[%s10544_s3 + $0xf8] sm:$0xff]  ;;  %1444 = vmatpush.bf16.msra.mxu2 %v7547_v16  ;;  %v7554_v21 = vld [vmem:[%s10544_s3 + $0xf0] sm:$0xff]  ;;  %v7553_v25 = vld [vmem:[%s10544_s3 + $0xe8] sm:$0xff]  ;;  %s8379_s22 = scalar_lea.vmem %s10553_s0, %s7523_s30  ;;  %s5663_s0 = sshll.u32 %s9431_s19, 4 }
  0x3a   : > { %1457 = vmatpush.bf16.msra.mxu3 %v7555_v17  ;;  %v7528_v26 = vld [vmem:[%s10544_s3 + $0x20] sm:$0xff]  ;;  %v7527_v30 = vld [vmem:[%s10544_s3 + $0x18] sm:$0xff]  ;;  %v7526_v34 = vld [vmem:[%s10544_s3 + $0x10] sm:$0xff]  ;;  %s517_s13 = scalar_lea.vmem [#allocation4], %s5663_s0 }
  0x3b   : > { %1323 = vmatpush.bf16.msra.mxu0 %v7530_v18  ;;  %v7536_v27 = vld [vmem:[%s10544_s3 + $0x60] sm:$0xff]  ;;  %v7535_v31 = vld [vmem:[%s10544_s3 + $0x58] sm:$0xff]  ;;  %v7534_v35 = vld [vmem:[%s10544_s3 + $0x50] sm:$0xff]  ;;  %s5486_s17 = sshll.u32 %s517_s13, 4  ;;  %s5487_s17 = int_to_ptr.vmem [resolvable:$true] %s5486_s17 }
  0x3c   : > { %1336 = vmatpush.bf16.msra.mxu1 %v7538_v19  ;;  %v7544_v28 = vld [vmem:[%s10544_s3 + $0xa0] sm:$0xff]  ;;  %v7543_v32 = vld [vmem:[%s10544_s3 + $0x98] sm:$0xff]  ;;  %v7542_v36 = vld [vmem:[%s10544_s3 + $0x90] sm:$0xff] }
  0x3d   : > { %1445 = vmatpush.bf16.msra.mxu2 %v7546_v20  ;;  %v7552_v29 = vld [vmem:[%s10544_s3 + $0xe0] sm:$0xff]  ;;  %v7551_v33 = vld [vmem:[%s10544_s3 + $0xd8] sm:$0xff]  ;;  %v7550_v37 = vld [vmem:[%s10544_s3 + $0xd0] sm:$0xff] }
  0x3e   : > { %1458 = vmatpush.bf16.msra.mxu3 %v7554_v21  ;;  %v544_v38 = vld [vmem:[%s8379_s22] sm:$0xff]  ;;  %v545_v39 = vld [vmem:[%s8379_s22 + $0x8] sm:$0xff]  ;;  %v7563_v51 = vld [vmem:[%s10544_s3 + $0x138] sm:$0xff] }
  0x3f   : > { %1324 = vmatpush.bf16.msra.mxu0 %v7529_v22  ;;  %v7525_v40 = vld [vmem:[%s10544_s3 + $0x8] sm:$0xff]  ;;  %v546_v42 = vpack.c.bf16 %v545_v39, %v544_v38  ;;  %v7524_v45 = vld [vmem:[%s10544_s3] sm:$0xff]  ;;  %v7571_v52 = vld [vmem:[%s10544_s3 + $0x178] sm:$0xff] }
  0x40   : > { %1337 = vmatpush.bf16.msra.mxu1 %v7537_v23  ;;  %v7533_v41 = vld [vmem:[%s10544_s3 + $0x48] sm:$0xff]  ;;  %v7532_v46 = vld [vmem:[%s10544_s3 + $0x40] sm:$0xff]  ;;  %v7579_v53 = vld [vmem:[%s10544_s3 + $0x1b8] sm:$0xff] }
  0x41   : > { %1446 = vmatpush.bf16.msra.mxu2 %v7545_v24  ;;  %v7541_v43 = vld [vmem:[%s10544_s3 + $0x88] sm:$0xff]  ;;  %v1220_v47 = vunpack.c.l.b16 %v546_v42  ;;  %v1221_v48 = vunpack.c.h.b16 %v546_v42  ;;  %v7540_v49 = vld [vmem:[%s10544_s3 + $0x80] sm:$0xff]  ;;  %v7587_v54 = vld [vmem:[%s10544_s3 + $0x1f8] sm:$0xff] }
  0x42   : > { %1459 = vmatpush.bf16.msra.mxu3 %v7553_v25  ;;  %v7549_v44 = vld [vmem:[%s10544_s3 + $0xc8] sm:$0xff]  ;;  %v7548_v50 = vld [vmem:[%s10544_s3 + $0xc0] sm:$0xff]  ;;  %v7562_v57 = vld [vmem:[%s10544_s3 + $0x130] sm:$0xff] }
  0x43   : > { %1325 = vmatpush.bf16.msra.mxu0 %v7528_v26  ;;  %v8431_v55 = vpack.c.b16 %v1220_v47, %v1220_v47  ;;  %v8433_v56 = vpack.c.b16 %v1221_v48, %v1221_v48  ;;  %v7570_v58 = vld [vmem:[%s10544_s3 + $0x170] sm:$0xff]  ;;  %v7561_v61 = vld [vmem:[%s10544_s3 + $0x128] sm:$0xff]  ;;  %v7560_v1 = vld [vmem:[%s10544_s3 + $0x120] sm:$0xff] }
  0x44   : > { %1338 = vmatpush.bf16.msra.mxu1 %v7536_v27  ;;  %v7578_v59 = vld [vmem:[%s10544_s3 + $0x1b0] sm:$0xff]  ;;  %v7569_v62 = vld [vmem:[%s10544_s3 + $0x168] sm:$0xff]  ;;  %v7568_v2 = vld [vmem:[%s10544_s3 + $0x160] sm:$0xff] }
  0x45   : > { %1447 = vmatpush.bf16.msra.mxu2 %v7544_v28  ;;  %v7586_v60 = vld [vmem:[%s10544_s3 + $0x1f0] sm:$0xff]  ;;  %v7577_v63 = vld [vmem:[%s10544_s3 + $0x1a8] sm:$0xff]  ;;  %v7576_v3 = vld [vmem:[%s10544_s3 + $0x1a0] sm:$0xff] }
  0x46   : > { %1460 = vmatpush.bf16.msra.mxu3 %v7552_v29  ;;  %v7585_v0 = vld [vmem:[%s10544_s3 + $0x1e8] sm:$0xff]  ;;  %v7584_v4 = vld [vmem:[%s10544_s3 + $0x1e0] sm:$0xff]  ;;  %v7559_v5 = vld [vmem:[%s10544_s3 + $0x118] sm:$0xff] }
  0x47   : > { %1326 = vmatpush.bf16.msra.mxu0 %v7527_v30  ;;  %v7567_v6 = vld [vmem:[%s10544_s3 + $0x158] sm:$0xff]  ;;  %v7558_v9 = vld [vmem:[%s10544_s3 + $0x110] sm:$0xff]  ;;  %v7557_v13 = vld [vmem:[%s10544_s3 + $0x108] sm:$0xff] }
  0x48   : > { %1339 = vmatpush.bf16.msra.mxu1 %v7535_v31  ;;  %v7575_v7 = vld [vmem:[%s10544_s3 + $0x198] sm:$0xff]  ;;  %v7566_v10 = vld [vmem:[%s10544_s3 + $0x150] sm:$0xff]  ;;  %v7565_v14 = vld [vmem:[%s10544_s3 + $0x148] sm:$0xff] }
  0x49   : > { %1448 = vmatpush.bf16.msra.mxu2 %v7543_v32  ;;  %v7583_v8 = vld [vmem:[%s10544_s3 + $0x1d8] sm:$0xff]  ;;  %v7574_v11 = vld [vmem:[%s10544_s3 + $0x190] sm:$0xff]  ;;  %v7573_v15 = vld [vmem:[%s10544_s3 + $0x188] sm:$0xff] }
  0x4a   : > { %1461 = vmatpush.bf16.msra.mxu3 %v7551_v33  ;;  %v7582_v12 = vld [vmem:[%s10544_s3 + $0x1d0] sm:$0xff]  ;;  %v7581_v16 = vld [vmem:[%s10544_s3 + $0x1c8] sm:$0xff]  ;;  %v7556_v17 = vld [vmem:[%s10544_s3 + $0x100] sm:$0xff] }
  0x4b   : > { %1327 = vmatpush.bf16.msra.mxu0 %v7526_v34  ;;  %v7564_v18 = vld [vmem:[%s10544_s3 + $0x140] sm:$0xff]  ;;  %v7595_v21 = vld [vmem:[%s10544_s3 + $0x238] sm:$0xff]  ;;  %v7594_v25 = vld [vmem:[%s10544_s3 + $0x230] sm:$0xff] }
  0x4c   : > { %1340 = vmatpush.bf16.msra.mxu1 %v7534_v35  ;;  %v7572_v19 = vld [vmem:[%s10544_s3 + $0x180] sm:$0xff]  ;;  %v7603_v22 = vld [vmem:[%s10544_s3 + $0x278] sm:$0xff]  ;;  %v7602_v26 = vld [vmem:[%s10544_s3 + $0x270] sm:$0xff] }
  0x4d   : > { %1449 = vmatpush.bf16.msra.mxu2 %v7542_v36  ;;  %v7580_v20 = vld [vmem:[%s10544_s3 + $0x1c0] sm:$0xff]  ;;  %v7611_v23 = vld [vmem:[%s10544_s3 + $0x2b8] sm:$0xff]  ;;  %v7610_v27 = vld [vmem:[%s10544_s3 + $0x2b0] sm:$0xff] }
  0x4e   : > { %1462 = vmatpush.bf16.msra.mxu3 %v7550_v37  ;;  %v7619_v24 = vld [vmem:[%s10544_s3 + $0x2f8] sm:$0xff]  ;;  %v7618_v28 = vld [vmem:[%s10544_s3 + $0x2f0] sm:$0xff]  ;;  %v7593_v29 = vld [vmem:[%s10544_s3 + $0x228] sm:$0xff] }
  0x4f   : > { %1328 = vmatpush.bf16.msra.mxu0 %v7525_v40  ;;  %v7601_v30 = vld [vmem:[%s10544_s3 + $0x268] sm:$0xff]  ;;  %v7592_v33 = vld [vmem:[%s10544_s3 + $0x220] sm:$0xff]  ;;  %v7591_v37 = vld [vmem:[%s10544_s3 + $0x218] sm:$0xff] }
  0x50   : > { %1341 = vmatpush.bf16.msra.mxu1 %v7533_v41  ;;  %v7609_v31 = vld [vmem:[%s10544_s3 + $0x2a8] sm:$0xff]  ;;  %v7600_v34 = vld [vmem:[%s10544_s3 + $0x260] sm:$0xff]  ;;  %v7599_v38 = vld [vmem:[%s10544_s3 + $0x258] sm:$0xff] }
  0x51   : > { %1450 = vmatpush.bf16.msra.mxu2 %v7541_v43  ;;  %v7617_v32 = vld [vmem:[%s10544_s3 + $0x2e8] sm:$0xff]  ;;  %v7608_v35 = vld [vmem:[%s10544_s3 + $0x2a0] sm:$0xff]  ;;  %v7607_v39 = vld [vmem:[%s10544_s3 + $0x298] sm:$0xff] }
  0x52   : > { %1463 = vmatpush.bf16.msra.mxu3 %v7549_v44  ;;  %v7616_v36 = vld [vmem:[%s10544_s3 + $0x2e0] sm:$0xff]  ;;  %v7615_v40 = vld [vmem:[%s10544_s3 + $0x2d8] sm:$0xff]  ;;  %v7590_v41 = vld [vmem:[%s10544_s3 + $0x210] sm:$0xff] }
  0x53   : > { %1329 = vmatpush.bf16.msra.mxu0 %v7524_v45  ;;  %v7598_v42 = vld [vmem:[%s10544_s3 + $0x250] sm:$0xff]  ;;  %v7589_v45 = vld [vmem:[%s10544_s3 + $0x208] sm:$0xff] }
  0x54   : > { %1342 = vmatpush.bf16.msra.mxu1 %v7532_v46  ;;  %v7606_v43 = vld [vmem:[%s10544_s3 + $0x290] sm:$0xff]  ;;  %v7597_v46 = vld [vmem:[%s10544_s3 + $0x248] sm:$0xff] }
  0x55   : > { %1451 = vmatpush.bf16.msra.mxu2 %v7540_v49  ;;  %v7614_v44 = vld [vmem:[%s10544_s3 + $0x2d0] sm:$0xff]  ;;  %v7605_v47 = vld [vmem:[%s10544_s3 + $0x288] sm:$0xff]  ;;  %v7588_v49 = vld [vmem:[%s10544_s3 + $0x200] sm:$0xff] }
  0x56   : > { %1464 = vmatpush.bf16.msra.mxu3 %v7548_v50  ;;  %1330 = vmatmul.bf16.vlgmr.msra.gmra.mxu0 %v8431_v55  ;;  %v7613_v48 = vld [vmem:[%s10544_s3 + $0x2c8] sm:$0xff]  ;;  %v7596_v50 = vld [vmem:[%s10544_s3 + $0x240] sm:$0xff] }
  0x57   : > { %1566 = vmatpush.bf16.msrb.mxu0 %v7563_v51  ;;  %1343 = vmatmul.bf16.vlgmr.msra.gmra.mxu1 %v8433_v56  ;;  %v7604_v51 = vld [vmem:[%s10544_s3 + $0x280] sm:$0xff] }
  0x58   : > { %1579 = vmatpush.bf16.msrb.mxu1 %v7571_v52  ;;  %1452 = vmatmul.bf16.vlgmr.msra.gmra.mxu2 %v8431_v55  ;;  %v7612_v52 = vld [vmem:[%s10544_s3 + $0x2c0] sm:$0xff] }
  0x59   : > { %1688 = vmatpush.bf16.msrb.mxu2 %v7579_v53  ;;  %1465 = vmatmul.bf16.vlgmr.msra.gmra.mxu3 %v8433_v56  ;;  %v7627_v53 = vld [vmem:[%s10544_s3 + $0x338] sm:$0xff] }
  0x5a   : > { %1701 = vmatpush.bf16.msrb.mxu3 %v7587_v54  ;;  %v7635_v54 = vld [vmem:[%s10544_s3 + $0x378] sm:$0xff] }
  0x5b   : > { %1567 = vmatpush.bf16.msrb.mxu0 %v7562_v57  ;;  %v7643_v57 = vld [vmem:[%s10544_s3 + $0x3b8] sm:$0xff] }
  0x5c   : > { %1580 = vmatpush.bf16.msrb.mxu1 %v7570_v58  ;;  %v7651_v58 = vld [vmem:[%s10544_s3 + $0x3f8] sm:$0xff] }
  0x5d   : > { %1689 = vmatpush.bf16.msrb.mxu2 %v7578_v59  ;;  %v7626_v59 = vld [vmem:[%s10544_s3 + $0x330] sm:$0xff] }
  0x5e   : > { %1702 = vmatpush.bf16.msrb.mxu3 %v7586_v60  ;;  %v7634_v60 = vld [vmem:[%s10544_s3 + $0x370] sm:$0xff] }
  0x5f   : > { %1568 = vmatpush.bf16.msrb.mxu0 %v7561_v61  ;;  %v7642_v61 = vld [vmem:[%s10544_s3 + $0x3b0] sm:$0xff] }
  0x60   : > { %1581 = vmatpush.bf16.msrb.mxu1 %v7569_v62  ;;  %v7650_v62 = vld [vmem:[%s10544_s3 + $0x3f0] sm:$0xff] }
  0x61   : > { %1690 = vmatpush.bf16.msrb.mxu2 %v7577_v63  ;;  %v7625_v63 = vld [vmem:[%s10544_s3 + $0x328] sm:$0xff] }
  0x62   : > { %1703 = vmatpush.bf16.msrb.mxu3 %v7585_v0  ;;  %v7633_v0 = vld [vmem:[%s10544_s3 + $0x368] sm:$0xff] }
  0x63   : > { %1569 = vmatpush.bf16.msrb.mxu0 %v7560_v1  ;;  %v7641_v1 = vld [vmem:[%s10544_s3 + $0x3a8] sm:$0xff] }
  0x64   : > { %1582 = vmatpush.bf16.msrb.mxu1 %v7568_v2  ;;  %v7649_v2 = vld [vmem:[%s10544_s3 + $0x3e8] sm:$0xff] }
  0x65   : > { %1691 = vmatpush.bf16.msrb.mxu2 %v7576_v3  ;;  %v7624_v3 = vld [vmem:[%s10544_s3 + $0x320] sm:$0xff] }
  0x66   : > { %1704 = vmatpush.bf16.msrb.mxu3 %v7584_v4  ;;  %v7632_v4 = vld [vmem:[%s10544_s3 + $0x360] sm:$0xff] }
  0x67   : > { %1570 = vmatpush.bf16.msrb.mxu0 %v7559_v5  ;;  %v7640_v5 = vld [vmem:[%s10544_s3 + $0x3a0] sm:$0xff] }
  0x68   : > { %1583 = vmatpush.bf16.msrb.mxu1 %v7567_v6  ;;  %v7648_v6 = vld [vmem:[%s10544_s3 + $0x3e0] sm:$0xff] }
  0x69   : > { %1692 = vmatpush.bf16.msrb.mxu2 %v7575_v7  ;;  %v7623_v7 = vld [vmem:[%s10544_s3 + $0x318] sm:$0xff] }
  0x6a   : > { %1705 = vmatpush.bf16.msrb.mxu3 %v7583_v8  ;;  %v7631_v8 = vld [vmem:[%s10544_s3 + $0x358] sm:$0xff] }
  0x6b   : > { %1571 = vmatpush.bf16.msrb.mxu0 %v7558_v9  ;;  %v7639_v9 = vld [vmem:[%s10544_s3 + $0x398] sm:$0xff] }
  0x6c   : > { %1584 = vmatpush.bf16.msrb.mxu1 %v7566_v10  ;;  %v7647_v10 = vld [vmem:[%s10544_s3 + $0x3d8] sm:$0xff] }
  0x6d   : > { %1693 = vmatpush.bf16.msrb.mxu2 %v7574_v11  ;;  %v7622_v11 = vld [vmem:[%s10544_s3 + $0x310] sm:$0xff] }
  0x6e   : > { %1706 = vmatpush.bf16.msrb.mxu3 %v7582_v12  ;;  %v7630_v12 = vld [vmem:[%s10544_s3 + $0x350] sm:$0xff] }
  0x6f   : > { %1572 = vmatpush.bf16.msrb.mxu0 %v7557_v13  ;;  %v7638_v13 = vld [vmem:[%s10544_s3 + $0x390] sm:$0xff] }
  0x70   : > { %1585 = vmatpush.bf16.msrb.mxu1 %v7565_v14  ;;  %v7646_v14 = vld [vmem:[%s10544_s3 + $0x3d0] sm:$0xff] }
  0x71   : > { %1694 = vmatpush.bf16.msrb.mxu2 %v7573_v15  ;;  %v7621_v15 = vld [vmem:[%s10544_s3 + $0x308] sm:$0xff] }
  0x72   : > { %1707 = vmatpush.bf16.msrb.mxu3 %v7581_v16  ;;  %v7629_v16 = vld [vmem:[%s10544_s3 + $0x348] sm:$0xff] }
  0x73   : > { %1573 = vmatpush.bf16.msrb.mxu0 %v7556_v17  ;;  %v7637_v17 = vld [vmem:[%s10544_s3 + $0x388] sm:$0xff] }
  0x74   : > { %1586 = vmatpush.bf16.msrb.mxu1 %v7564_v18  ;;  %v7645_v18 = vld [vmem:[%s10544_s3 + $0x3c8] sm:$0xff] }
  0x75   : > { %1695 = vmatpush.bf16.msrb.mxu2 %v7572_v19  ;;  %v7620_v19 = vld [vmem:[%s10544_s3 + $0x300] sm:$0xff] }
  0x76   : > { %1708 = vmatpush.bf16.msrb.mxu3 %v7580_v20  ;;  %1574 = vmatmul.bf16.vlgmr.msrb.gmra.mxu0 %v8431_v55  ;;  %v7628_v20 = vld [vmem:[%s10544_s3 + $0x340] sm:$0xff] }
  0x77   : > { %1810 = vmatpush.bf16.msra.mxu0 %v7595_v21  ;;  %1587 = vmatmul.bf16.vlgmr.msrb.gmra.mxu1 %v8433_v56  ;;  %v7636_v21 = vld [vmem:[%s10544_s3 + $0x380] sm:$0xff] }
  0x78   : > { %1823 = vmatpush.bf16.msra.mxu1 %v7603_v22  ;;  %1696 = vmatmul.bf16.vlgmr.msrb.gmra.mxu2 %v8431_v55  ;;  %v7644_v22 = vld [vmem:[%s10544_s3 + $0x3c0] sm:$0xff] }
  0x79   : > { %1932 = vmatpush.bf16.msra.mxu2 %v7611_v23  ;;  %1709 = vmatmul.bf16.vlgmr.msrb.gmra.mxu3 %v8433_v56  ;;  %v7659_v23 = vld [vmem:[%s10544_s3 + $0x438] sm:$0xff] }
  0x7a   : > { %1945 = vmatpush.bf16.msra.mxu3 %v7619_v24  ;;  %v7667_v24 = vld [vmem:[%s10544_s3 + $0x478] sm:$0xff] }
  0x7b   : > { %1811 = vmatpush.bf16.msra.mxu0 %v7594_v25  ;;  %v7675_v25 = vld [vmem:[%s10544_s3 + $0x4b8] sm:$0xff] }
  0x7c   : > { %1824 = vmatpush.bf16.msra.mxu1 %v7602_v26  ;;  %v7683_v26 = vld [vmem:[%s10544_s3 + $0x4f8] sm:$0xff] }
  0x7d   : > { %1933 = vmatpush.bf16.msra.mxu2 %v7610_v27  ;;  %v7658_v27 = vld [vmem:[%s10544_s3 + $0x430] sm:$0xff] }
  0x7e   : > { %1946 = vmatpush.bf16.msra.mxu3 %v7618_v28  ;;  %v7666_v28 = vld [vmem:[%s10544_s3 + $0x470] sm:$0xff] }
  0x7f   : > { %1812 = vmatpush.bf16.msra.mxu0 %v7593_v29  ;;  %v7674_v29 = vld [vmem:[%s10544_s3 + $0x4b0] sm:$0xff] }
  0x80   : > { %1825 = vmatpush.bf16.msra.mxu1 %v7601_v30  ;;  %v7682_v30 = vld [vmem:[%s10544_s3 + $0x4f0] sm:$0xff] }
  0x81   : > { %1934 = vmatpush.bf16.msra.mxu2 %v7609_v31  ;;  %v7657_v31 = vld [vmem:[%s10544_s3 + $0x428] sm:$0xff] }
  0x82   : > { %1947 = vmatpush.bf16.msra.mxu3 %v7617_v32  ;;  %v7665_v32 = vld [vmem:[%s10544_s3 + $0x468] sm:$0xff] }
  0x83   : > { %1813 = vmatpush.bf16.msra.mxu0 %v7592_v33  ;;  %v7673_v33 = vld [vmem:[%s10544_s3 + $0x4a8] sm:$0xff] }
  0x84   : > { %1826 = vmatpush.bf16.msra.mxu1 %v7600_v34  ;;  %v7681_v34 = vld [vmem:[%s10544_s3 + $0x4e8] sm:$0xff] }
  0x85   : > { %1935 = vmatpush.bf16.msra.mxu2 %v7608_v35  ;;  %v7656_v35 = vld [vmem:[%s10544_s3 + $0x420] sm:$0xff] }
  0x86   : > { %1948 = vmatpush.bf16.msra.mxu3 %v7616_v36  ;;  %v7664_v36 = vld [vmem:[%s10544_s3 + $0x460] sm:$0xff] }
  0x87   : > { %1814 = vmatpush.bf16.msra.mxu0 %v7591_v37  ;;  %v7672_v37 = vld [vmem:[%s10544_s3 + $0x4a0] sm:$0xff] }
  0x88   : > { %1827 = vmatpush.bf16.msra.mxu1 %v7599_v38  ;;  %v7680_v38 = vld [vmem:[%s10544_s3 + $0x4e0] sm:$0xff] }
  0x89   : > { %1936 = vmatpush.bf16.msra.mxu2 %v7607_v39  ;;  %v7655_v39 = vld [vmem:[%s10544_s3 + $0x418] sm:$0xff] }
  0x8a   : > { %1949 = vmatpush.bf16.msra.mxu3 %v7615_v40  ;;  %v7663_v40 = vld [vmem:[%s10544_s3 + $0x458] sm:$0xff] }
  0x8b   : > { %1815 = vmatpush.bf16.msra.mxu0 %v7590_v41  ;;  %v7671_v41 = vld [vmem:[%s10544_s3 + $0x498] sm:$0xff] }
  0x8c   : > { %1828 = vmatpush.bf16.msra.mxu1 %v7598_v42  ;;  %v7679_v42 = vld [vmem:[%s10544_s3 + $0x4d8] sm:$0xff] }
  0x8d   : > { %1937 = vmatpush.bf16.msra.mxu2 %v7606_v43  ;;  %v7654_v43 = vld [vmem:[%s10544_s3 + $0x410] sm:$0xff] }
  0x8e   : > { %1950 = vmatpush.bf16.msra.mxu3 %v7614_v44  ;;  %v7662_v44 = vld [vmem:[%s10544_s3 + $0x450] sm:$0xff] }
  0x8f   : > { %1816 = vmatpush.bf16.msra.mxu0 %v7589_v45  ;;  %v7670_v45 = vld [vmem:[%s10544_s3 + $0x490] sm:$0xff] }
  0x90   : > { %1829 = vmatpush.bf16.msra.mxu1 %v7597_v46  ;;  %v7678_v46 = vld [vmem:[%s10544_s3 + $0x4d0] sm:$0xff] }
  0x91   : > { %1938 = vmatpush.bf16.msra.mxu2 %v7605_v47  ;;  %v7653_v47 = vld [vmem:[%s10544_s3 + $0x408] sm:$0xff] }
  0x92   : > { %1951 = vmatpush.bf16.msra.mxu3 %v7613_v48  ;;  %v7661_v48 = vld [vmem:[%s10544_s3 + $0x448] sm:$0xff] }
  0x93   : > { %1817 = vmatpush.bf16.msra.mxu0 %v7588_v49  ;;  %v7669_v49 = vld [vmem:[%s10544_s3 + $0x488] sm:$0xff] }
  0x94   : > { %1830 = vmatpush.bf16.msra.mxu1 %v7596_v50  ;;  %v7677_v50 = vld [vmem:[%s10544_s3 + $0x4c8] sm:$0xff] }
  0x95   : > { %1939 = vmatpush.bf16.msra.mxu2 %v7604_v51  ;;  %v7652_v51 = vld [vmem:[%s10544_s3 + $0x400] sm:$0xff] }
  0x96   : > { %1952 = vmatpush.bf16.msra.mxu3 %v7612_v52  ;;  %1818 = vmatmul.bf16.vlgmr.msra.gmra.mxu0 %v8431_v55  ;;  %v7660_v52 = vld [vmem:[%s10544_s3 + $0x440] sm:$0xff] }
  0x97   : > { %2054 = vmatpush.bf16.msrb.mxu0 %v7627_v53  ;;  %1831 = vmatmul.bf16.vlgmr.msra.gmra.mxu1 %v8433_v56  ;;  %v7668_v53 = vld [vmem:[%s10544_s3 + $0x480] sm:$0xff] }
  0x98   : > { %2067 = vmatpush.bf16.msrb.mxu1 %v7635_v54  ;;  %1940 = vmatmul.bf16.vlgmr.msra.gmra.mxu2 %v8431_v55  ;;  %v7676_v54 = vld [vmem:[%s10544_s3 + $0x4c0] sm:$0xff] }
  0x99   : > { %2176 = vmatpush.bf16.msrb.mxu2 %v7643_v57  ;;  %1953 = vmatmul.bf16.vlgmr.msra.gmra.mxu3 %v8433_v56  ;;  %v7691_v57 = vld [vmem:[%s10544_s3 + $0x538] sm:$0xff] }
  0x9a   : > { %2189 = vmatpush.bf16.msrb.mxu3 %v7651_v58  ;;  %v7699_v58 = vld [vmem:[%s10544_s3 + $0x578] sm:$0xff] }
  0x9b   : > { %2055 = vmatpush.bf16.msrb.mxu0 %v7626_v59  ;;  %v7707_v59 = vld [vmem:[%s10544_s3 + $0x5b8] sm:$0xff] }
  0x9c   : > { %2068 = vmatpush.bf16.msrb.mxu1 %v7634_v60  ;;  %v7715_v60 = vld [vmem:[%s10544_s3 + $0x5f8] sm:$0xff] }
  0x9d   : > { %2177 = vmatpush.bf16.msrb.mxu2 %v7642_v61  ;;  %v7690_v61 = vld [vmem:[%s10544_s3 + $0x530] sm:$0xff] }
  0x9e   : > { %2190 = vmatpush.bf16.msrb.mxu3 %v7650_v62  ;;  %v7698_v62 = vld [vmem:[%s10544_s3 + $0x570] sm:$0xff] }
  0x9f   : > { %2056 = vmatpush.bf16.msrb.mxu0 %v7625_v63  ;;  %v7706_v63 = vld [vmem:[%s10544_s3 + $0x5b0] sm:$0xff] }
  0xa0   : > { %2069 = vmatpush.bf16.msrb.mxu1 %v7633_v0  ;;  %v7714_v0 = vld [vmem:[%s10544_s3 + $0x5f0] sm:$0xff] }
  0xa1   : > { %2178 = vmatpush.bf16.msrb.mxu2 %v7641_v1  ;;  %v7689_v1 = vld [vmem:[%s10544_s3 + $0x528] sm:$0xff] }
  0xa2   : > { %2191 = vmatpush.bf16.msrb.mxu3 %v7649_v2  ;;  %v7697_v2 = vld [vmem:[%s10544_s3 + $0x568] sm:$0xff] }
  0xa3   : > { %2057 = vmatpush.bf16.msrb.mxu0 %v7624_v3  ;;  %v7705_v3 = vld [vmem:[%s10544_s3 + $0x5a8] sm:$0xff] }
  0xa4   : > { %2070 = vmatpush.bf16.msrb.mxu1 %v7632_v4  ;;  %v7713_v4 = vld [vmem:[%s10544_s3 + $0x5e8] sm:$0xff] }
  0xa5   : > { %2179 = vmatpush.bf16.msrb.mxu2 %v7640_v5  ;;  %v7688_v5 = vld [vmem:[%s10544_s3 + $0x520] sm:$0xff] }
  0xa6   : > { %2192 = vmatpush.bf16.msrb.mxu3 %v7648_v6  ;;  %v7696_v6 = vld [vmem:[%s10544_s3 + $0x560] sm:$0xff] }
  0xa7   : > { %2058 = vmatpush.bf16.msrb.mxu0 %v7623_v7 }
  0xa8   : > { %2071 = vmatpush.bf16.msrb.mxu1 %v7631_v8  ;;  %v7704_v8 = vld [vmem:[%s10544_s3 + $0x5a0] sm:$0xff] }
  0xa9   : > { %2180 = vmatpush.bf16.msrb.mxu2 %v7639_v9  ;;  %v7712_v9 = vld [vmem:[%s10544_s3 + $0x5e0] sm:$0xff] }
  0xaa   : > { %2193 = vmatpush.bf16.msrb.mxu3 %v7647_v10  ;;  %v7687_v10 = vld [vmem:[%s10544_s3 + $0x518] sm:$0xff] }
  0xab   : > { %2059 = vmatpush.bf16.msrb.mxu0 %v7622_v11  ;;  %v7695_v11 = vld [vmem:[%s10544_s3 + $0x558] sm:$0xff] }
  0xac   : > { %2072 = vmatpush.bf16.msrb.mxu1 %v7630_v12  ;;  %v7703_v12 = vld [vmem:[%s10544_s3 + $0x598] sm:$0xff] }
  0xad   : > { %2181 = vmatpush.bf16.msrb.mxu2 %v7638_v13  ;;  %v7711_v13 = vld [vmem:[%s10544_s3 + $0x5d8] sm:$0xff] }
  0xae   : > { %2194 = vmatpush.bf16.msrb.mxu3 %v7646_v14 }
  0xaf   : > { %2060 = vmatpush.bf16.msrb.mxu0 %v7621_v15 }
  0xb0   : > { %2073 = vmatpush.bf16.msrb.mxu1 %v7629_v16 }
  0xb1   : > { %2182 = vmatpush.bf16.msrb.mxu2 %v7637_v17 }
  0xb2   : > { %2195 = vmatpush.bf16.msrb.mxu3 %v7645_v18  ;;  %v7686_v18 = vld [vmem:[%s10544_s3 + $0x510] sm:$0xff] }
  0xb3   : > { %2061 = vmatpush.bf16.msrb.mxu0 %v7620_v19  ;;  %v7694_v19 = vld [vmem:[%s10544_s3 + $0x550] sm:$0xff] }
  0xb4   : > { %2074 = vmatpush.bf16.msrb.mxu1 %v7628_v20 }
  0xb5   : > { %2183 = vmatpush.bf16.msrb.mxu2 %v7636_v21 }
  0xb6   : > { %2196 = vmatpush.bf16.msrb.mxu3 %v7644_v22  ;;  %2062 = vmatmul.bf16.vlgmr.msrb.gmra.mxu0 %v8431_v55  ;;  %v7702_v22 = vld [vmem:[%s10544_s3 + $0x590] sm:$0xff] }
  0xb7   : > { %2298 = vmatpush.bf16.msra.mxu0 %v7659_v23  ;;  %2075 = vmatmul.bf16.vlgmr.msrb.gmra.mxu1 %v8433_v56  ;;  %v7710_v23 = vld [vmem:[%s10544_s3 + $0x5d0] sm:$0xff] }
  0xb8   : > { %2311 = vmatpush.bf16.msra.mxu1 %v7667_v24  ;;  %2184 = vmatmul.bf16.vlgmr.msrb.gmra.mxu2 %v8431_v55  ;;  %v7685_v24 = vld [vmem:[%s10544_s3 + $0x508] sm:$0xff] }
  0xb9   : > { %2420 = vmatpush.bf16.msra.mxu2 %v7675_v25  ;;  %2197 = vmatmul.bf16.vlgmr.msrb.gmra.mxu3 %v8433_v56  ;;  %v7693_v25 = vld [vmem:[%s10544_s3 + $0x548] sm:$0xff] }
  0xba   : > { %2433 = vmatpush.bf16.msra.mxu3 %v7683_v26  ;;  %v7701_v26 = vld [vmem:[%s10544_s3 + $0x588] sm:$0xff] }
  0xbb   : > { %2299 = vmatpush.bf16.msra.mxu0 %v7658_v27  ;;  %v7709_v27 = vld [vmem:[%s10544_s3 + $0x5c8] sm:$0xff] }
  0xbc   : > { %2312 = vmatpush.bf16.msra.mxu1 %v7666_v28 }
  0xbd   : > { %2421 = vmatpush.bf16.msra.mxu2 %v7674_v29 }
  0xbe   : > { %2434 = vmatpush.bf16.msra.mxu3 %v7682_v30 }
  0xbf   : > { %2300 = vmatpush.bf16.msra.mxu0 %v7657_v31  ;;  %v7684_v31 = vld [vmem:[%s10544_s3 + $0x500] sm:$0xff] }
  0xc0   : > { %2313 = vmatpush.bf16.msra.mxu1 %v7665_v32  ;;  %v7692_v32 = vld [vmem:[%s10544_s3 + $0x540] sm:$0xff] }
  0xc1   : > { %2422 = vmatpush.bf16.msra.mxu2 %v7673_v33  ;;  %v7700_v33 = vld [vmem:[%s10544_s3 + $0x580] sm:$0xff] }
  0xc2   : > { %2435 = vmatpush.bf16.msra.mxu3 %v7681_v34  ;;  %v7708_v34 = vld [vmem:[%s10544_s3 + $0x5c0] sm:$0xff] }
  0xc3   : > { %2301 = vmatpush.bf16.msra.mxu0 %v7656_v35  ;;  %v7723_v35 = vld [vmem:[%s10544_s3 + $0x638] sm:$0xff] }
  0xc4   : > { %2314 = vmatpush.bf16.msra.mxu1 %v7664_v36  ;;  %v7731_v36 = vld [vmem:[%s10544_s3 + $0x678] sm:$0xff] }
  0xc5   : > { %2423 = vmatpush.bf16.msra.mxu2 %v7672_v37  ;;  %v7739_v37 = vld [vmem:[%s10544_s3 + $0x6b8] sm:$0xff] }
  0xc6   : > { %2436 = vmatpush.bf16.msra.mxu3 %v7680_v38  ;;  %v7747_v38 = vld [vmem:[%s10544_s3 + $0x6f8] sm:$0xff] }
  0xc7   : > { %2302 = vmatpush.bf16.msra.mxu0 %v7655_v39  ;;  %v7722_v39 = vld [vmem:[%s10544_s3 + $0x630] sm:$0xff] }
  0xc8   : > { %2315 = vmatpush.bf16.msra.mxu1 %v7663_v40  ;;  %v7730_v40 = vld [vmem:[%s10544_s3 + $0x670] sm:$0xff] }
  0xc9   : > { %2424 = vmatpush.bf16.msra.mxu2 %v7671_v41  ;;  %v7738_v41 = vld [vmem:[%s10544_s3 + $0x6b0] sm:$0xff] }
  0xca   : > { %2437 = vmatpush.bf16.msra.mxu3 %v7679_v42  ;;  %v7746_v42 = vld [vmem:[%s10544_s3 + $0x6f0] sm:$0xff] }
  0xcb   : > { %2303 = vmatpush.bf16.msra.mxu0 %v7654_v43  ;;  %v7721_v43 = vld [vmem:[%s10544_s3 + $0x628] sm:$0xff] }
  0xcc   : > { %2316 = vmatpush.bf16.msra.mxu1 %v7662_v44  ;;  %v7729_v44 = vld [vmem:[%s10544_s3 + $0x668] sm:$0xff] }
  0xcd   : > { %2425 = vmatpush.bf16.msra.mxu2 %v7670_v45  ;;  %v7737_v45 = vld [vmem:[%s10544_s3 + $0x6a8] sm:$0xff] }
  0xce   : > { %2438 = vmatpush.bf16.msra.mxu3 %v7678_v46  ;;  %v7745_v46 = vld [vmem:[%s10544_s3 + $0x6e8] sm:$0xff] }
  0xcf   : > { %2304 = vmatpush.bf16.msra.mxu0 %v7653_v47  ;;  %v7720_v47 = vld [vmem:[%s10544_s3 + $0x620] sm:$0xff] }
  0xd0   : > { %2317 = vmatpush.bf16.msra.mxu1 %v7661_v48  ;;  %v7728_v48 = vld [vmem:[%s10544_s3 + $0x660] sm:$0xff] }
  0xd1   : > { %2426 = vmatpush.bf16.msra.mxu2 %v7669_v49 }
  0xd2   : > { %2439 = vmatpush.bf16.msra.mxu3 %v7677_v50  ;;  %v7736_v50 = vld [vmem:[%s10544_s3 + $0x6a0] sm:$0xff] }
  0xd3   : > { %2305 = vmatpush.bf16.msra.mxu0 %v7652_v51  ;;  %v1331_v7 = vpop.f32.mrf.mxu0  ;;  %v7744_v51 = vld [vmem:[%s10544_s3 + $0x6e0] sm:$0xff] }
  0xd4   : > { %2318 = vmatpush.bf16.msra.mxu1 %v7660_v52  ;;  %v1344_v17 = vpop.f32.mrf.mxu1  ;;  %v7719_v52 = vld [vmem:[%s10544_s3 + $0x618] sm:$0xff] }
  0xd5   : > { %2427 = vmatpush.bf16.msra.mxu2 %v7668_v53  ;;  %v8895_v21 = vadd.f32 %v1344_v17, %v1331_v7  ;;  %v7727_v53 = vld [vmem:[%s10544_s3 + $0x658] sm:$0xff]  ;;  %v7741_v7 = vld [vmem:[%s10544_s3 + $0x6c8] sm:$0xff] }
  0xd6   : > { %2440 = vmatpush.bf16.msra.mxu3 %v7676_v54  ;;  %2306 = vmatmul.bf16.vlgmr.msra.gmra.mxu0 %v8431_v55  ;;  %v7735_v54 = vld [vmem:[%s10544_s3 + $0x698] sm:$0xff] }
  0xd7   : > { %2542 = vmatpush.bf16.msrb.mxu0 %v7691_v57  ;;  %2319 = vmatmul.bf16.vlgmr.msra.gmra.mxu1 %v8433_v56  ;;  %v7743_v57 = vld [vmem:[%s10544_s3 + $0x6d8] sm:$0xff] }
  0xd8   : > { %2555 = vmatpush.bf16.msrb.mxu1 %v7699_v58  ;;  %2428 = vmatmul.bf16.vlgmr.msra.gmra.mxu2 %v8431_v55  ;;  %v7771_v17 = vld [vmem:[%s10544_s3 + $0x7b8] sm:$0xff] }
  0xd9   : > { %2664 = vmatpush.bf16.msrb.mxu2 %v7707_v59  ;;  %2441 = vmatmul.bf16.vlgmr.msra.gmra.mxu3 %v8433_v56 }
  0xda   : > { %2677 = vmatpush.bf16.msrb.mxu3 %v7715_v60 }
  0xdb   : > { %2543 = vmatpush.bf16.msrb.mxu0 %v7690_v61  ;;  %v1453_v14 = vpop.f32.mrf.mxu2  ;;  %v1333_v20 = vpop.f32.mrf.mxu0 }
  0xdc   : > { %2556 = vmatpush.bf16.msrb.mxu1 %v7698_v62  ;;  %v1466_v15 = vpop.f32.mrf.mxu3  ;;  %v1346_v30 = vpop.f32.mrf.mxu1  ;;  %v7718_v62 = vld [vmem:[%s10544_s3 + $0x610] sm:$0xff] }
  0xdd   : > { %2665 = vmatpush.bf16.msrb.mxu2 %v7706_v63  ;;  %v8887_v16 = vadd.f32 %v1466_v15, %v1453_v14  ;;  %v7726_v63 = vld [vmem:[%s10544_s3 + $0x650] sm:$0xff]  ;;  %v7740_v14 = vld [vmem:[%s10544_s3 + $0x6c0] sm:$0xff]  ;;  %v7755_v15 = vld [vmem:[%s10544_s3 + $0x738] sm:$0xff] }
  0xde   : > { %2678 = vmatpush.bf16.msrb.mxu3 %v7714_v0  ;;  %v7754_v20 = vld [vmem:[%s10544_s3 + $0x730] sm:$0xff]  ;;  %v7768_v30 = vld [vmem:[%s10544_s3 + $0x7a0] sm:$0xff] }
  0xdf   : > { %2544 = vmatpush.bf16.msrb.mxu0 %v7689_v1 }
  0xe0   : > { %2557 = vmatpush.bf16.msrb.mxu1 %v7697_v2  ;;  %v7734_v2 = vld [vmem:[%s10544_s3 + $0x690] sm:$0xff] }
  0xe1   : > { %2666 = vmatpush.bf16.msrb.mxu2 %v7705_v3  ;;  %v7742_v3 = vld [vmem:[%s10544_s3 + $0x6d0] sm:$0xff] }
  0xe2   : > { %2679 = vmatpush.bf16.msrb.mxu3 %v7713_v4  ;;  %v7717_v4 = vld [vmem:[%s10544_s3 + $0x608] sm:$0xff] }
  0xe3   : > { %2545 = vmatpush.bf16.msrb.mxu0 %v7688_v5  ;;  %v1455_v28 = vpop.f32.mrf.mxu2  ;;  %v7725_v5 = vld [vmem:[%s10544_s3 + $0x648] sm:$0xff] }
  0xe4   : > { %2558 = vmatpush.bf16.msrb.mxu1 %v7696_v6  ;;  %v1468_v29 = vpop.f32.mrf.mxu3  ;;  %v7733_v6 = vld [vmem:[%s10544_s3 + $0x688] sm:$0xff] }
  0xe5   : > { %2667 = vmatpush.bf16.msrb.mxu2 %v7704_v8  ;;  %v7761_v28 = vld [vmem:[%s10544_s3 + $0x768] sm:$0xff]  ;;  %v7752_v29 = vld [vmem:[%s10544_s3 + $0x720] sm:$0xff] }
  0xe6   : > { %2680 = vmatpush.bf16.msrb.mxu3 %v7712_v9 }
  0xe7   : > { %2546 = vmatpush.bf16.msrb.mxu0 %v7687_v10 }
  0xe8   : > { %2559 = vmatpush.bf16.msrb.mxu1 %v7695_v11  ;;  %v7716_v11 = vld [vmem:[%s10544_s3 + $0x600] sm:$0xff] }
  0xe9   : > { %2668 = vmatpush.bf16.msrb.mxu2 %v7703_v12  ;;  %v7724_v12 = vld [vmem:[%s10544_s3 + $0x640] sm:$0xff] }
  0xea   : > { %2681 = vmatpush.bf16.msrb.mxu3 %v7711_v13  ;;  %v7732_v13 = vld [vmem:[%s10544_s3 + $0x680] sm:$0xff] }
  0xeb   : > { %2547 = vmatpush.bf16.msrb.mxu0 %v7686_v18  ;;  %v7779_v18 = vld [vmem:[%s10544_s3 + $0x7f8] sm:$0xff] }
  0xec   : > { %2560 = vmatpush.bf16.msrb.mxu1 %v7694_v19  ;;  %v7763_v19 = vld [vmem:[%s10544_s3 + $0x778] sm:$0xff] }
  0xed   : > { %2669 = vmatpush.bf16.msrb.mxu2 %v7702_v22  ;;  %v7770_v22 = vld [vmem:[%s10544_s3 + $0x7b0] sm:$0xff] }
  0xee   : > { %2682 = vmatpush.bf16.msrb.mxu3 %v7710_v23  ;;  %v7778_v23 = vld [vmem:[%s10544_s3 + $0x7f0] sm:$0xff] }
  0xef   : > { %2548 = vmatpush.bf16.msrb.mxu0 %v7685_v24  ;;  %v7762_v24 = vld [vmem:[%s10544_s3 + $0x770] sm:$0xff] }
  0xf0   : > { %2561 = vmatpush.bf16.msrb.mxu1 %v7693_v25  ;;  %v7753_v25 = vld [vmem:[%s10544_s3 + $0x728] sm:$0xff] }
  0xf1   : > { %2670 = vmatpush.bf16.msrb.mxu2 %v7701_v26  ;;  %v7769_v26 = vld [vmem:[%s10544_s3 + $0x7a8] sm:$0xff] }
  0xf2   : > { %2683 = vmatpush.bf16.msrb.mxu3 %v7709_v27  ;;  %v7777_v27 = vld [vmem:[%s10544_s3 + $0x7e8] sm:$0xff] }
  0xf3   : > { %2549 = vmatpush.bf16.msrb.mxu0 %v7684_v31  ;;  %v1575_v49 = vpop.f32.mrf.mxu0 }
  0xf4   : > { %2562 = vmatpush.bf16.msrb.mxu1 %v7692_v32  ;;  %v1588_v61 = vpop.f32.mrf.mxu1  ;;  %v7776_v32 = vld [vmem:[%s10544_s3 + $0x7e0] sm:$0xff] }
  0xf5   : > { %2671 = vmatpush.bf16.msrb.mxu2 %v7700_v33  ;;  %v8999_v1 = vadd.f32 %v1588_v61, %v1575_v49  ;;  %v7760_v33 = vld [vmem:[%s10544_s3 + $0x760] sm:$0xff]  ;;  %v7765_v49 = vld [vmem:[%s10544_s3 + $0x788] sm:$0xff]  ;;  %v7787_v61 = vld [vmem:[%s10544_s3 + $0x838] sm:$0xff] }
  0xf6   : > { %2684 = vmatpush.bf16.msrb.mxu3 %v7708_v34  ;;  %2550 = vmatmul.bf16.vlgmr.msrb.gmra.mxu0 %v8431_v55  ;;  %v7751_v34 = vld [vmem:[%s10544_s3 + $0x718] sm:$0xff] }
  0xf7   : > { %2786 = vmatpush.bf16.msra.mxu0 %v7723_v35  ;;  %2563 = vmatmul.bf16.vlgmr.msrb.gmra.mxu1 %v8433_v56  ;;  %v7767_v35 = vld [vmem:[%s10544_s3 + $0x798] sm:$0xff] }
  0xf8   : > { %2799 = vmatpush.bf16.msra.mxu1 %v7731_v36  ;;  %2672 = vmatmul.bf16.vlgmr.msrb.gmra.mxu2 %v8431_v55  ;;  %v7775_v36 = vld [vmem:[%s10544_s3 + $0x7d8] sm:$0xff] }
  0xf9   : > { %2908 = vmatpush.bf16.msra.mxu2 %v7739_v37  ;;  %2685 = vmatmul.bf16.vlgmr.msrb.gmra.mxu3 %v8433_v56 }
  0xfa   : > { %2921 = vmatpush.bf16.msra.mxu3 %v7747_v38 }
  0xfb   : > { %2787 = vmatpush.bf16.msra.mxu0 %v7722_v39  ;;  %v1697_v58 = vpop.f32.mrf.mxu2  ;;  %v1577_v0 = vpop.f32.mrf.mxu0 }
  0xfc   : > { %2800 = vmatpush.bf16.msra.mxu1 %v7730_v40  ;;  %v1710_v59 = vpop.f32.mrf.mxu3  ;;  %v1590_v10 = vpop.f32.mrf.mxu1  ;;  %v7756_v0 = vld [vmem:[%s10544_s3 + $0x740] sm:$0xff] }
  0xfd   : > { %2909 = vmatpush.bf16.msra.mxu2 %v7738_v41  ;;  %v8991_v60 = vadd.f32 %v1710_v59, %v1697_v58  ;;  %v7759_v41 = vld [vmem:[%s10544_s3 + $0x758] sm:$0xff]  ;;  %v7764_v58 = vld [vmem:[%s10544_s3 + $0x780] sm:$0xff]  ;;  %v7793_v10 = vld [vmem:[%s10544_s3 + $0x868] sm:$0xff] }
  0xfe   : > { %2922 = vmatpush.bf16.msra.mxu3 %v7746_v42  ;;  %v7772_v59 = vld [vmem:[%s10544_s3 + $0x7c0] sm:$0xff] }
  0xff   : > { %2788 = vmatpush.bf16.msra.mxu0 %v7721_v43  ;;  %v7750_v43 = vld [vmem:[%s10544_s3 + $0x710] sm:$0xff] }
 0x100   : > { %2801 = vmatpush.bf16.msra.mxu1 %v7729_v44  ;;  %v7766_v44 = vld [vmem:[%s10544_s3 + $0x790] sm:$0xff] }
 0x101   : > { %2910 = vmatpush.bf16.msra.mxu2 %v7737_v45 }
 0x102   : > { %2923 = vmatpush.bf16.msra.mxu3 %v7745_v46  ;;  %v7774_v46 = vld [vmem:[%s10544_s3 + $0x7d0] sm:$0xff] }
 0x103   : > { %2789 = vmatpush.bf16.msra.mxu0 %v7720_v47  ;;  %v1699_v8 = vpop.f32.mrf.mxu2  ;;  %v7758_v47 = vld [vmem:[%s10544_s3 + $0x750] sm:$0xff] }
 0x104   : > { %2802 = vmatpush.bf16.msra.mxu1 %v7728_v48  ;;  %v1712_v9 = vpop.f32.mrf.mxu3  ;;  %v7749_v48 = vld [vmem:[%s10544_s3 + $0x708] sm:$0xff] }
 0x105   : > { %2911 = vmatpush.bf16.msra.mxu2 %v7736_v50  ;;  %v7773_v50 = vld [vmem:[%s10544_s3 + $0x7c8] sm:$0xff] }
 0x106   : > { %2924 = vmatpush.bf16.msra.mxu3 %v7744_v51  ;;  %v7801_v8 = vld [vmem:[%s10544_s3 + $0x8a8] sm:$0xff] }
 0x107   : > { %2790 = vmatpush.bf16.msra.mxu0 %v7719_v52  ;;  %v7809_v9 = vld [vmem:[%s10544_s3 + $0x8e8] sm:$0xff] }
 0x108   : > { %2803 = vmatpush.bf16.msra.mxu1 %v7727_v53 }
 0x109   : > { %2912 = vmatpush.bf16.msra.mxu2 %v7735_v54  ;;  %v7757_v54 = vld [vmem:[%s10544_s3 + $0x748] sm:$0xff] }
 0x10a   : > { %2925 = vmatpush.bf16.msra.mxu3 %v7743_v57  ;;  %v7748_v57 = vld [vmem:[%s10544_s3 + $0x700] sm:$0xff] }
 0x10b   : > { %2791 = vmatpush.bf16.msra.mxu0 %v7718_v62  ;;  %v7803_v62 = vld [vmem:[%s10544_s3 + $0x8b8] sm:$0xff] }
 0x10c   : > { %2804 = vmatpush.bf16.msra.mxu1 %v7726_v63  ;;  %v7811_v63 = vld [vmem:[%s10544_s3 + $0x8f8] sm:$0xff] }
 0x10d   : > { %2913 = vmatpush.bf16.msra.mxu2 %v7734_v2  ;;  %v7795_v2 = vld [vmem:[%s10544_s3 + $0x878] sm:$0xff] }
 0x10e   : > { %2926 = vmatpush.bf16.msra.mxu3 %v7742_v3  ;;  %v7786_v3 = vld [vmem:[%s10544_s3 + $0x830] sm:$0xff] }
 0x10f   : > { %2792 = vmatpush.bf16.msra.mxu0 %v7717_v4  ;;  %v7802_v4 = vld [vmem:[%s10544_s3 + $0x8b0] sm:$0xff] }
 0x110   : > { %2805 = vmatpush.bf16.msra.mxu1 %v7725_v5  ;;  %v7810_v5 = vld [vmem:[%s10544_s3 + $0x8f0] sm:$0xff] }
 0x111   : > { %2914 = vmatpush.bf16.msra.mxu2 %v7733_v6  ;;  %v7794_v6 = vld [vmem:[%s10544_s3 + $0x870] sm:$0xff] }
 0x112   : > { %2927 = vmatpush.bf16.msra.mxu3 %v7741_v7  ;;  %v7785_v7 = vld [vmem:[%s10544_s3 + $0x828] sm:$0xff] }
 0x113   : > { %2793 = vmatpush.bf16.msra.mxu0 %v7716_v11  ;;  %v1819_v31 = vpop.f32.mrf.mxu0  ;;  %v7784_v11 = vld [vmem:[%s10544_s3 + $0x820] sm:$0xff] }
 0x114   : > { %2806 = vmatpush.bf16.msra.mxu1 %v7724_v12  ;;  %v1832_v40 = vpop.f32.mrf.mxu1  ;;  %v7800_v12 = vld [vmem:[%s10544_s3 + $0x8a0] sm:$0xff] }
 0x115   : > { %2915 = vmatpush.bf16.msra.mxu2 %v7732_v13  ;;  %v9097_v42 = vadd.f32 %v1832_v40, %v1819_v31  ;;  %v7808_v13 = vld [vmem:[%s10544_s3 + $0x8e0] sm:$0xff]  ;;  %v7781_v31 = vld [vmem:[%s10544_s3 + $0x808] sm:$0xff] }
 0x116   : > { %2928 = vmatpush.bf16.msra.mxu3 %v7740_v14  ;;  %2794 = vmatmul.bf16.vlgmr.msra.gmra.mxu0 %v8431_v55  ;;  %v7796_v40 = vld [vmem:[%s10544_s3 + $0x880] sm:$0xff] }
 0x117   : > { %3030 = vmatpush.bf16.msrb.mxu0 %v7755_v15  ;;  %2807 = vmatmul.bf16.vlgmr.msra.gmra.mxu1 %v8433_v56  ;;  %v7792_v15 = vld [vmem:[%s10544_s3 + $0x860] sm:$0xff] }
 0x118   : > { %2916 = vmatmul.bf16.vlgmr.msra.gmra.mxu2 %v8431_v55  ;;  %3043 = vmatpush.bf16.msrb.mxu1 %v7763_v19  ;;  %v7807_v19 = vld [vmem:[%s10544_s3 + $0x8d8] sm:$0xff] }
 0x119   : > { %3152 = vmatpush.bf16.msrb.mxu2 %v7771_v17  ;;  %2929 = vmatmul.bf16.vlgmr.msra.gmra.mxu3 %v8433_v56  ;;  %v7783_v17 = vld [vmem:[%s10544_s3 + $0x818] sm:$0xff] }
 0x11a   : > { %3165 = vmatpush.bf16.msrb.mxu3 %v7779_v18  ;;  %v7799_v18 = vld [vmem:[%s10544_s3 + $0x898] sm:$0xff] }
 0x11b   : > { %3031 = vmatpush.bf16.msrb.mxu0 %v7754_v20  ;;  %v1941_v37 = vpop.f32.mrf.mxu2  ;;  %v1821_v45 = vpop.f32.mrf.mxu0 }
 0x11c   : > { %3044 = vmatpush.bf16.msrb.mxu1 %v7762_v24  ;;  %v1954_v38 = vpop.f32.mrf.mxu3  ;;  %v1834_v53 = vpop.f32.mrf.mxu1  ;;  %v7843_v45 = vld [vmem:[%s10544_s3 + $0x9f8] sm:$0xff] }
 0x11d   : > { %3153 = vmatpush.bf16.msrb.mxu2 %v7770_v22  ;;  %v9092_v39 = vadd.f32 %v1954_v38, %v1941_v37  ;;  %v7780_v38 = vld [vmem:[%s10544_s3 + $0x800] sm:$0xff]  ;;  %v7833_v53 = vld [vmem:[%s10544_s3 + $0x9a8] sm:$0xff] }
 0x11e   : > { %3166 = vmatpush.bf16.msrb.mxu3 %v7778_v23  ;;  %v7791_v23 = vld [vmem:[%s10544_s3 + $0x858] sm:$0xff] }
 0x11f   : > { %3032 = vmatpush.bf16.msrb.mxu0 %v7753_v25  ;;  %v7782_v25 = vld [vmem:[%s10544_s3 + $0x810] sm:$0xff] }
 0x120   : > { %3045 = vmatpush.bf16.msrb.mxu1 %v7761_v28  ;;  %v7806_v28 = vld [vmem:[%s10544_s3 + $0x8d0] sm:$0xff] }
 0x121   : > { %3154 = vmatpush.bf16.msrb.mxu2 %v7769_v26 }
 0x122   : > { %3167 = vmatpush.bf16.msrb.mxu3 %v7777_v27  ;;  %v7798_v27 = vld [vmem:[%s10544_s3 + $0x890] sm:$0xff] }
 0x123   : > { %3033 = vmatpush.bf16.msrb.mxu0 %v7752_v29  ;;  %v1943_v51 = vpop.f32.mrf.mxu2 }
 0x124   : > { %3046 = vmatpush.bf16.msrb.mxu1 %v7760_v33  ;;  %v1956_v52 = vpop.f32.mrf.mxu3  ;;  %v7805_v33 = vld [vmem:[%s10544_s3 + $0x8c8] sm:$0xff]  ;;  %v7826_v51 = vld [vmem:[%s10544_s3 + $0x970] sm:$0xff] }
 0x125   : > { %3155 = vmatpush.bf16.msrb.mxu2 %v7768_v30  ;;  %v7790_v30 = vld [vmem:[%s10544_s3 + $0x850] sm:$0xff]  ;;  %v7817_v52 = vld [vmem:[%s10544_s3 + $0x928] sm:$0xff] }
 0x126   : > { %3168 = vmatpush.bf16.msrb.mxu3 %v7776_v32  ;;  %v7797_v32 = vld [vmem:[%s10544_s3 + $0x888] sm:$0xff] }
 0x127   : > { %3034 = vmatpush.bf16.msrb.mxu0 %v7751_v34 }
 0x128   : > { %3047 = vmatpush.bf16.msrb.mxu1 %v7759_v41  ;;  %v7804_v41 = vld [vmem:[%s10544_s3 + $0x8c0] sm:$0xff] }
 0x129   : > { %3156 = vmatpush.bf16.msrb.mxu2 %v7767_v35 }
 0x12a   : > { %3169 = vmatpush.bf16.msrb.mxu3 %v7775_v36  ;;  %v7789_v36 = vld [vmem:[%s10544_s3 + $0x848] sm:$0xff] }
 0x12b   : > { %3035 = vmatpush.bf16.msrb.mxu0 %v7750_v43  ;;  %v7819_v43 = vld [vmem:[%s10544_s3 + $0x938] sm:$0xff] }
 0x12c   : > { %3048 = vmatpush.bf16.msrb.mxu1 %v7758_v47  ;;  %v7827_v47 = vld [vmem:[%s10544_s3 + $0x978] sm:$0xff] }
 0x12d   : > { %3157 = vmatpush.bf16.msrb.mxu2 %v7766_v44  ;;  %v7835_v44 = vld [vmem:[%s10544_s3 + $0x9b8] sm:$0xff] }
 0x12e   : > { %3170 = vmatpush.bf16.msrb.mxu3 %v7774_v46  ;;  %v7788_v46 = vld [vmem:[%s10544_s3 + $0x840] sm:$0xff] }
 0x12f   : > { %3036 = vmatpush.bf16.msrb.mxu0 %v7749_v48  ;;  %v7818_v48 = vld [vmem:[%s10544_s3 + $0x930] sm:$0xff] }
 0x130   : > { %3049 = vmatpush.bf16.msrb.mxu1 %v7757_v54  ;;  %v7841_v54 = vld [vmem:[%s10544_s3 + $0x9e8] sm:$0xff] }
 0x131   : > { %3158 = vmatpush.bf16.msrb.mxu2 %v7765_v49  ;;  %v7834_v49 = vld [vmem:[%s10544_s3 + $0x9b0] sm:$0xff] }
 0x132   : > { %3171 = vmatpush.bf16.msrb.mxu3 %v7773_v50  ;;  %v7842_v50 = vld [vmem:[%s10544_s3 + $0x9f0] sm:$0xff] }
 0x133   : > { %3037 = vmatpush.bf16.msrb.mxu0 %v7748_v57  ;;  %v2063_v14 = vpop.f32.mrf.mxu0  ;;  %v7825_v57 = vld [vmem:[%s10544_s3 + $0x968] sm:$0xff] }
 0x134   : > { %3050 = vmatpush.bf16.msrb.mxu1 %v7756_v0  ;;  %v2076_v24 = vpop.f32.mrf.mxu1  ;;  %v7824_v0 = vld [vmem:[%s10544_s3 + $0x960] sm:$0xff] }
 0x135   : > { %3159 = vmatpush.bf16.msrb.mxu2 %v7764_v58  ;;  %v9206_v26 = vadd.f32 %v2076_v24, %v2063_v14  ;;  %v7816_v58 = vld [vmem:[%s10544_s3 + $0x920] sm:$0xff]  ;;  %v7813_v14 = vld [vmem:[%s10544_s3 + $0x908] sm:$0xff] }
 0x136   : > { %3172 = vmatpush.bf16.msrb.mxu3 %v7772_v59  ;;  %3038 = vmatmul.bf16.vlgmr.msrb.gmra.mxu0 %v8431_v55  ;;  %v7832_v59 = vld [vmem:[%s10544_s3 + $0x9a0] sm:$0xff] }
 0x137   : > { %3274 = vmatpush.bf16.msra.mxu0 %v7787_v61  ;;  %3051 = vmatmul.bf16.vlgmr.msrb.gmra.mxu1 %v8433_v56  ;;  %v7840_v61 = vld [vmem:[%s10544_s3 + $0x9e0] sm:$0xff] }
 0x138   : > { %3160 = vmatmul.bf16.vlgmr.msrb.gmra.mxu2 %v8431_v55  ;;  %3287 = vmatpush.bf16.msra.mxu1 %v7795_v2  ;;  %v7815_v2 = vld [vmem:[%s10544_s3 + $0x918] sm:$0xff] }
 0x139   : > { %3396 = vmatpush.bf16.msra.mxu2 %v7803_v62  ;;  %3173 = vmatmul.bf16.vlgmr.msrb.gmra.mxu3 %v8433_v56 }
 0x13a   : > { %3409 = vmatpush.bf16.msra.mxu3 %v7811_v63 }
 0x13b   : > { %3275 = vmatpush.bf16.msra.mxu0 %v7786_v3  ;;  %v9196_v20 = vpop.f32.mrf.mxu2  ;;  %v2065_v29 = vpop.f32.mrf.mxu0  ;;  %v7831_v3 = vld [vmem:[%s10544_s3 + $0x998] sm:$0xff] }
 0x13c   : > { %3288 = vmatpush.bf16.msra.mxu1 %v7794_v6  ;;  %v9198_v22 = vpop.f32.mrf.mxu3  ;;  %v2078_v37 = vpop.f32.mrf.mxu1  ;;  %v7836_v29 = vld [vmem:[%s10544_s3 + $0x9c0] sm:$0xff] }
 0x13d   : > { %3397 = vmatpush.bf16.msra.mxu2 %v7802_v4  ;;  %v7839_v4 = vld [vmem:[%s10544_s3 + $0x9d8] sm:$0xff] }
 0x13e   : > { %3410 = vmatpush.bf16.msra.mxu3 %v7810_v5  ;;  %v7823_v5 = vld [vmem:[%s10544_s3 + $0x958] sm:$0xff] }
 0x13f   : > { %3276 = vmatpush.bf16.msra.mxu0 %v7785_v7 }
 0x140   : > { %3289 = vmatpush.bf16.msra.mxu1 %v7793_v10  ;;  %v7838_v10 = vld [vmem:[%s10544_s3 + $0x9d0] sm:$0xff] }
 0x141   : > { %3398 = vmatpush.bf16.msra.mxu2 %v7801_v8  ;;  %v7814_v8 = vld [vmem:[%s10544_s3 + $0x910] sm:$0xff] }
 0x142   : > { %3411 = vmatpush.bf16.msra.mxu3 %v7809_v9  ;;  %v7830_v9 = vld [vmem:[%s10544_s3 + $0x990] sm:$0xff] }
 0x143   : > { %3277 = vmatpush.bf16.msra.mxu0 %v7784_v11  ;;  %v2187_v34 = vpop.f32.mrf.mxu2 }
 0x144   : > { %3290 = vmatpush.bf16.msra.mxu1 %v7792_v15  ;;  %v2200_v35 = vpop.f32.mrf.mxu3  ;;  %v7829_v15 = vld [vmem:[%s10544_s3 + $0x988] sm:$0xff] }
 0x145   : > { %3399 = vmatpush.bf16.msra.mxu2 %v7800_v12 }
 0x146   : > { %3412 = vmatpush.bf16.msra.mxu3 %v7808_v13  ;;  %v7822_v13 = vld [vmem:[%s10544_s3 + $0x950] sm:$0xff] }
 0x147   : > { %3278 = vmatpush.bf16.msra.mxu0 %v7783_v17  ;;  %v2199_v17 = vadd.f32 %v9198_v22, %v9196_v20  ;;  %v7812_v20 = vld [vmem:[%s10544_s3 + $0x900] sm:$0xff] }
 0x148   : > { %3291 = vmatpush.bf16.msra.mxu1 %v7791_v23  ;;  %v7828_v22 = vld [vmem:[%s10544_s3 + $0x980] sm:$0xff] }
 0x149   : > { %3400 = vmatpush.bf16.msra.mxu2 %v7799_v18  ;;  %v7837_v18 = vld [vmem:[%s10544_s3 + $0x9c8] sm:$0xff] }
 0x14a   : > { %3413 = vmatpush.bf16.msra.mxu3 %v7807_v19  ;;  %v7821_v19 = vld [vmem:[%s10544_s3 + $0x948] sm:$0xff] }
 0x14b   : > { %3279 = vmatpush.bf16.msra.mxu0 %v7782_v25 }
 0x14c   : > { %3292 = vmatpush.bf16.msra.mxu1 %v7790_v30  ;;  %v7851_v30 = vld [vmem:[%s10544_s3 + $0xa38] sm:$0xff] }
 0x14d   : > { %3401 = vmatpush.bf16.msra.mxu2 %v7798_v27 }
 0x14e   : > { %3414 = vmatpush.bf16.msra.mxu3 %v7806_v28  ;;  %v3795_v28 = vpack.c.bf16 %v2199_v17, %v2199_v17 }
 0x14f   : > { %3280 = vmatpush.bf16.msra.mxu0 %v7781_v31 }
 0x150   : > { %3293 = vmatpush.bf16.msra.mxu1 %v7789_v36  ;;  %v3814_v35 = vsel %vm3809_vm0, %v3795_v28, 0  ;;  %v7850_v36 = vld [vmem:[%s10544_s3 + $0xa30] sm:$0xff] }
 0x151   : > { %3402 = vmatpush.bf16.msra.mxu2 %v7797_v32  ;;  %v7820_v32 = vld [vmem:[%s10544_s3 + $0x940] sm:$0xff] }
 0x152   : > { %3415 = vmatpush.bf16.msra.mxu3 %v7805_v33  ;;  %v7859_v33 = vld [vmem:[%s10544_s3 + $0xa78] sm:$0xff] }
 0x153   : > { %3281 = vmatpush.bf16.msra.mxu0 %v7780_v38  ;;  %v2307_v62 = vpop.f32.mrf.mxu0 }
 0x154   : > { %3294 = vmatpush.bf16.msra.mxu1 %v7788_v46  ;;  %v2320_v63 = vpop.f32.mrf.mxu1 }
 0x155   : > { %3403 = vmatpush.bf16.msra.mxu2 %v7796_v40  ;;  %v2321_v23 = vadd.f32 %v2320_v63, %v2307_v62  ;;  %v7858_v40 = vld [vmem:[%s10544_s3 + $0xa70] sm:$0xff] }
 0x156   : > { %3416 = vmatpush.bf16.msra.mxu3 %v7804_v41  ;;  %3282 = vmatmul.bf16.vlgmr.msra.gmra.mxu0 %v8431_v55  ;;  %v7849_v41 = vld [vmem:[%s10544_s3 + $0xa28] sm:$0xff]  ;;  %v7854_v62 = vld [vmem:[%s10544_s3 + $0xa50] sm:$0xff] }
 0x157   : > { %3518 = vmatpush.bf16.msrb.mxu0 %v7819_v43  ;;  %3295 = vmatmul.bf16.vlgmr.msra.gmra.mxu1 %v8433_v56  ;;  %v3796_v31 = vpack.c.bf16 %v2321_v23, %v2321_v23  ;;  %v7857_v43 = vld [vmem:[%s10544_s3 + $0xa68] sm:$0xff] }
 0x158   : > { %3531 = vmatpush.bf16.msrb.mxu1 %v7827_v47  ;;  %3404 = vmatmul.bf16.vlgmr.msra.gmra.mxu2 %v8431_v55 }
 0x159   : > { %3640 = vmatpush.bf16.msrb.mxu2 %v7835_v44  ;;  %3417 = vmatmul.bf16.vlgmr.msra.gmra.mxu3 %v8433_v56  ;;  %v3833_v37 = vsel %vm3809_vm0, %v3796_v31, 0  ;;  %v7848_v44 = vld [vmem:[%s10544_s3 + $0xa20] sm:$0xff] }
 0x15a   : > { %3653 = vmatpush.bf16.msrb.mxu3 %v7843_v45  ;;  %v7856_v45 = vld [vmem:[%s10544_s3 + $0xa60] sm:$0xff] }
 0x15b   : > { %3519 = vmatpush.bf16.msrb.mxu0 %v7818_v48  ;;  %v2429_v6 = vpop.f32.mrf.mxu2  ;;  %v2309_v11 = vpop.f32.mrf.mxu0 }
 0x15c   : > { %3532 = vmatpush.bf16.msrb.mxu1 %v7826_v51  ;;  %v2442_v7 = vpop.f32.mrf.mxu3  ;;  %v2322_v12 = vpop.f32.mrf.mxu1  ;;  %v7855_v51 = vld [vmem:[%s10544_s3 + $0xa58] sm:$0xff] }
 0x15d   : > { %3641 = vmatpush.bf16.msrb.mxu2 %v7834_v49  ;;  %v2443_v27 = vadd.f32 %v2442_v7, %v2429_v6  ;;  %v7847_v49 = vld [vmem:[%s10544_s3 + $0xa18] sm:$0xff]  ;;  %v7852_v7 = vld [vmem:[%s10544_s3 + $0xa40] sm:$0xff] }
 0x15e   : > { %3654 = vmatpush.bf16.msrb.mxu3 %v7842_v50 }
 0x15f   : > { %3520 = vmatpush.bf16.msrb.mxu0 %v7817_v52  ;;  %v3797_v34 = vpack.c.bf16 %v2443_v27, %v2443_v27 }
 0x160   : > { %3533 = vmatpush.bf16.msrb.mxu1 %v7825_v57  ;;  %v3788_v57 = vpack.c.bf16 %v8895_v21, %v8895_v21  ;;  %v7845_v21 = vld [vmem:[%s10544_s3 + $0xa08] sm:$0xff] }
 0x161   : > { %3642 = vmatpush.bf16.msrb.mxu2 %v7833_v53  ;;  %v3852_v38 = vsel %vm3809_vm0, %v3797_v34, 0 }
 0x162   : > { %3655 = vmatpush.bf16.msrb.mxu3 %v7841_v54 }
 0x163   : > { %3521 = vmatpush.bf16.msrb.mxu0 %v7816_v58  ;;  %v2431_v24 = vpop.f32.mrf.mxu2  ;;  %v7846_v58 = vld [vmem:[%s10544_s3 + $0xa10] sm:$0xff] }
 0x164   : > { %3534 = vmatpush.bf16.msrb.mxu1 %v7824_v0  ;;  %v2444_v25 = vpop.f32.mrf.mxu3 }
 0x165   : > { %3643 = vmatpush.bf16.msrb.mxu2 %v7832_v59  ;;  %v3789_v59 = vpack.c.bf16 %v8887_v16, %v8887_v16  ;;  %v7853_v16 = vld [vmem:[%s10544_s3 + $0xa48] sm:$0xff] }
 0x166   : > { %3656 = vmatpush.bf16.msrb.mxu3 %v7840_v61 }
 0x167   : > { %3522 = vmatpush.bf16.msrb.mxu0 %v7815_v2 }
 0x168   : > { %3535 = vmatpush.bf16.msrb.mxu1 %v7823_v5  ;;  %v7844_v5 = vld [vmem:[%s10544_s3 + $0xa00] sm:$0xff] }
 0x169   : > { %3644 = vmatpush.bf16.msrb.mxu2 %v7831_v3 }
 0x16a   : > { %3657 = vmatpush.bf16.msrb.mxu3 %v7839_v4 }
 0x16b   : > { %3523 = vmatpush.bf16.msrb.mxu0 %v7814_v8  ;;  %v3790_v8 = vpack.c.bf16 %v8999_v1, %v8999_v1 }
 0x16c   : > { %3536 = vmatpush.bf16.msrb.mxu1 %v7822_v13 }
 0x16d   : > { %3645 = vmatpush.bf16.msrb.mxu2 %v7830_v9  ;;  %v3791_v9 = vpack.c.bf16 %v8991_v60, %v8991_v60 }
 0x16e   : > { %3658 = vmatpush.bf16.msrb.mxu3 %v7838_v10 }
 0x16f   : > { %3524 = vmatpush.bf16.msrb.mxu0 %v7813_v14 }
 0x170   : > { %3537 = vmatpush.bf16.msrb.mxu1 %v7821_v19  ;;  %v3793_v19 = vpack.c.bf16 %v9092_v39, %v9092_v39 }
 0x171   : > { %3646 = vmatpush.bf16.msrb.mxu2 %v7829_v15 }
 0x172   : > { %3659 = vmatpush.bf16.msrb.mxu3 %v7837_v18 }
 0x173   : > { %3525 = vmatpush.bf16.msrb.mxu0 %v7812_v20  ;;  %v2551_v46 = vpop.f32.mrf.mxu0 }
 0x174   : > { %3538 = vmatpush.bf16.msrb.mxu1 %v7820_v32  ;;  %v2564_v47 = vpop.f32.mrf.mxu1 }
 0x175   : > { %3647 = vmatpush.bf16.msrb.mxu2 %v7828_v22  ;;  %v2565_v48 = vadd.f32 %v2564_v47, %v2551_v46 }
 0x176   : > { %3660 = vmatpush.bf16.msrb.mxu3 %v7836_v29  ;;  %3526 = vmatmul.bf16.vlgmr.msrb.gmra.mxu0 %v8431_v55 }
 0x177   : > { %3762 = vmatpush.bf16.msra.mxu0 %v7851_v30  ;;  %3539 = vmatmul.bf16.vlgmr.msrb.gmra.mxu1 %v8433_v56  ;;  %v3798_v50 = vpack.c.bf16 %v2565_v48, %v2565_v48 }
 0x178   : > { %3648 = vmatmul.bf16.vlgmr.msrb.gmra.mxu2 %v8431_v55  ;;  %3775 = vmatpush.bf16.msra.mxu1 %v7859_v33 }
 0x179   : > { %3823 = vmatpush.bf16.xpose.msra.mxu2 %v3814_v35  ;;  %3661 = vmatmul.bf16.vlgmr.msrb.gmra.mxu3 %v8433_v56  ;;  %v3871_v52 = vsel %vm3809_vm0, %v3798_v50, 0 }
 0x17a   : > { %3842 = vmatpush.bf16.xpose.msra.mxu3 %v3833_v37 }
 0x17b   : > { %3763 = vmatpush.bf16.msra.mxu0 %v7850_v36  ;;  %v2673_v53 = vpop.f32.mrf.mxu2  ;;  %v2553_v63 = vpop.f32.mrf.mxu0 }
 0x17c   : > { %3776 = vmatpush.bf16.msra.mxu1 %v7858_v40  ;;  %v2686_v54 = vpop.f32.mrf.mxu3  ;;  %v2566_v0 = vpop.f32.mrf.mxu1 }
 0x17d   : > { %v2687_v61 = vadd.f32 %v2686_v54, %v2673_v53 }
 0x17f   : > { %3764 = vmatpush.bf16.msra.mxu0 %v7849_v41  ;;  %v3799_v2 = vpack.c.bf16 %v2687_v61, %v2687_v61 }
 0x180   : > { %3777 = vmatpush.bf16.msra.mxu1 %v7857_v43 }
 0x181   : > { %3861 = vmatpush.bf16.xpose.msrb.mxu2 %v3852_v38  ;;  %v3890_v6 = vsel %vm3809_vm0, %v3799_v2, 0 }
 0x182   : > { %3880 = vmatpush.bf16.xpose.msrb.mxu3 %v3871_v52 }
 0x183   : > { %3765 = vmatpush.bf16.msra.mxu0 %v7848_v44  ;;  %v2675_v3 = vpop.f32.mrf.mxu2 }
 0x184   : > { %3778 = vmatpush.bf16.msra.mxu1 %v7856_v45  ;;  %v2688_v4 = vpop.f32.mrf.mxu3 }
 0x187   : > { %3766 = vmatpush.bf16.msra.mxu0 %v7847_v49 }
 0x188   : > { %7010 = vmatmul.msk.bf16.vlgmr.msra.gmra.mxu2 %vm3809_vm0, %v3788_v57  ;;  %3779 = vmatpush.bf16.msra.mxu1 %v7855_v51 }
 0x189   : > { %7011 = vmatmul.msk.bf16.vlgmr.msra.gmra.mxu3 %vm3809_vm0, %v3789_v59 }
 0x18b   : > { %3767 = vmatpush.bf16.msra.mxu0 %v7846_v58 }
 0x18c   : > { %3780 = vmatpush.bf16.msra.mxu1 %v7854_v62 }
 0x18f   : > { %3768 = vmatpush.bf16.msra.mxu0 %v7845_v21 }
 0x190   : > { %3781 = vmatpush.bf16.msra.mxu1 %v7853_v16 }
 0x193   : > { %3769 = vmatpush.bf16.msra.mxu0 %v7844_v5  ;;  %v2795_v10 = vpop.f32.mrf.mxu0  ;;  %v7982_v5 = vld [vmem:[%s9437_s16] sm:$0xff]  }
 0x194   : > { %3782 = vmatpush.bf16.msra.mxu1 %v7852_v7  ;;  %v2808_v11 = vpop.f32.mrf.mxu1 }
 0x195   : > { %v2809_v12 = vadd.f32 %v2808_v11, %v2795_v10 }
 0x196   : > { %3770 = vmatmul.bf16.vlgmr.msra.gmra.mxu0 %v8431_v55  ;;  %v3792_v55 = vpack.c.bf16 %v9097_v42, %v9097_v42  ;;  %v3794_v42 = vpack.c.bf16 %v9206_v26, %v9206_v26 }
 0x197   : > { %3899 = vmatpush.bf16.xpose.msrb.mxu0 %v3890_v6  ;;  %3783 = vmatmul.bf16.vlgmr.msra.gmra.mxu1 %v8433_v56  ;;  %v3800_v13 = vpack.c.bf16 %v2809_v12, %v2809_v12  ;;  %v7983_v6 = vunpack.c.l.bf16 %v7982_v5 }
 0x198   : > { %7012 = vmatmul.msk.bf16.vlgmr.msrb.gmra.mxu2 %vm3809_vm0, %v3790_v8  ;;  %v7984_v8 = vunpack.c.h.bf16 %v7982_v5 }
 0x199   : > { %7013 = vmatmul.msk.bf16.vlgmr.msrb.gmra.mxu3 %vm3809_vm0, %v3791_v9  ;;  %v3909_v14 = vsel %vm3809_vm0, %v3800_v13, 0 }
 0x19a   : > { %3918 = vmatpush.bf16.xpose.msrb.mxu1 %v3909_v14 }
 0x19b   : > { %v2917_v15 = vpop.f32.mrf.mxu2  ;;  %v2797_v17 = vpop.f32.mrf.mxu0 }
 0x19c   : > { %v2930_v1 = vpop.f32.mrf.mxu3  ;;  %v2810_v56 = vpop.f32.mrf.mxu1 }
 0x19d   : > { %v2931_v60 = vadd.f32 %v2930_v1, %v2917_v15 }
 0x19f   : > { %v3801_v18 = vpack.c.bf16 %v2931_v60, %v2931_v60 }
 0x1a1   : > { %v3928_v23 = vsel %vm3809_vm0, %v3801_v18, 0 }
 0x1a2   : > { %3937 = vmatpush.bf16.xpose.msra.mxu2 %v3928_v23 }
 0x1a3   : > { %v2919_v24 = vpop.f32.mrf.mxu2 }
 0x1a4   : > { %v2932_v25 = vpop.f32.mrf.mxu3 }
 0x1a6   : > { %7014 = vmatmul.msk.bf16.vlgmr.msrb.gmra.mxu0 %vm3809_vm0, %v3792_v55 }
 0x1a7   : > { %7015 = vmatmul.msk.bf16.vlgmr.msrb.gmra.mxu1 %vm3809_vm0, %v3793_v19  ;;  %v8005_v19 = vld [vmem:[%s9437_s16 + $0x8] sm:$0xff]  }
 0x1a8   : > { %v7987_v25 = vunpack.c.l.bf16 %v8005_v19 }
 0x1a9   : > { %7016 = vmatmul.msk.bf16.vlgmr.msra.gmra.mxu2 %vm3809_vm0, %v3794_v42 }
 0x1b3   : > { %v3039_v27 = vpop.f32.mrf.mxu0 }
 0x1b4   : > { %v3052_v20 = vpop.f32.mrf.mxu1 }
 0x1b5   : > { %v3053_v22 = vadd.f32 %v3052_v20, %v3039_v27  ;;  %v7988_v27 = vunpack.c.h.bf16 %v8005_v19 }
 0x1b7   : > { %v3802_v30 = vpack.c.bf16 %v3053_v22, %v3053_v22 }
 0x1b9   : > { %v4082_v39 = vsel %vm4080_vm1, %v3802_v30, 0 }
 0x1ba   : > { %4091 = vmatpush.bf16.msra.mxu3 %v4082_v39 }
 0x1bb   : > { %v3161_v28 = vpop.f32.mrf.mxu2  ;;  %v3041_v34 = vpop.f32.mrf.mxu0 }
 0x1bc   : > { %v3174_v29 = vpop.f32.mrf.mxu3  ;;  %v3054_v35 = vpop.f32.mrf.mxu1 }
 0x1bd   : > { %v3175_v31 = vadd.f32 %v3174_v29, %v3161_v28 }
 0x1bf   : > { %v3803_v32 = vpack.c.bf16 %v3175_v31, %v3175_v31  ;;  %v8006_v31 = vld [vmem:[%s9437_s16 + $0x10] sm:$0xff]  }
 0x1c0   : > { %v7991_v34 = vunpack.c.l.bf16 %v8006_v31 }
 0x1c1   : > { %v4101_v33 = vsel %vm4080_vm1, %v3803_v32, 0 }
 0x1c2   : > { %4110 = vmatpush.bf16.msra.mxu0 %v4101_v33 }
 0x1c3   : > { %v3163_v26 = vpop.f32.mrf.mxu2 }
 0x1c4   : > { %v3176_v36 = vpop.f32.mrf.mxu3 }
 0x1d3   : > { %v3283_v37 = vpop.f32.mrf.mxu0 }
 0x1d4   : > { %v3296_v38 = vpop.f32.mrf.mxu1 }
 0x1d5   : > { %v3297_v40 = vadd.f32 %v3296_v38, %v3283_v37 }
 0x1d7   : > { %v3804_v43 = vpack.c.bf16 %v3297_v40, %v3297_v40 }
 0x1d9   : > { %v4120_v46 = vsel %vm4080_vm1, %v3804_v43, 0  ;;  %v7992_v43 = vunpack.c.h.bf16 %v8006_v31 }
 0x1da   : > { %4129 = vmatpush.bf16.msra.mxu1 %v4120_v46 }
 0x1db   : > { %v3405_v41 = vpop.f32.mrf.mxu2  ;;  %v3285_v47 = vpop.f32.mrf.mxu0 }
 0x1dc   : > { %v3418_v44 = vpop.f32.mrf.mxu3  ;;  %v3298_v49 = vpop.f32.mrf.mxu1 }
 0x1dd   : > { %v3419_v45 = vadd.f32 %v3418_v44, %v3405_v41  ;;  %v3956_v49 = vld [vmem:[%s9437_s16 + $0x18] sm:$0xf]  ;;  %s8136_s16 = scalar_lea.hbm %s10548_s7, 32 }
 0x1df   : > { %v3805_v48 = vpack.c.bf16 %v3419_v45, %v3419_v45 }
 0x1e1   : > { %v4139_v50 = vsel %vm4080_vm1, %v3805_v48, 0 }
 0x1e2   : > { %4148 = vmatpush.bf16.msrb.mxu2 %v4139_v50  ;;  %v3963_v50 = vunpack.c.l.bf16 %v3956_v49 }
 0x1e3   : > { %v3407_v51 = vpop.f32.mrf.mxu2 }
 0x1e4   : > { %v3420_v52 = vpop.f32.mrf.mxu3 }
 0x1f3   : > { %v3527_v53 = vpop.f32.mrf.mxu0 }
 0x1f4   : > { %v3540_v54 = vpop.f32.mrf.mxu1 }
 0x1f5   : > { %v3541_v57 = vadd.f32 %v3540_v54, %v3527_v53 }
 0x1f7   : > { %v3806_v59 = vpack.c.bf16 %v3541_v57, %v3541_v57 }
 0x1f9   : > { %v4158_v63 = vsel %vm4080_vm1, %v3806_v59, 0 }
 0x1fa   : > { %4167 = vmatpush.bf16.msrb.mxu3 %v4158_v63 }
 0x1fb   : > { %v3649_v58 = vpop.f32.mrf.mxu2  ;;  %v3529_v0 = vpop.f32.mrf.mxu0 }
 0x1fc   : > { %v3662_v61 = vpop.f32.mrf.mxu3  ;;  %v3542_v2 = vpop.f32.mrf.mxu1 }
 0x1fd   : > { %v3663_v62 = vadd.f32 %v3662_v61, %v3649_v58 }
 0x1ff   : > { %v3807_v21 = vpack.c.bf16 %v3663_v62, %v3663_v62 }
 0x201   : > { %v4177_v16 = vsel %vm4080_vm1, %v3807_v21, 0 }
 0x202   : > { %4186 = vmatpush.bf16.msrb.mxu0 %v4177_v16 }
 0x203   : > { %v3651_v3 = vpop.f32.mrf.mxu2 }
 0x204   : > { %v3664_v4 = vpop.f32.mrf.mxu3 }
 0x20b   : > { %v3825_v7 = vpop.f32.mrf.mxu2 }
 0x20c   : > { %v3943_v9 = vmul.f32 0.125, %v3825_v7  ;;  %v3844_v10 = vpop.f32.mrf.mxu3 }
 0x20d   : > { %v3944_v11 = vmul.f32 0.125, %v3844_v10 }
 0x20e   : > { %v3964_v12 = vadd.f32 %v7983_v6, %v3943_v9 }
 0x20f   : > { %v3965_v13 = vadd.f32 %v7984_v8, %v3944_v11 }
 0x210   : > { %v3972_v14 = vsel %vm3971_vm2, %v3964_v12, -inf }
 0x211   : > { %v3975_v55 = vsel %vm3971_vm2, %v3965_v13, -inf  ;;  %3973 = vmax.xlane.f32.xlu0 %v3972_v14 }
 0x212   : > { %3976 = vmax.xlane.f32.xlu1 %v3975_v55 }
 0x213   : > { %v3771_v15 = vpop.f32.mrf.mxu0  ;;  %v3827_v1 = vpop.f32.mrf.mxu2 }
 0x214   : > { %v3846_v17 = vpop.f32.mrf.mxu3  ;;  %v3784_v60 = vpop.f32.mrf.mxu1 }
 0x215   : > { %v3785_v56 = vadd.f32 %v3784_v60, %v3771_v15 }
 0x217   : > { %v3808_v18 = vpack.c.bf16 %v3785_v56, %v3785_v56 }
 0x219   : > { %v4196_v23 = vsel %vm4080_vm1, %v3808_v18, 0 }
 0x21a   : > { %4205 = vmatpush.bf16.msrb.mxu1 %v4196_v23 }
 0x21b   : > { %v3773_v24 = vpop.f32.mrf.mxu0  ;;  %v3863_v42 = vpop.f32.mrf.mxu2 }
 0x21c   : > { %v3945_v20 = vmul.f32 0.125, %v3863_v42  ;;  %v3882_v22 = vpop.f32.mrf.mxu3  ;;  %v3786_v28 = vpop.f32.mrf.mxu1 }
 0x21d   : > { %v3946_v29 = vmul.f32 0.125, %v3882_v22 }
 0x21e   : > { %v3966_v30 = vadd.f32 %v7987_v25, %v3945_v20 }
 0x21f   : > { %v3967_v39 = vadd.f32 %v7988_v27, %v3946_v29  ;;  %v7994_v29 = vld [vmem:[%s9472_s21] sm:$0xff]  }
 0x220   : > { %v3978_v32 = vsel %vm3971_vm2, %v3966_v30, -inf }
 0x221   : > { %v3981_v33 = vsel %vm3971_vm2, %v3967_v39, -inf  ;;  %3979 = vmax.xlane.f32.xlu0 %v3978_v32 }
 0x222   : > { %3982 = vmax.xlane.f32.xlu2 %v3981_v33 }
 0x223   : > { %v3901_v35 = vpop.f32.mrf.mxu0  ;;  %v3865_v36 = vpop.f32.mrf.mxu2 }
 0x224   : > { %v3947_v26 = vmul.f32 0.125, %v3901_v35  ;;  %v3884_v37 = vpop.f32.mrf.mxu3  ;;  %v3920_v40 = vpop.f32.mrf.mxu1 }
 0x225   : > { %v3948_v44 = vmul.f32 0.125, %v3920_v40  ;;  %v8007_v40 = vld [vmem:[%s9472_s21 + $0x8] sm:$0xff]  }
 0x226   : > { %v3968_v38 = vadd.f32 %v7991_v34, %v3947_v26 }
 0x227   : > { %v3969_v46 = vadd.f32 %v7992_v43, %v3948_v44 }
 0x228   : > { %v3984_v41 = vsel %vm3971_vm2, %v3968_v38, -inf }
 0x229   : > { %3985 = vmax.xlane.f32.xlu1 %v3984_v41  ;;  %v3987_v48 = vsel %vm3971_vm2, %v3969_v46, -inf  ;;  %v7999_v41 = vunpack.c.l.bf16 %v8007_v40 }
 0x22b   : > { %v3903_v45 = vpop.f32.mrf.mxu0 }
 0x22c   : > { %v3922_v47 = vpop.f32.mrf.mxu1  ;;  %v3939_v51 = vpop.f32.mrf.mxu2  ;;  %v7084_v45 = vld [vmem:[%s10545_s4 + $0x70] sm:$0xf] }
 0x22d   : > { %v3949_v52 = vmul.f32 0.125, %v3939_v51  ;;  %v7874_v47 = vld [vmem:[%s10545_s4 + $0x74] sm:$0xf]  ;;  %v7086_v51 = vld [vmem:[%s10545_s4 + $0x78] sm:$0xf0] }
 0x22f   : > { %v3970_v53 = vadd.f32 %v3963_v50, %v3949_v52  ;;  %v7076_v52 = vld [vmem:[%s10545_s4 + $0x60] sm:$0xf] }
 0x231   : > { %3988 = vmax.xlane.f32.xlu1 %v3987_v48  ;;  %v3990_v54 = vsel %vm3971_vm2, %v3970_v53, -inf }
 0x232   : > { %3991 = vmax.xlane.f32.xlu0 %v3990_v54  ;;  %v8008_v54 = vld [vmem:[%s9472_s21 + $0x10] sm:$0xff]  }
 0x234   : > { %v3941_v57 = vpop.f32.mrf.mxu2 }
 0x235   : > { %v7050_v57 = vld [vmem:[%s10545_s4 + $0x30] sm:$0xf] }
 0x284   : > { %v3974_v58 = vpop.xlane.xlu0 %3973 }
 0x285   : > { %v3977_v59 = vpop.xlane.xlu1 %3976  ;;  %v3993_v61 = vsub.f32 %v3964_v12, %v3974_v58 }
 0x286   : > { %v3994_v62 = vsub.f32 %v3965_v13, %v3977_v59 }
 0x287   : > { %v4000_v63 = vmul.f32 1.442695, %v3993_v61  ;;  %v7867_v61 = vld [vmem:[%s10545_s4 + $0x34] sm:$0xf0] }
 0x288   : > { %v4002_v0 = vmul.f32 1.442695, %v3994_v62  ;;  %v7866_v62 = vld [vmem:[%s10545_s4 + $0x34] sm:$0xf] }
 0x289   : > { %8068 = vpow2.f32 %v4000_v63  ;;  %v7052_v63 = vld [vmem:[%s10545_s4 + $0x38] sm:$0xf0] }
 0x28a   : > { %8070 = vpow2.f32 %v4002_v0  ;;  %v7089_v0 = vor.u32 %v7874_v47, %v7086_v51  ;;  %v7862_v47 = vld [vmem:[%s10545_s4 + $0x14] sm:$0xf]  ;;  %v7026_v51 = vld [vmem:[%s10545_s4] sm:$0xf] }
 0x28f   : > { %v8069_v21 = vpop.eup %8068 }
 0x290   : > { %v8071_v2 = vpop.eup %8070  ;;  %v4014_v16 = vsel %vm3971_vm2, %v8069_v21, 0.0 }
 0x291   : > { %v4017_v3 = vsel %vm3971_vm2, %v8071_v2, 0.0  ;;  %4015 = vadd.xlane.f32.xlu2 %v4014_v16  ;;  %v7055_v16 = vor.u32 %v7866_v62, %v7052_v63  ;;  %v7882_v62 = vld [vmem:[%s10545_s4 + $0xb4] sm:$0xf] }
 0x292   : > { %4018 = vadd.xlane.f32.xlu0 %v4017_v3  ;;  %v7068_v3 = vld [vmem:[%s10545_s4 + $0x50] sm:$0xf] }
 0x294   : > { %v3980_v4 = vpop.xlane.xlu0 %3979 }
 0x295   : > { %v3983_v5 = vpop.xlane.xlu2 %3982  ;;  %v3995_v6 = vsub.f32 %v3966_v30, %v3980_v4  ;;  %v7995_v30 = vunpack.c.l.bf16 %v7994_v29  ;;  %v7871_v4 = vld [vmem:[%s10545_s4 + $0x54] sm:$0xf0] }
 0x296   : > { %v3996_v7 = vsub.f32 %v3967_v39, %v3983_v5  ;;  %v7996_v39 = vunpack.c.h.bf16 %v7994_v29 }
 0x297   : > { %v4004_v8 = vmul.f32 1.442695, %v3995_v6  ;;  %v7078_v6 = vld [vmem:[%s10545_s4 + $0x68] sm:$0xf0] }
 0x298   : > { %v4006_v9 = vmul.f32 1.442695, %v3996_v7  ;;  %v7042_v7 = vld [vmem:[%s10545_s4 + $0x20] sm:$0xf] }
 0x299   : > { %8072 = vpow2.f32 %v4004_v8  ;;  %v7865_v8 = vld [vmem:[%s10545_s4 + $0x24] sm:$0xf0] }
 0x29a   : > { %8074 = vpow2.f32 %v4006_v9  ;;  %v8003_v9 = vunpack.c.l.bf16 %v8008_v54 }
 0x29c   : > { %v3986_v10 = vpop.xlane.xlu1 %3985 }
 0x29d   : > { %v3997_v11 = vsub.f32 %v3968_v38, %v3986_v10  ;;  %v7043_v10 = vor.u32 %v7865_v8, %v7042_v7  ;;  %v7102_v7 = vld [vmem:[%s10545_s4 + $0x90] sm:$0xf]  ;;  %v7879_v8 = vld [vmem:[%s10545_s4 + $0x94] sm:$0xf0] }
 0x29f   : > { %v4008_v12 = vmul.f32 1.442695, %v3997_v11  ;;  %v8073_v13 = vpop.eup %8072  ;;  %v7864_v11 = vld [vmem:[%s10545_s4 + $0x24] sm:$0xf] }
 0x2a0   : > { %v4020_v14 = vsel %vm3971_vm2, %v8073_v13, 0.0  ;;  %v9454_v1 = vpop.eup %8074 }
 0x2a1   : > { %8076 = vpow2.f32 %v4008_v12  ;;  %4021 = vadd.xlane.f32.xlu2 %v4020_v14  ;;  %v4023_v18 = vsel %vm3971_vm2, %v9454_v1, 0.0  ;;  %v7044_v12 = vld [vmem:[%s10545_s4 + $0x28] sm:$0xf0]  ;;  %v8000_v14 = vunpack.c.h.bf16 %v8007_v40  ;;  %v7869_v40 = vld [vmem:[%s10545_s4 + $0x44] sm:$0xf0] }
 0x2a4   : > { %v3989_v55 = vpop.xlane.xlu1 %3988 }
 0x2a5   : > { %v3998_v15 = vsub.f32 %v3969_v46, %v3989_v55  ;;  %v3992_v19 = vpop.xlane.xlu0 %3991  ;;  %v7875_v46 = vld [vmem:[%s10545_s4 + $0x74] sm:$0xf0]  ;;  %v7069_v55 = vor.u32 %v7871_v4, %v7068_v3  ;;  %v7880_v3 = vld [vmem:[%s10545_s4 + $0xa4] sm:$0xf]  ;;  %v7112_v4 = vld [vmem:[%s10545_s4 + $0xa8] sm:$0xf0] }
 0x2a6   : > { %v3999_v24 = vsub.f32 %v3970_v53, %v3992_v19  ;;  %v7085_v50 = vor.u32 %v7875_v46, %v7084_v45  ;;  %v7873_v53 = vld [vmem:[%s10545_s4 + $0x64] sm:$0xf0]  ;;  %v7034_v45 = vld [vmem:[%s10545_s4 + $0x10] sm:$0xf]  ;;  %v7863_v46 = vld [vmem:[%s10545_s4 + $0x14] sm:$0xf0] }
 0x2a7   : > { %v9456_v17 = vpop.eup %8076  ;;  %v4010_v60 = vmul.f32 1.442695, %v3998_v15  ;;  %v7077_v59 = vor.u32 %v7873_v53, %v7076_v52  ;;  %v7047_v15 = vor.u32 %v7864_v11, %v7044_v12  ;;  %v7861_v52 = vld [vmem:[%s10545_s4 + $0x4] sm:$0xf0]  ;;  %v7860_v53 = vld [vmem:[%s10545_s4 + $0x4] sm:$0xf] }
 0x2a8   : > { %v4026_v56 = vsel %vm3971_vm2, %v9456_v17, 0.0  ;;  %v4012_v42 = vmul.f32 1.442695, %v3999_v24  ;;  %v7104_v11 = vld [vmem:[%s10545_s4 + $0x98] sm:$0xf0] }
 0x2a9   : > { %8078 = vpow2.f32 %v4010_v60  ;;  %4027 = vadd.xlane.f32.xlu1 %v4026_v56  ;;  %4024 = vadd.xlane.f32.xlu2 %v4023_v18  ;;  %v7152_v12 = vld [vmem:[%s10545_s4 + $0xf0] sm:$0xf] }
 0x2aa   : > { %8080 = vpow2.f32 %v4012_v42  ;;  %v7070_v42 = vld [vmem:[%s10545_s4 + $0x58] sm:$0xf0] }
 0x2af   : > { %v9462_v23 = vpop.eup %8078 }
 0x2b0   : > { %v4029_v25 = vsel %vm3971_vm2, %v9462_v23, 0.0  ;;  %v9466_v27 = vpop.eup %8080 }
 0x2b1   : > { %4030 = vadd.xlane.f32.xlu1 %v4029_v25  ;;  %v4032_v20 = vsel %vm3971_vm2, %v9466_v27, 0.0  ;;  %v7870_v25 = vld [vmem:[%s10545_s4 + $0x54] sm:$0xf] }
 0x2b2   : > { %4033 = vadd.xlane.f32.xlu0 %v4032_v20 }
 0x304   : > { %v4016_v22 = vpop.xlane.xlu2 %4015 }
 0x305   : > { %8082 = vrcp.f32 %v4016_v22  ;;  %v4019_v28 = vpop.xlane.xlu0 %4018 }
 0x306   : > { %8084 = vrcp.f32 %v4019_v28  ;;  %v7073_v28 = vor.u32 %v7870_v25, %v7070_v42  ;;  %v7096_v25 = vld [vmem:[%s10545_s4 + $0x88] sm:$0xf0] }
 0x30b   : > { %v8083_v31 = vpop.eup %8082 }
 0x30c   : > { %v8085_v32 = vpop.eup %8084  ;;  %v4042_v33 = vmul.f32 %v8083_v31, %v8069_v21  ;;  %v7872_v21 = vld [vmem:[%s10545_s4 + $0x64] sm:$0xf] }
 0x30d   : > { %v4043_v34 = vmul.f32 %v8085_v32, %v8071_v2  ;;  %v7051_v2 = vor.u32 %v7867_v61, %v7050_v57  ;;  %v7081_v19 = vor.u32 %v7872_v21, %v7078_v6  ;;  %v7028_v57 = vld [vmem:[%s10545_s4 + $0x8] sm:$0xf0]  ;;  %v7883_v61 = vld [vmem:[%s10545_s4 + $0xb4] sm:$0xf0]  ;;  %v7110_v21 = vld [vmem:[%s10545_s4 + $0xa0] sm:$0xf]  ;;  %v7115_v6 = vor.u32 %v7880_v3, %v7112_v4 }
 0x30e   : > { %v4063_v35 = vmul.f32 %v7995_v30, %v4042_v33 }
 0x30f   : > { %v4064_v26 = vmul.f32 %v7996_v39, %v4043_v34  ;;  %4321 = vmatpush.bf16.msra.mxu2 %v7051_v2  ;;  %v4055_v34 = vld [vmem:[%s9472_s21 + $0x18] sm:$0xf]  ;;  %v7881_v2 = vld [vmem:[%s10545_s4 + $0xa4] sm:$0xf0] }
 0x310   : > { %v4070_v36 = vpack.c.bf16 %v4063_v35, %v4063_v35  ;;  %v4062_v35 = vunpack.c.l.bf16 %v4055_v34  ;;  %v7138_v34 = vld [vmem:[%s10545_s4 + $0xd8] sm:$0xf0] }
 0x311   : > { %v4071_v37 = vpack.c.bf16 %v4064_v26, %v4064_v26 }
 0x312   : > { %7017 = vmatmul.msk.bf16.vlgmr.msra.gmra.mxu3 %vm3971_vm2, %v4070_v36 }
 0x313   : > { %7018 = vmatmul.msk.bf16.vlgmr.msra.gmra.mxu0 %vm3971_vm2, %v4071_v37  ;;  %4334 = vmatpush.bf16.msra.mxu3 %v7055_v16 }
 0x314   : > { %v4022_v38 = vpop.xlane.xlu2 %4021  ;;  %4390 = vmatpush.bf16.msra.mxu0 %v7085_v50  ;;  %4322 = vmatpush.bf16.msra.mxu2 %v7043_v10  ;;  %v7103_v10 = vor.u32 %v7879_v8, %v7102_v7  ;;  %v7903_v7 = vld [vmem:[%s10545_s4 + $0x154] sm:$0xf0] }
 0x315   : > { %8086 = vrcp.f32 %v4022_v38 }
 0x317   : > { %4335 = vmatpush.bf16.msra.mxu3 %v7047_v15  ;;  %v7890_v15 = vld [vmem:[%s10545_s4 + $0xf4] sm:$0xf] }
 0x318   : > { %4391 = vmatpush.bf16.msra.mxu0 %v7077_v59  ;;  %v7118_v59 = vld [vmem:[%s10545_s4 + $0xb0] sm:$0xf] }
 0x319   : > { %v7119_v63 = vor.u32 %v7883_v61, %v7118_v59  ;;  %v7178_v61 = vld [vmem:[%s10545_s4 + $0x120] sm:$0xf] }
 0x31b   : > { %v8087_v43 = vpop.eup %8086 }
 0x31c   : > { %v4028_v44 = vpop.xlane.xlu1 %4027  ;;  %v4044_v48 = vmul.f32 %v8087_v43, %v8073_v13  ;;  %v4025_v49 = vpop.xlane.xlu2 %4024  ;;  %4392 = vmatpush.bf16.msra.mxu0 %v7069_v55 }
 0x31d   : > { %8088 = vrcp.f32 %v4028_v44 }
 0x31e   : > { %8090 = vrcp.f32 %v4025_v49  ;;  %v4065_v58 = vmul.f32 %v7999_v41, %v4044_v48  ;;  %v7868_v41 = vld [vmem:[%s10545_s4 + $0x44] sm:$0xf]  ;;  %v7035_v48 = vor.u32 %v7863_v46, %v7034_v45  ;;  %v7036_v49 = vld [vmem:[%s10545_s4 + $0x18] sm:$0xf0]  ;;  %v7186_v45 = vld [vmem:[%s10545_s4 + $0x130] sm:$0xf] }
 0x31f   : > { %v7039_v50 = vor.u32 %v7862_v47, %v7036_v49  ;;  %v7906_v47 = vld [vmem:[%s10545_s4 + $0x174] sm:$0xf]  ;;  %v7899_v49 = vld [vmem:[%s10545_s4 + $0x134] sm:$0xf0] }
 0x320   : > { %v4072_v5 = vpack.c.bf16 %v4065_v58, %v4065_v58  ;;  %4323 = vmatpush.bf16.msra.mxu2 %v7035_v48  ;;  %v7031_v58 = vor.u32 %v7860_v53, %v7028_v57  ;;  %v7222_v48 = vld [vmem:[%s10545_s4 + $0x178] sm:$0xf0]  ;;  %v7212_v53 = vld [vmem:[%s10545_s4 + $0x160] sm:$0xf] }
 0x321   : > { %4336 = vmatpush.bf16.msra.mxu3 %v7039_v50  ;;  %v7898_v50 = vld [vmem:[%s10545_s4 + $0x134] sm:$0xf] }
 0x322   : > { %7019 = vmatmul.msk.bf16.vlgmr.msra.gmra.mxu1 %vm3971_vm2, %v4072_v5  ;;  %v7111_v5 = vor.u32 %v7881_v2, %v7110_v21  ;;  %v7897_v21 = vld [vmem:[%s10545_s4 + $0x124] sm:$0xf0]  ;;  %v7896_v2 = vld [vmem:[%s10545_s4 + $0x124] sm:$0xf] }
 0x323   : > { %v8089_v13 = vpop.eup %8088  ;;  %4403 = vmatpush.bf16.msra.mxu1 %v7089_v0  ;;  %v7120_v0 = vld [vmem:[%s10545_s4 + $0xb8] sm:$0xf0]  ;;  %v7179_v8 = vor.u32 %v7897_v21, %v7178_v61  ;;  %v7908_v61 = vld [vmem:[%s10545_s4 + $0x184] sm:$0xf] }
 0x324   : > { %v8091_v60 = vpop.eup %8090  ;;  %v4046_v56 = vmul.f32 %v8089_v13, %v9456_v17  ;;  %v4031_v18 = vpop.xlane.xlu1 %4030  ;;  %v7123_v16 = vor.u32 %v7882_v62, %v7120_v0  ;;  %v7891_v13 = vld [vmem:[%s10545_s4 + $0xf4] sm:$0xf0]  ;;  %v7904_v62 = vld [vmem:[%s10545_s4 + $0x164] sm:$0xf] }
 0x325   : > { %v4045_v24 = vmul.f32 %v8091_v60, %v9454_v1  ;;  %8092 = vrcp.f32 %v4031_v18  ;;  %v8004_v1 = vunpack.c.h.bf16 %v8008_v54  ;;  %v4034_v32 = vpop.xlane.xlu0 %4033  ;;  %v7027_v54 = vor.u32 %v7861_v52, %v7026_v51  ;;  %4337 = vmatpush.bf16.msra.mxu3 %v7031_v58  ;;  %v7154_v60 = vld [vmem:[%s10545_s4 + $0xf8] sm:$0xf0] }
 0x326   : > { %v4067_v20 = vmul.f32 %v8003_v9, %v4046_v56  ;;  %8094 = vrcp.f32 %v4034_v32  ;;  %v7878_v9 = vld [vmem:[%s10545_s4 + $0x94] sm:$0xf]  ;;  %v7153_v55 = vor.u32 %v7891_v13, %v7152_v12  ;;  %v7094_v56 = vld [vmem:[%s10545_s4 + $0x80] sm:$0xf]  ;;  %v7157_v18 = vor.u32 %v7890_v15, %v7154_v60  ;;  %v7188_v51 = vld [vmem:[%s10545_s4 + $0x138] sm:$0xf0] }
 0x327   : > { %v4066_v22 = vmul.f32 %v8000_v14, %v4045_v24  ;;  %4404 = vmatpush.bf16.msra.mxu1 %v7081_v19  ;;  %4324 = vmatpush.bf16.msra.mxu2 %v7027_v54  ;;  %v7107_v14 = vor.u32 %v7878_v9, %v7104_v11  ;;  %v7877_v19 = vld [vmem:[%s10545_s4 + $0x84] sm:$0xf0]  ;;  %v7876_v24 = vld [vmem:[%s10545_s4 + $0x84] sm:$0xf]  ;;  %v7225_v52 = vor.u32 %v7906_v47, %v7222_v48  ;;  %v7902_v11 = vld [vmem:[%s10545_s4 + $0x154] sm:$0xf] }
 0x328   : > { %v4074_v17 = vpack.c.bf16 %v4067_v20, %v4067_v20  ;;  %v7095_v42 = vor.u32 %v7877_v19, %v7094_v56  ;;  %v7099_v20 = vor.u32 %v7876_v24, %v7096_v25  ;;  %v7905_v54 = vld [vmem:[%s10545_s4 + $0x164] sm:$0xf0]  ;;  %v7187_v58 = vor.u32 %v7899_v49, %v7186_v45  ;;  %v7206_v12 = vld [vmem:[%s10545_s4 + $0x158] sm:$0xf0]  ;;  %v7895_v13 = vld [vmem:[%s10545_s4 + $0x114] sm:$0xf0] }
 0x329   : > { %v4073_v29 = vpack.c.bf16 %v4066_v22, %v4066_v22  ;;  %v7144_v22 = vld [vmem:[%s10545_s4 + $0xe0] sm:$0xf]  ;;  %v7191_v59 = vor.u32 %v7898_v50, %v7188_v51  ;;  %v7213_v3 = vor.u32 %v7905_v54, %v7212_v53  ;;  %v7209_v60 = vor.u32 %v7902_v11, %v7206_v12  ;;  %v7900_v19 = vld [vmem:[%s10545_s4 + $0x144] sm:$0xf]  ;;  %v7198_v24 = vld [vmem:[%s10545_s4 + $0x148] sm:$0xf0] }
 0x32a   : > { %7021 = vmatmul.msk.bf16.vlgmr.msrb.gmra.mxu3 %vm3971_vm2, %v4074_v17  ;;  %v7889_v17 = vld [vmem:[%s10545_s4 + $0xe4] sm:$0xf0]  ;;  %v7196_v56 = vld [vmem:[%s10545_s4 + $0x140] sm:$0xf]  ;;  %v7911_v47 = vld [vmem:[%s10545_s4 + $0x194] sm:$0xf0] }
 0x32b   : > { %v8093_v30 = vpop.eup %8092  ;;  %7020 = vmatmul.msk.bf16.vlgmr.msrb.gmra.mxu2 %vm3971_vm2, %v4073_v29  ;;  %4405 = vmatpush.bf16.msra.mxu1 %v7073_v28  ;;  %v7888_v28 = vld [vmem:[%s10545_s4 + $0xe4] sm:$0xf]  ;;  %v7145_v29 = vor.u32 %v7889_v17, %v7144_v22  ;;  %v7162_v22 = vld [vmem:[%s10545_s4 + $0x100] sm:$0xf]  ;;  %v7893_v17 = vld [vmem:[%s10545_s4 + $0x104] sm:$0xf0] }
 0x32c   : > { %v4047_v31 = vmul.f32 %v8093_v30, %v9462_v23  ;;  %v8095_v26 = vpop.eup %8094  ;;  %v7060_v23 = vld [vmem:[%s10545_s4 + $0x40] sm:$0xf]  ;;  %4459 = vmatpush.bf16.msrb.mxu2 %v7119_v63  ;;  %4472 = vmatpush.bf16.msrb.mxu3 %v7123_v16  ;;  %v7214_v63 = vld [vmem:[%s10545_s4 + $0x168] sm:$0xf0]  ;;  %v7910_v48 = vld [vmem:[%s10545_s4 + $0x194] sm:$0xf] }
 0x32d   : > { %v4048_v36 = vmul.f32 %v8095_v26, %v9466_v27  ;;  %v7061_v43 = vor.u32 %v7869_v40, %v7060_v23  ;;  %v7062_v27 = vld [vmem:[%s10545_s4 + $0x48] sm:$0xf0]  ;;  %v7128_v26 = vld [vmem:[%s10545_s4 + $0xc0] sm:$0xf]  ;;  %v7217_v4 = vor.u32 %v7904_v62, %v7214_v63  ;;  %v7240_v49 = vld [vmem:[%s10545_s4 + $0x198] sm:$0xf0] }
 0x32e   : > { %v4068_v39 = vmul.f32 %v8004_v1, %v4047_v31  ;;  %v7065_v44 = vor.u32 %v7868_v41, %v7062_v27  ;;  %v7146_v1 = vld [vmem:[%s10545_s4 + $0xe8] sm:$0xf0]  ;;  %v7136_v31 = vld [vmem:[%s10545_s4 + $0xd0] sm:$0xf]  ;;  %v7907_v27 = vld [vmem:[%s10545_s4 + $0x174] sm:$0xf0]  ;;  %v7243_v53 = vor.u32 %v7910_v48, %v7240_v49 }
 0x32f   : > { %v4069_v37 = vmul.f32 %v4062_v35, %v4048_v36  ;;  %4393 = vmatpush.bf16.msra.mxu0 %v7061_v43  ;;  %v7149_v30 = vor.u32 %v7888_v28, %v7146_v1  ;;  %v7885_v36 = vld [vmem:[%s10545_s4 + $0xc4] sm:$0xf0]  ;;  %v7130_v23 = vld [vmem:[%s10545_s4 + $0xc8] sm:$0xf0]  ;;  %v7220_v43 = vld [vmem:[%s10545_s4 + $0x170] sm:$0xf] }
 0x330   : > { %v4075_v33 = vpack.c.bf16 %v4068_v39, %v4068_v39  ;;  %4406 = vmatpush.bf16.msra.mxu1 %v7065_v44  ;;  %4460 = vmatpush.bf16.msrb.mxu2 %v7111_v5  ;;  %v7887_v39 = vld [vmem:[%s10545_s4 + $0xd4] sm:$0xf0]  ;;  %v7221_v46 = vor.u32 %v7907_v27, %v7220_v43  ;;  %v7180_v16 = vld [vmem:[%s10545_s4 + $0x128] sm:$0xf0]  ;;  %v7892_v28 = vld [vmem:[%s10545_s4 + $0x104] sm:$0xf] }
 0x331   : > { %v4076_v38 = vpack.c.bf16 %v4069_v37, %v4069_v37  ;;  %4473 = vmatpush.bf16.msrb.mxu3 %v7115_v6  ;;  %v7137_v32 = vor.u32 %v7887_v39, %v7136_v31  ;;  %v7129_v37 = vor.u32 %v7885_v36, %v7128_v26  ;;  %v7204_v6 = vld [vmem:[%s10545_s4 + $0x150] sm:$0xf]  ;;  %v7183_v9 = vor.u32 %v7896_v2, %v7180_v16  ;;  %v7256_v26 = vld [vmem:[%s10545_s4 + $0x1b8] sm:$0xf0]  ;;  %v7248_v43 = vld [vmem:[%s10545_s4 + $0x1a8] sm:$0xf0] }
 0x332   : > { %7022 = vmatmul.msk.bf16.vlgmr.msrb.gmra.mxu0 %vm3971_vm2, %v4075_v33  ;;  %v7886_v33 = vld [vmem:[%s10545_s4 + $0xd4] sm:$0xf]  ;;  %v7205_v15 = vor.u32 %v7903_v7, %v7204_v6  ;;  %v7163_v39 = vor.u32 %v7893_v17, %v7162_v22  ;;  %v7230_v54 = vld [vmem:[%s10545_s4 + $0x180] sm:$0xf]  ;;  %v7232_v62 = vld [vmem:[%s10545_s4 + $0x188] sm:$0xf0] }
 0x333   : > { %7023 = vmatmul.msk.bf16.vlgmr.msrb.gmra.mxu1 %vm3971_vm2, %v4076_v38  ;;  %4528 = vmatpush.bf16.msrb.mxu0 %v7153_v55  ;;  %v7141_v35 = vor.u32 %v7886_v33, %v7138_v34  ;;  %v7884_v38 = vld [vmem:[%s10545_s4 + $0xc4] sm:$0xf]  ;;  %v7172_v55 = vld [vmem:[%s10545_s4 + $0x118] sm:$0xf0]  ;;  %v7254_v33 = vld [vmem:[%s10545_s4 + $0x1b0] sm:$0xf] }
 0x334   : > { %4461 = vmatpush.bf16.msrb.mxu2 %v7103_v10  ;;  %4541 = vmatpush.bf16.msrb.mxu1 %v7157_v18  ;;  %v7133_v40 = vor.u32 %v7884_v38, %v7130_v23  ;;  %v7170_v10 = vld [vmem:[%s10545_s4 + $0x110] sm:$0xf]  ;;  %v7901_v18 = vld [vmem:[%s10545_s4 + $0x144] sm:$0xf0]  ;;  %v7915_v34 = vld [vmem:[%s10545_s4 + $0x1b4] sm:$0xf0] }
 0x335   : > { %4474 = vmatpush.bf16.msrb.mxu3 %v7107_v14  ;;  %v7894_v14 = vld [vmem:[%s10545_s4 + $0x114] sm:$0xf]  ;;  %v7197_v1 = vor.u32 %v7901_v18, %v7196_v56  ;;  %v7255_v36 = vor.u32 %v7915_v34, %v7254_v33  ;;  %v7246_v38 = vld [vmem:[%s10545_s4 + $0x1a0] sm:$0xf]  ;;  %v8115_v12 = vld [vmem:[%s8379_s22 + $0x8] sm:$0xff] }
 0x337   : > { %4529 = vmatpush.bf16.msrb.mxu0 %v7145_v29  ;;  %v7164_v29 = vld [vmem:[%s10545_s4 + $0x108] sm:$0xf0] }
 0x338   : > { %4462 = vmatpush.bf16.msrb.mxu2 %v7095_v42  ;;  %4542 = vmatpush.bf16.msrb.mxu1 %v7149_v30  ;;  %v7171_v42 = vor.u32 %v7895_v13, %v7170_v10  ;;  %v7201_v30 = vor.u32 %v7900_v19, %v7198_v24  ;;  %v8114_v10 = vld [vmem:[%s8379_s22] sm:$0xff]  ;;  %s5484_s22 = scalar_lea.hbm %s10548_s7, %s7980_s23 }
 0x339   : > { %4475 = vmatpush.bf16.msrb.mxu3 %v7099_v20  ;;  %v7175_v20 = vor.u32 %v7894_v14, %v7172_v55  ;;  %s5488_s21 = sshll.u32 %s5484_s22, 4  ;;  %s5489_s21 = int_to_ptr.hbm [resolvable:$true] %s5488_s21 }
 0x33a   : > { %s8130_s11 = sshra.s32 %s5489_s21, 4  ;;  %s8131_s11 = int_to_ptr.hbm [resolvable:$true] %s8130_s11 }
 0x33b   : > { %4530 = vmatpush.bf16.msrb.mxu0 %v7137_v32  ;;  %v7167_v32 = vor.u32 %v7892_v28, %v7164_v29  ;;  %s8132_s30 = scalar_lea.hbm %s8131_s11, 16  ;;  %p8137_p4 = scmp.lt.s32.totalorder %s8131_s11, %s10548_s7 }
 0x33c   : > { %4543 = vmatpush.bf16.msrb.mxu1 %v7141_v35  ;;  %v7914_v35 = vld [vmem:[%s10545_s4 + $0x1b4] sm:$0xf]  ;;  %p8133_p1 = scmp.ne.s32.totalorder %s8131_s11, %s8132_s30  ;;  %p8138_p6 = scmp.lt.s32.totalorder %s8136_s16, %s8132_s30 }
 0x33e   : > { %p8134_p2 = pnand %p8133_p1, %p8280_p5  ;;  %p8139_p7 = por %p8138_p6, %p8137_p4 }
 0x33f   : > { %4531 = vmatpush.bf16.msrb.mxu0 %v7129_v37  ;;  %v7259_v37 = vor.u32 %v7914_v35, %v7256_v26 }
 0x340   : > { %4544 = vmatpush.bf16.msrb.mxu1 %v7133_v40  ;;  %v7913_v40 = vld [vmem:[%s10545_s4 + $0x1a4] sm:$0xf0]  ;;  %p8135_p3 = pneg %p8134_p2 }
 0x342   : > { %p8140_p8 = pnand %p8139_p7, %p8135_p3 }
 0x390   : > { %v4112_v41 = vpop.f32.mrf.mxu0 }
 0x391   : > { %v4212_v44 = vpack.c.bf16 %v4112_v41, %v4112_v41  ;;  %v7912_v41 = vld [vmem:[%s10545_s4 + $0x1a4] sm:$0xf] }
 0x392   : > { %v7251_v45 = vor.u32 %v7912_v41, %v7248_v43 }
 0x393   : > { %7090 = vmatmul.msk.bf16.vlgmr.msra.gmra.mxu0 %vm3809_vm0, %v4212_v44  ;;  %7091 = vmatmul.msk.bf16.vlgmr.msra.gmra.mxu1 %vm3809_vm0, %v4212_v44  ;;  %v7247_v44 = vor.u32 %v7913_v40, %v7246_v38 }
 0x394   : > { %4666 = vmatpush.bf16.msra.mxu0 %v7221_v46  ;;  %4679 = vmatpush.bf16.msra.mxu1 %v7225_v52  ;;  %v7238_v46 = vld [vmem:[%s10545_s4 + $0x190] sm:$0xf] }
 0x395   : > { %v4093_v57 = vpop.f32.mrf.mxu3  ;;  %v7239_v52 = vor.u32 %v7911_v47, %v7238_v46 }
 0x396   : > { %v4211_v0 = vpack.c.bf16 %v4093_v57, %v4093_v57 }
 0x398   : > { %v4114_v5 = vpop.f32.mrf.mxu0  ;;  %7056 = vmatmul.msk.bf16.vlgmr.msra.gmra.mxu2 %vm3809_vm0, %v4211_v0  ;;  %7057 = vmatmul.msk.bf16.vlgmr.msra.gmra.mxu3 %vm3809_vm0, %v4211_v0  ;;  %v7235_v0 = vor.u32 %v7908_v61, %v7232_v62 }
 0x399   : > { %4597 = vmatpush.bf16.msra.mxu2 %v7187_v58  ;;  %4610 = vmatpush.bf16.msra.mxu3 %v7191_v59  ;;  %v7909_v59 = vld [vmem:[%s10545_s4 + $0x184] sm:$0xf0] }
 0x39a   : > { %4667 = vmatpush.bf16.msra.mxu0 %v7213_v3  ;;  %4680 = vmatpush.bf16.msra.mxu1 %v7217_v4  ;;  %v7231_v63 = vor.u32 %v7909_v59, %v7230_v54  ;;  %v8196_v59 = vmov 256.0  }
 0x39b   : > { %8096 = vrcp.f32 %v8196_v59  ;;  %v7947_v59 = vld [vmem:[%s10546_s5 + $0xf4] sm:$0xf0] }
 0x39d   : > { %v4095_v25 = vpop.f32.mrf.mxu3  ;;  %4598 = vmatpush.bf16.msra.mxu2 %v7179_v8  ;;  %4611 = vmatpush.bf16.msra.mxu3 %v7183_v9 }
 0x39e   : > { %4668 = vmatpush.bf16.msra.mxu0 %v7205_v15  ;;  %4681 = vmatpush.bf16.msra.mxu1 %v7209_v60 }
 0x39f   : > { %v4131_v31 = vpop.f32.mrf.mxu1 }
 0x3a0   : > { %v4213_v23 = vpack.c.bf16 %v4131_v31, %v4131_v31 }
 0x3a1   : > { %4599 = vmatpush.bf16.msra.mxu2 %v7171_v42  ;;  %4612 = vmatpush.bf16.msra.mxu3 %v7175_v20  ;;  %v8097_v61 = vpop.eup %8096 }
 0x3a2   : > { %4669 = vmatpush.bf16.msra.mxu0 %v7197_v1  ;;  %4682 = vmatpush.bf16.msra.mxu1 %v7201_v30  ;;  %v4779_v62 = vmul.f32 256.0, %v8097_v61  ;;  %vm4783_vm3 = vweird.f32 %v8097_v61 }
 0x3a5   : > { %4600 = vmatpush.bf16.msra.mxu2 %v7163_v39  ;;  %4613 = vmatpush.bf16.msra.mxu3 %v7167_v32 }
 0x3a7   : > { %v4133_v27 = vpop.f32.mrf.mxu1 }
 0x3a8   : > { %7124 = vmatmul.msk.bf16.vlgmr.msrb.gmra.mxu2 %vm3809_vm0, %v4213_v23  ;;  %7125 = vmatmul.msk.bf16.vlgmr.msrb.gmra.mxu3 %vm3809_vm0, %v4213_v23 }
 0x3a9   : > { %4735 = vmatpush.bf16.msrb.mxu2 %v7255_v36  ;;  %4748 = vmatpush.bf16.msrb.mxu3 %v7259_v37 }
 0x3ad   : > { %v4169_v50 = vpop.f32.mrf.mxu3  ;;  %4736 = vmatpush.bf16.msrb.mxu2 %v7247_v44  ;;  %4749 = vmatpush.bf16.msrb.mxu3 %v7251_v45 }
 0x3ae   : > { %v4150_v51 = vpop.f32.mrf.mxu2  ;;  %v4215_v16 = vpack.c.bf16 %v4169_v50, %v4169_v50 }
 0x3af   : > { %v4214_v57 = vpack.c.bf16 %v4150_v51, %v4150_v51  ;;  %v4188_v58 = vpop.f32.mrf.mxu0 }
 0x3b0   : > { %v4207_v4 = vpop.f32.mrf.mxu1  ;;  %v4216_v5 = vpack.c.bf16 %v4188_v58, %v4188_v58 }
 0x3b1   : > { %7158 = vmatmul.msk.bf16.vlgmr.msrb.gmra.mxu0 %vm3809_vm0, %v4214_v57  ;;  %7159 = vmatmul.msk.bf16.vlgmr.msrb.gmra.mxu1 %vm3809_vm0, %v4214_v57  ;;  %v4217_v7 = vpack.c.bf16 %v4207_v4, %v4207_v4 }
 0x3b2   : > { %4737 = vmatpush.bf16.msrb.mxu2 %v7239_v52  ;;  %4750 = vmatpush.bf16.msrb.mxu3 %v7243_v53 }
 0x3b5   : > { %v4171_v21 = vpop.f32.mrf.mxu3 }
 0x3b6   : > { %v4152_v2 = vpop.f32.mrf.mxu2  ;;  %4738 = vmatpush.bf16.msrb.mxu2 %v7231_v63  ;;  %4751 = vmatpush.bf16.msrb.mxu3 %v7235_v0  ;;  %v4780_v63 = vsub.f32 1.0, %v4779_v62 }
 0x3b7   : > { %v4190_v3 = vpop.f32.mrf.mxu0 }
 0x3b8   : > { %7192 = vmatmul.msk.bf16.vlgmr.msra.gmra.mxu2 %vm3809_vm0, %v4215_v16  ;;  %7193 = vmatmul.msk.bf16.vlgmr.msra.gmra.mxu3 %vm3809_vm0, %v4215_v16  ;;  %v4209_v6 = vpop.f32.mrf.mxu1  ;;  %v4781_v0 = vmul.f32 %v8097_v61, %v4780_v63  ;;  %v7322_v63 = vld [vmem:[%s10546_s5 + $0x78] sm:$0xf0] }
 0x3ba   : > { %v4782_v21 = vadd.f32 %v8097_v61, %v4781_v0  ;;  %v7946_v0 = vld [vmem:[%s10546_s5 + $0xf4] sm:$0xf] }
 0x3bc   : > { %v9883_v2 = vsel %vm4783_vm3, %v8097_v61, %v4782_v21  ;;  %v7930_v61 = vld [vmem:[%s10546_s5 + $0x74] sm:$0xf]  ;;  %v7386_v21 = vld [vmem:[%s10546_s5 + $0xf8] sm:$0xf0] }
 0x3c1   : > { %7226 = vmatmul.msk.bf16.vlgmr.msra.gmra.mxu0 %vm3809_vm0, %v4216_v5  ;;  %7227 = vmatmul.msk.bf16.vlgmr.msra.gmra.mxu1 %vm3809_vm0, %v4216_v5 }
 0x3c8   : > { %7260 = vmatmul.msk.bf16.vlgmr.msrb.gmra.mxu2 %vm3809_vm0, %v4217_v7  ;;  %7261 = vmatmul.msk.bf16.vlgmr.msrb.gmra.mxu3 %vm3809_vm0, %v4217_v7 }
 0x410   : > { %v4395_v8 = vpop.f32.mrf.mxu0  ;;  %v4408_v9 = vpop.f32.mrf.mxu1 }
 0x411   : > { %v9840_v11 = vadd.f32 %v8114_v10, %v4395_v8  ;;  %v9843_v13 = vadd.f32 %v8115_v12, %v4408_v9 }
 0x413   : > { %v4760_v14 = vadd.f32 %v9843_v13, %v9840_v11 }
 0x415   : > { %4761 = vadd.xlane.f32.xlu0 %v4760_v14 }
 0x418   : > { %v4397_v55 = vpop.f32.mrf.mxu0  ;;  %v4410_v15 = vpop.f32.mrf.mxu1 }
 0x41b   : > { %v4326_v60 = vpop.f32.mrf.mxu2  ;;  %v4339_v56 = vpop.f32.mrf.mxu3 }
 0x41c   : > { %v9847_v18 = vadd.f32 %v8114_v10, %v4326_v60  ;;  %v9849_v19 = vadd.f32 %v8115_v12, %v4339_v56 }
 0x41e   : > { %v4757_v24 = vadd.f32 %v9849_v19, %v9847_v18 }
 0x420   : > { %4758 = vadd.xlane.f32.xlu2 %v4757_v24 }
 0x423   : > { %v4328_v25 = vpop.f32.mrf.mxu2  ;;  %v4341_v42 = vpop.f32.mrf.mxu3 }
 0x42b   : > { %v4464_v20 = vpop.f32.mrf.mxu2  ;;  %v4477_v22 = vpop.f32.mrf.mxu3 }
 0x42c   : > { %v9853_v17 = vadd.f32 %v8114_v10, %v4464_v20  ;;  %v9855_v28 = vadd.f32 %v8115_v12, %v4477_v22 }
 0x42e   : > { %v4533_v29 = vpop.f32.mrf.mxu0  ;;  %v4546_v1 = vpop.f32.mrf.mxu1  ;;  %v4763_v39 = vadd.f32 %v9855_v28, %v9853_v17 }
 0x42f   : > { %v9857_v30 = vadd.f32 %v8114_v10, %v4533_v29  ;;  %v9859_v31 = vadd.f32 %v8115_v12, %v4546_v1 }
 0x430   : > { %4764 = vadd.xlane.f32.xlu1 %v4763_v39 }
 0x431   : > { %v4766_v32 = vadd.f32 %v9859_v31, %v9857_v30 }
 0x433   : > { %4767 = vadd.xlane.f32.xlu2 %v4766_v32  ;;  %v4466_v33 = vpop.f32.mrf.mxu2  ;;  %v4479_v34 = vpop.f32.mrf.mxu3 }
 0x436   : > { %v4535_v35 = vpop.f32.mrf.mxu0  ;;  %v4548_v26 = vpop.f32.mrf.mxu1 }
 0x43b   : > { %v4602_v36 = vpop.f32.mrf.mxu2  ;;  %v4615_v37 = vpop.f32.mrf.mxu3 }
 0x43c   : > { %v9865_v38 = vadd.f32 %v8114_v10, %v4602_v36  ;;  %v9867_v23 = vadd.f32 %v8115_v12, %v4615_v37 }
 0x43e   : > { %v4671_v40 = vpop.f32.mrf.mxu0  ;;  %v4684_v41 = vpop.f32.mrf.mxu1  ;;  %v4769_v44 = vadd.f32 %v9867_v23, %v9865_v38 }
 0x43f   : > { %v9869_v43 = vadd.f32 %v8114_v10, %v4671_v40  ;;  %v9871_v27 = vadd.f32 %v8115_v12, %v4684_v41 }
 0x440   : > { %4770 = vadd.xlane.f32.xlu0 %v4769_v44 }
 0x441   : > { %v4772_v45 = vadd.f32 %v9871_v27, %v9869_v43 }
 0x443   : > { %4773 = vadd.xlane.f32.xlu1 %v4772_v45  ;;  %v4604_v46 = vpop.f32.mrf.mxu2  ;;  %v4617_v47 = vpop.f32.mrf.mxu3 }
 0x446   : > { %v4673_v48 = vpop.f32.mrf.mxu0  ;;  %v4686_v49 = vpop.f32.mrf.mxu1 }
 0x44b   : > { %v4740_v50 = vpop.f32.mrf.mxu2  ;;  %v4753_v51 = vpop.f32.mrf.mxu3 }
 0x44c   : > { %v9877_v52 = vadd.f32 %v8114_v10, %v4740_v50  ;;  %v9879_v53 = vadd.f32 %v8115_v12, %v4753_v51 }
 0x44e   : > { %v4775_v54 = vadd.f32 %v9879_v53, %v9877_v52 }
 0x450   : > { %4776 = vadd.xlane.f32.xlu2 %v4775_v54 }
 0x453   : > { %v4742_v57 = vpop.f32.mrf.mxu2  ;;  %v4755_v58 = vpop.f32.mrf.mxu3 }
 0x454   : > { %v7384_v57 = vld [vmem:[%s10546_s5 + $0xf0] sm:$0xf] }
 0x455   : > { %v7385_v62 = vor.u32 %v7947_v59, %v7384_v57  ;;  %v7298_v57 = vld [vmem:[%s10546_s5 + $0x48] sm:$0xf0] }
 0x457   : > { %5158 = vmatpush.bf16.msrb.mxu1 %v7385_v62  ;;  %v7362_v62 = vld [vmem:[%s10546_s5 + $0xc8] sm:$0xf0] }
 0x488   : > { %v4762_v16 = vpop.xlane.xlu0 %4761 }
 0x489   : > { %v4786_v3 = vmul.f32 %v9883_v2, %v4762_v16 }
 0x48b   : > { %v9887_v4 = vsub.f32 %v9840_v11, %v4786_v3  ;;  %v9890_v5 = vsub.f32 %v9843_v13, %v4786_v3  ;;  %v7325_v3 = vor.u32 %v7930_v61, %v7322_v63  ;;  %v7940_v61 = vld [vmem:[%s10546_s5 + $0xc4] sm:$0xf] }
 0x48d   : > { %v4808_v6 = vmul.f32 %v9887_v4, %v9887_v4  ;;  %v4809_v7 = vmul.f32 %v9890_v5, %v9890_v5  ;;  %5171 = vmatpush.bf16.msra.mxu2 %v7325_v3 }
 0x48f   : > { %v4823_v8 = vadd.f32 %v4809_v7, %v4808_v6  ;;  %v7389_v6 = vor.u32 %v7946_v0, %v7386_v21  ;;  %v7365_v0 = vor.u32 %v7940_v61, %v7362_v62  ;;  %v7919_v61 = vld [vmem:[%s10546_s5 + $0x14] sm:$0xf0] }
 0x491   : > { %4824 = vadd.xlane.f32.xlu1 %v4823_v8  ;;  %5184 = vmatpush.bf16.msra.mxu3 %v7389_v6  ;;  %v7288_v6 = vld [vmem:[%s10546_s5 + $0x30] sm:$0xf] }
 0x493   : > { %v4759_v9 = vpop.xlane.xlu2 %4758 }
 0x494   : > { %v4785_v10 = vmul.f32 %v9883_v2, %v4759_v9  ;;  %v7312_v9 = vld [vmem:[%s10546_s5 + $0x60] sm:$0xf] }
 0x496   : > { %v9898_v12 = vsub.f32 %v9847_v18, %v4785_v10  ;;  %v9901_v11 = vsub.f32 %v9849_v19, %v4785_v10  ;;  %v7929_v10 = vld [vmem:[%s10546_s5 + $0x64] sm:$0xf0] }
 0x498   : > { %v4806_v13 = vmul.f32 %v9898_v12, %v9898_v12  ;;  %v4807_v14 = vmul.f32 %v9901_v11, %v9901_v11 }
 0x49a   : > { %v4820_v55 = vadd.f32 %v4807_v14, %v4806_v13  ;;  %v7313_v14 = vor.u32 %v7929_v10, %v7312_v9  ;;  %v7352_v9 = vld [vmem:[%s10546_s5 + $0xb0] sm:$0xf] }
 0x49c   : > { %4821 = vadd.xlane.f32.xlu0 %v4820_v55  ;;  %v7376_v55 = vld [vmem:[%s10546_s5 + $0xe0] sm:$0xf] }
 0x4a3   : > { %v4765_v15 = vpop.xlane.xlu1 %4764 }
 0x4a4   : > { %v4787_v60 = vmul.f32 %v9883_v2, %v4765_v15  ;;  %v7945_v15 = vld [vmem:[%s10546_s5 + $0xe4] sm:$0xf0] }
 0x4a6   : > { %v4768_v56 = vpop.xlane.xlu2 %4767  ;;  %v9909_v24 = vsub.f32 %v9853_v17, %v4787_v60  ;;  %v9912_v18 = vsub.f32 %v9855_v28, %v4787_v60  ;;  %v7928_v60 = vld [vmem:[%s10546_s5 + $0x64] sm:$0xf] }
 0x4a7   : > { %v4788_v19 = vmul.f32 %v9883_v2, %v4768_v56 }
 0x4a8   : > { %v4810_v20 = vmul.f32 %v9909_v24, %v9909_v24  ;;  %v4811_v22 = vmul.f32 %v9912_v18, %v9912_v18 }
 0x4a9   : > { %v9916_v25 = vsub.f32 %v9857_v30, %v4788_v19  ;;  %v9919_v42 = vsub.f32 %v9859_v31, %v4788_v19  ;;  %v7377_v19 = vor.u32 %v7945_v15, %v7376_v55 }
 0x4aa   : > { %v4826_v29 = vadd.f32 %v4811_v22, %v4810_v20  ;;  %v7314_v20 = vld [vmem:[%s10546_s5 + $0x68] sm:$0xf0]  ;;  %v7944_v22 = vld [vmem:[%s10546_s5 + $0xe4] sm:$0xf] }
 0x4ab   : > { %v4812_v17 = vmul.f32 %v9916_v25, %v9916_v25  ;;  %v4813_v28 = vmul.f32 %v9919_v42, %v9919_v42  ;;  %5159 = vmatpush.bf16.msrb.mxu1 %v7377_v19  ;;  %v7354_v19 = vld [vmem:[%s10546_s5 + $0xb8] sm:$0xf0] }
 0x4ac   : > { %4827 = vadd.xlane.f32.xlu2 %v4826_v29 }
 0x4ad   : > { %v4829_v1 = vadd.f32 %v4813_v28, %v4812_v17  ;;  %v7317_v28 = vor.u32 %v7928_v60, %v7314_v20  ;;  %v7290_v60 = vld [vmem:[%s10546_s5 + $0x38] sm:$0xf0] }
 0x4af   : > { %4830 = vadd.xlane.f32.xlu0 %v4829_v1  ;;  %v7378_v1 = vld [vmem:[%s10546_s5 + $0xe8] sm:$0xf0]  ;;  %5172 = vmatpush.bf16.msra.mxu2 %v7317_v28 }
 0x4b3   : > { %v4771_v30 = vpop.xlane.xlu0 %4770 }
 0x4b4   : > { %v4789_v31 = vmul.f32 %v9883_v2, %v4771_v30  ;;  %v7381_v30 = vor.u32 %v7944_v22, %v7378_v1 }
 0x4b6   : > { %v4774_v39 = vpop.xlane.xlu1 %4773  ;;  %v9931_v32 = vsub.f32 %v9865_v38, %v4789_v31  ;;  %v9934_v33 = vsub.f32 %v9867_v23, %v4789_v31  ;;  %v7304_v31 = vld [vmem:[%s10546_s5 + $0x50] sm:$0xf]  ;;  %5185 = vmatpush.bf16.msra.mxu3 %v7381_v30  ;;  %v7280_v30 = vld [vmem:[%s10546_s5 + $0x20] sm:$0xf] }
 0x4b7   : > { %v4790_v34 = vmul.f32 %v9883_v2, %v4774_v39  ;;  %v7927_v39 = vld [vmem:[%s10546_s5 + $0x54] sm:$0xf0] }
 0x4b8   : > { %v4814_v36 = vmul.f32 %v9931_v32, %v9931_v32  ;;  %v4815_v37 = vmul.f32 %v9934_v33, %v9934_v33 }
 0x4b9   : > { %v9938_v35 = vsub.f32 %v9869_v43, %v4790_v34  ;;  %v9941_v26 = vsub.f32 %v9871_v27, %v4790_v34  ;;  %v7368_v34 = vld [vmem:[%s10546_s5 + $0xd0] sm:$0xf] }
 0x4ba   : > { %v4832_v40 = vadd.f32 %v4815_v37, %v4814_v36  ;;  %v7305_v36 = vor.u32 %v7927_v39, %v7304_v31  ;;  %v7943_v37 = vld [vmem:[%s10546_s5 + $0xd4] sm:$0xf0]  ;;  %v7921_v31 = vld [vmem:[%s10546_s5 + $0x24] sm:$0xf0] }
 0x4bb   : > { %v4816_v38 = vmul.f32 %v9938_v35, %v9938_v35  ;;  %v4817_v23 = vmul.f32 %v9941_v26, %v9941_v26 }
 0x4bc   : > { %4833 = vadd.xlane.f32.xlu1 %v4832_v40  ;;  %v7926_v40 = vld [vmem:[%s10546_s5 + $0x54] sm:$0xf] }
 0x4bd   : > { %v4835_v41 = vadd.f32 %v4817_v23, %v4816_v38  ;;  %v7369_v38 = vor.u32 %v7943_v37, %v7368_v34  ;;  %v7306_v23 = vld [vmem:[%s10546_s5 + $0x58] sm:$0xf0]  ;;  %v7344_v37 = vld [vmem:[%s10546_s5 + $0xa0] sm:$0xf] }
 0x4bf   : > { %4836 = vadd.xlane.f32.xlu2 %v4835_v41  ;;  %v7942_v41 = vld [vmem:[%s10546_s5 + $0xd4] sm:$0xf]  ;;  %5160 = vmatpush.bf16.msrb.mxu1 %v7369_v38  ;;  %v7920_v38 = vld [vmem:[%s10546_s5 + $0x24] sm:$0xf] }
 0x4c3   : > { %v4777_v43 = vpop.xlane.xlu2 %4776 }
 0x4c4   : > { %v4791_v27 = vmul.f32 %v9883_v2, %v4777_v43  ;;  %v7370_v43 = vld [vmem:[%s10546_s5 + $0xd8] sm:$0xf0] }
 0x4c6   : > { %v9953_v44 = vsub.f32 %v9877_v52, %v4791_v27  ;;  %v9956_v45 = vsub.f32 %v9879_v53, %v4791_v27  ;;  %v7320_v52 = vld [vmem:[%s10546_s5 + $0x70] sm:$0xf]  ;;  %v7931_v53 = vld [vmem:[%s10546_s5 + $0x74] sm:$0xf0] }
 0x4c7   : > { %v7321_v58 = vor.u32 %v7931_v53, %v7320_v52  ;;  %v7941_v52 = vld [vmem:[%s10546_s5 + $0xc4] sm:$0xf0]  ;;  %v7924_v53 = vld [vmem:[%s10546_s5 + $0x44] sm:$0xf] }
 0x4c8   : > { %v4818_v46 = vmul.f32 %v9953_v44, %v9953_v44  ;;  %v4819_v47 = vmul.f32 %v9956_v45, %v9956_v45  ;;  %v7301_v59 = vor.u32 %v7924_v53, %v7298_v57 }
 0x4c9   : > { %5145 = vmatpush.bf16.msrb.mxu0 %v7321_v58 }
 0x4ca   : > { %v4838_v48 = vadd.f32 %v4819_v47, %v4818_v46  ;;  %v7309_v46 = vor.u32 %v7926_v40, %v7306_v23  ;;  %v7373_v47 = vor.u32 %v7942_v41, %v7370_v43  ;;  %v7937_v40 = vld [vmem:[%s10546_s5 + $0xa4] sm:$0xf0] }
 0x4cb   : > { %v7345_v43 = vor.u32 %v7937_v40, %v7344_v37  ;;  %v7932_v40 = vld [vmem:[%s10546_s5 + $0x84] sm:$0xf] }
 0x4cc   : > { %4839 = vadd.xlane.f32.xlu0 %v4838_v48  ;;  %v7296_v48 = vld [vmem:[%s10546_s5 + $0x40] sm:$0xf]  ;;  %5173 = vmatpush.bf16.msra.mxu2 %v7309_v46  ;;  %v7282_v46 = vld [vmem:[%s10546_s5 + $0x28] sm:$0xf0] }
 0x4cd   : > { %5146 = vmatpush.bf16.msrb.mxu0 %v7313_v14  ;;  %5186 = vmatpush.bf16.msra.mxu3 %v7373_v47  ;;  %v7922_v14 = vld [vmem:[%s10546_s5 + $0x34] sm:$0xf]  ;;  %v7936_v47 = vld [vmem:[%s10546_s5 + $0xa4] sm:$0xf] }
 0x4ce   : > { %v7293_v22 = vor.u32 %v7922_v14, %v7290_v60 }
 0x4d0   : > { %5174 = vmatpush.bf16.msra.mxu2 %v7301_v59  ;;  %v7272_v59 = vld [vmem:[%s10546_s5 + $0x10] sm:$0xf] }
 0x4d1   : > { %5147 = vmatpush.bf16.msrb.mxu0 %v7305_v36  ;;  %5187 = vmatpush.bf16.msra.mxu3 %v7365_v0  ;;  %v7281_v36 = vor.u32 %v7921_v31, %v7280_v30  ;;  %v7273_v0 = vor.u32 %v7919_v61, %v7272_v59  ;;  %v7266_v30 = vld [vmem:[%s10546_s5 + $0x8] sm:$0xf0]  ;;  %v7962_v59 = vld [vmem:[%s10547_s6 + $0x74] sm:$0xf] }
 0x4d4   : > { %5175 = vmatpush.bf16.msra.mxu2 %v7293_v22  ;;  %v7917_v22 = vld [vmem:[%s10546_s5 + $0x4] sm:$0xf0] }
 0x504   : > { %v4825_v50 = vpop.xlane.xlu1 %4824 }
 0x505   : > { %v4842_v54 = vmul.f32 %v4825_v50, %v9883_v2  ;;  %v7360_v50 = vld [vmem:[%s10546_s5 + $0xc0] sm:$0xf] }
 0x506   : > { %v7361_v58 = vor.u32 %v7941_v52, %v7360_v50  ;;  %v7346_v52 = vld [vmem:[%s10546_s5 + $0xa8] sm:$0xf0] }
 0x507   : > { %v9990_v7 = vadd.f32 1e-05, %v4842_v54 }
 0x508   : > { %5161 = vmatpush.bf16.msrb.mxu1 %v7361_v58  ;;  %v7349_v58 = vor.u32 %v7936_v47, %v7346_v52 }
 0x509   : > { %vm4871_vm4 = vweird.f32 %v9990_v7 }
 0x50f   : > { %v4822_v49 = vpop.xlane.xlu0 %4821 }
 0x510   : > { %v4841_v51 = vmul.f32 %v4822_v49, %v9883_v2  ;;  %v7925_v49 = vld [vmem:[%s10546_s5 + $0x44] sm:$0xf0] }
 0x511   : > { %v7297_v54 = vor.u32 %v7925_v49, %v7296_v48 }
 0x512   : > { %v9988_v16 = vadd.f32 1e-05, %v4841_v51 }
 0x513   : > { %5148 = vmatpush.bf16.msrb.mxu0 %v7297_v54  ;;  %v7285_v54 = vor.u32 %v7920_v38, %v7282_v46  ;;  %v7330_v38 = vld [vmem:[%s10546_s5 + $0x88] sm:$0xf0] }
 0x514   : > { %8098 = vrsqrt.f32 %v9988_v16  ;;  %v7333_v46 = vor.u32 %v7932_v40, %v7330_v38  ;;  %vm4861_vm7 = vweird.f32 %v9988_v16  ;;  %v7959_v40 = vld [vmem:[%s10547_s6 + $0x54] sm:$0xf0] }
 0x515   : > { %8100 = vrsqrt.f32 %v9990_v7  ;;  %5176 = vmatpush.bf16.msra.mxu2 %v7285_v54 }
 0x51a   : > { %v10058_v51 = vpop.eup %8098 }
 0x51b   : > { %v10075_v63 = vpop.eup %8100  ;;  %v4856_v3 = vmul.f32 %v10058_v51, %v9988_v16  ;;  %vm4862_vm6 = vweird.f32 %v10058_v51 }
 0x51c   : > { %v4866_v55 = vmul.f32 %v10075_v63, %v9990_v7  ;;  %vm4872_vm5 = vweird.f32 %v10075_v63  ;;  %vm10234_vm9 = vmor %vm4861_vm7, %vm4862_vm6 }
 0x51d   : > { %v4857_v28 = vmul.f32 %v10058_v51, %v4856_v3  ;;  %v7336_v3 = vld [vmem:[%s10546_s5 + $0x90] sm:$0xf]  ;;  %vm4873_vm12 = vmor %vm4871_vm4, %vm4872_vm5 }
 0x51e   : > { %v4867_v23 = vmul.f32 %v10075_v63, %v4866_v55 }
 0x51f   : > { %v4828_v8 = vpop.xlane.xlu2 %4827  ;;  %v4858_v53 = vmul.f32 0.5, %v4857_v28  ;;  %v7933_v28 = vld [vmem:[%s10546_s5 + $0x84] sm:$0xf0] }
 0x520   : > { %v4843_v13 = vmul.f32 %v4828_v8, %v9883_v2  ;;  %v7923_v8 = vld [vmem:[%s10546_s5 + $0x34] sm:$0xf0]  ;;  %v4868_v14 = vmul.f32 0.5, %v4867_v23 }
 0x521   : > { %v7289_v10 = vor.u32 %v7923_v8, %v7288_v6  ;;  %v7935_v6 = vld [vmem:[%s10546_s5 + $0x94] sm:$0xf0]  ;;  %v4859_v31 = vsub.f32 1.5, %v4858_v53 }
 0x522   : > { %v4831_v56 = vpop.xlane.xlu0 %4830  ;;  %v10015_v29 = vadd.f32 1e-05, %v4843_v13  ;;  %v7939_v13 = vld [vmem:[%s10546_s5 + $0xb4] sm:$0xf0]  ;;  %v7337_v8 = vor.u32 %v7935_v6, %v7336_v3  ;;  %v7450_v3 = vld [vmem:[%s10547_s6 + $0x78] sm:$0xf0] }
 0x523   : > { %v4844_v17 = vmul.f32 %v4831_v56, %v9883_v2  ;;  %v7353_v15 = vor.u32 %v7939_v13, %v7352_v9  ;;  %v7938_v56 = vld [vmem:[%s10546_s5 + $0xb4] sm:$0xf]  ;;  %5149 = vmatpush.bf16.msrb.mxu0 %v7289_v10  ;;  %v7274_v10 = vld [vmem:[%s10546_s5 + $0x18] sm:$0xf0]  ;;  %v4860_v54 = vmul.f32 %v10058_v51, %v4859_v31  ;;  %v7440_v6 = vld [vmem:[%s10547_s6 + $0x60] sm:$0xf] }
 0x524   : > { %8102 = vrsqrt.f32 %v10015_v29  ;;  %v7918_v9 = vld [vmem:[%s10546_s5 + $0x14] sm:$0xf]  ;;  %vm4881_vm10 = vweird.f32 %v10015_v29 }
 0x525   : > { %v10047_v27 = vadd.f32 1e-05, %v4844_v17  ;;  %v7357_v17 = vor.u32 %v7938_v56, %v7354_v19  ;;  %5162 = vmatpush.bf16.msrb.mxu1 %v7353_v15  ;;  %v7934_v13 = vld [vmem:[%s10546_s5 + $0x94] sm:$0xf]  ;;  %v7338_v15 = vld [vmem:[%s10546_s5 + $0x98] sm:$0xf0]  ;;  %v7277_v56 = vor.u32 %v7918_v9, %v7274_v10 }
 0x526   : > { %v7341_v19 = vor.u32 %v7934_v13, %v7338_v15  ;;  %v7961_v15 = vld [vmem:[%s10547_s6 + $0x64] sm:$0xf0] }
 0x527   : > { %8104 = vrsqrt.f32 %v10047_v27  ;;  %5188 = vmatpush.bf16.msra.mxu3 %v7357_v17  ;;  %5150 = vmatpush.bf16.msrb.mxu0 %v7281_v36  ;;  %v7328_v17 = vld [vmem:[%s10546_s5 + $0x80] sm:$0xf]  ;;  %vm4891_vm14 = vweird.f32 %v10047_v27 }
 0x528   : > { %5177 = vmatpush.bf16.msra.mxu2 %v7277_v56  ;;  %v7329_v36 = vor.u32 %v7933_v28, %v7328_v17  ;;  %v7979_v17 = vld [vmem:[%s10547_s6 + $0xf4] sm:$0xf0]  ;;  %v4864_v28 = vsel %vm10234_vm9, %v10058_v51, %v4860_v54  ;;  %v7504_v54 = vld [vmem:[%s10547_s6 + $0xe0] sm:$0xf] }
 0x529   : > { %5163 = vmatpush.bf16.msrb.mxu1 %v7345_v43 }
 0x52a   : > { %v10078_v21 = vpop.eup %8102 }
 0x52b   : > { %v4876_v20 = vmul.f32 %v10078_v21, %v10015_v29  ;;  %5189 = vmatpush.bf16.msra.mxu3 %v7349_v58  ;;  %5151 = vmatpush.bf16.msrb.mxu0 %v7273_v0  ;;  %v7963_v58 = vld [vmem:[%s10547_s6 + $0x74] sm:$0xf0]  ;;  %vm4882_vm8 = vweird.f32 %v10078_v21 }
 0x52c   : > { %vm4883_vm13 = vmor %vm4881_vm10, %vm4882_vm8 }
 0x52d   : > { %v10117_v39 = vpop.eup %8104  ;;  %v4877_v48 = vmul.f32 %v10078_v21, %v4876_v20  ;;  %5164 = vmatpush.bf16.msrb.mxu1 %v7337_v8  ;;  %v7264_v20 = vld [vmem:[%s10546_s5] sm:$0xf]  ;;  %v7956_v8 = vld [vmem:[%s10547_s6 + $0x44] sm:$0xf] }
 0x52e   : > { %v4886_v57 = vmul.f32 %v10117_v39, %v10047_v27  ;;  %vm4892_vm11 = vweird.f32 %v10117_v39 }
 0x52f   : > { %v4834_v1 = vpop.xlane.xlu1 %4833  ;;  %v4878_v55 = vmul.f32 0.5, %v4877_v48  ;;  %5190 = vmatpush.bf16.msra.mxu3 %v7341_v19  ;;  %v7441_v19 = vor.u32 %v7961_v15, %v7440_v6  ;;  %vm10290_vm15 = vmor %vm4891_vm14, %vm4892_vm11  ;;  %v7950_v15 = vld [vmem:[%s10547_s6 + $0x14] sm:$0xf] }
 0x530   : > { %v4845_v34 = vmul.f32 %v4834_v1, %v9883_v2  ;;  %v4887_v60 = vmul.f32 %v10117_v39, %v4886_v57  ;;  %v7916_v1 = vld [vmem:[%s10546_s5 + $0x4] sm:$0xf]  ;;  %v7448_v57 = vld [vmem:[%s10547_s6 + $0x70] sm:$0xf] }
 0x531   : > { %v7269_v37 = vor.u32 %v7916_v1, %v7266_v30  ;;  %v4879_v43 = vsub.f32 1.5, %v4878_v55  ;;  %5165 = vmatpush.bf16.msrb.mxu1 %v7329_v36  ;;  %v7449_v0 = vor.u32 %v7963_v58, %v7448_v57  ;;  %v7453_v55 = vor.u32 %v7962_v59, %v7450_v3  ;;  %v7514_v36 = vld [vmem:[%s10547_s6 + $0xf8] sm:$0xf0]  ;;  %v7506_v58 = vld [vmem:[%s10547_s6 + $0xe8] sm:$0xf0] }
 0x532   : > { %v4837_v41 = vpop.xlane.xlu2 %4836  ;;  %v10137_v49 = vadd.f32 1e-05, %v4845_v34  ;;  %v7265_v34 = vor.u32 %v7917_v22, %v7264_v20  ;;  %v10200_v47 = vmul.f32 0.5, %v4887_v60  ;;  %v7960_v60 = vld [vmem:[%s10547_s6 + $0x64] sm:$0xf] }
 0x533   : > { %v4846_v50 = vmul.f32 %v4837_v41, %v9883_v2  ;;  %v4869_v41 = vsub.f32 1.5, %v4868_v14  ;;  %5178 = vmatpush.bf16.msra.mxu2 %v7269_v37  ;;  %5191 = vmatpush.bf16.msra.mxu3 %v7333_v46  ;;  %v4880_v61 = vmul.f32 %v10078_v21, %v4879_v43  ;;  %v7442_v20 = vld [vmem:[%s10547_s6 + $0x68] sm:$0xf0]  ;;  %v7512_v22 = vld [vmem:[%s10547_s6 + $0xf0] sm:$0xf] }
 0x534   : > { %8106 = vrsqrt.f32 %v10137_v49  ;;  %5152 = vmatpush.bf16.msrb.mxu0 %v7265_v34  ;;  %v4889_v9 = vsub.f32 1.5, %v10200_v47  ;;  %v7445_v30 = vor.u32 %v7960_v60, %v7442_v20  ;;  %v7513_v31 = vor.u32 %v7979_v17, %v7512_v22  ;;  %v7978_v34 = vld [vmem:[%s10547_s6 + $0xf4] sm:$0xf]  ;;  %v7432_v37 = vld [vmem:[%s10547_s6 + $0x50] sm:$0xf] }
 0x535   : > { %v10152_v62 = vadd.f32 1e-05, %v4846_v50  ;;  %v4870_v16 = vmul.f32 %v10075_v63, %v4869_v41  ;;  %v7517_v51 = vor.u32 %v7978_v34, %v7514_v36  ;;  %v4884_v41 = vsel %vm4883_vm13, %v10078_v21, %v4880_v61  ;;  %v7958_v46 = vld [vmem:[%s10547_s6 + $0x54] sm:$0xf]  ;;  %v7424_v59 = vld [vmem:[%s10547_s6 + $0x40] sm:$0xf] }
 0x536   : > { %5406 = vmatpush.bf16.msra.mxu1 %v7513_v31  ;;  %v4925_v21 = vmul.f32 %v4864_v28, %v9898_v12  ;;  %v4890_v47 = vmul.f32 %v10117_v39, %v4889_v9  ;;  %v4929_v3 = vmul.f32 %v4884_v41, %v9909_v24  ;;  %v7426_v9 = vld [vmem:[%s10547_s6 + $0x48] sm:$0xf0]  ;;  %vm4901_vm1 = vweird.f32 %v10137_v49  ;;  %v7974_v24 = vld [vmem:[%s10547_s6 + $0xd4] sm:$0xf]  ;;  %v7488_v17 = vld [vmem:[%s10547_s6 + $0xc0] sm:$0xf] }
 0x537   : > { %8108 = vrsqrt.f32 %v10152_v62  ;;  %5419 = vmatpush.bf16.msrb.mxu2 %v7453_v55  ;;  %v4874_v38 = vsel %vm4873_vm12, %v10075_v63, %v4870_v16  ;;  %v7434_v63 = vld [vmem:[%s10547_s6 + $0x58] sm:$0xf0]  ;;  %5432 = vmatpush.bf16.msrb.mxu3 %v7517_v51  ;;  %v7957_v16 = vld [vmem:[%s10547_s6 + $0x44] sm:$0xf0]  ;;  %v7954_v22 = vld [vmem:[%s10547_s6 + $0x34] sm:$0xf]  ;;  %vm4911_vm4 = vweird.f32 %v10152_v62 }
 0x538   : > { %5393 = vmatpush.bf16.msra.mxu0 %v7449_v0  ;;  %v7437_v12 = vor.u32 %v7958_v46, %v7434_v63  ;;  %v4927_v61 = vmul.f32 %v4874_v38, %v9887_v4  ;;  %v4926_v0 = vmul.f32 %v4864_v28, %v9901_v11  ;;  %v7975_v11 = vld [vmem:[%s10547_s6 + $0xd4] sm:$0xf0]  ;;  %v7425_v60 = vor.u32 %v7957_v16, %v7424_v59  ;;  %v7973_v28 = vld [vmem:[%s10547_s6 + $0xc4] sm:$0xf0]  ;;  %v7418_v34 = vld [vmem:[%s10547_s6 + $0x38] sm:$0xf0] }
 0x539   : > { %v7972_v36 = vld [vmem:[%s10547_s6 + $0xc4] sm:$0xf]  ;;  %v7490_v51 = vld [vmem:[%s10547_s6 + $0xc8] sm:$0xf0]  ;;  %v7965_v46 = vld [vmem:[%s10547_s6 + $0x84] sm:$0xf0] }
 0x53a   : > { %v10198_v23 = vpop.eup %8106  ;;  %v4939_v55 = vadd.f32 %v4927_v61, %v4925_v21 }
 0x53b   : > { %v4896_v48 = vmul.f32 %v10198_v23, %v10137_v49  ;;  %vm4902_vm0 = vweird.f32 %v10198_v23  ;;  %5420 = vmatpush.bf16.msrb.mxu2 %v7445_v30  ;;  %v4894_v49 = vsel %vm10290_vm15, %v10117_v39, %v4890_v47  ;;  %v7429_v39 = vor.u32 %v7956_v8, %v7426_v9  ;;  %v7408_v47 = vld [vmem:[%s10547_s6 + $0x20] sm:$0xf] }
 0x53c   : > { %5394 = vmatpush.bf16.msra.mxu0 %v7441_v19  ;;  %vm10353_vm2 = vmor %vm4901_vm1, %vm4902_vm0  ;;  %v4940_v31 = vadd.f32 %v4939_v55, %v4929_v3  ;;  %v4931_v29 = vmul.f32 %v4894_v49, %v9916_v25  ;;  %v7421_v25 = vor.u32 %v7954_v22, %v7418_v34 }
 0x53d   : > { %v10204_v50 = vpop.eup %8108  ;;  %v4897_v52 = vmul.f32 %v10198_v23, %v4896_v48  ;;  %v7433_v48 = vor.u32 %v7959_v40, %v7432_v37 }
 0x53e   : > { %v4906_v53 = vmul.f32 %v10204_v50, %v10152_v62  ;;  %vm4912_vm3 = vweird.f32 %v10204_v50 }
 0x53f   : > { %v4898_v10 = vmul.f32 0.5, %v4897_v52  ;;  %v4840_v14 = vpop.xlane.xlu0 %4839  ;;  %v7977_v52 = vld [vmem:[%s10547_s6 + $0xe4] sm:$0xf0]  ;;  %5421 = vmatpush.bf16.msrb.mxu2 %v7437_v12  ;;  %vm10392_vm5 = vmor %vm4911_vm4, %vm4912_vm3  ;;  %v7410_v12 = vld [vmem:[%s10547_s6 + $0x28] sm:$0xf0] }
 0x540   : > { %v4907_v13 = vmul.f32 %v10204_v50, %v4906_v53  ;;  %v4847_v56 = vmul.f32 %v4840_v14, %v9883_v2  ;;  %v7976_v53 = vld [vmem:[%s10547_s6 + $0xe4] sm:$0xf]  ;;  %v7505_v57 = vor.u32 %v7977_v52, %v7504_v54  ;;  %v7498_v14 = vld [vmem:[%s10547_s6 + $0xd8] sm:$0xf0]  ;;  %5395 = vmatpush.bf16.msra.mxu0 %v7433_v48  ;;  %v7953_v48 = vld [vmem:[%s10547_s6 + $0x24] sm:$0xf0] }
 0x541   : > { %v4899_v27 = vsub.f32 1.5, %v4898_v10  ;;  %v7509_v6 = vor.u32 %v7976_v53, %v7506_v58  ;;  %v7496_v10 = vld [vmem:[%s10547_s6 + $0xd0] sm:$0xf]  ;;  %v7501_v20 = vor.u32 %v7974_v24, %v7498_v14  ;;  %v7952_v54 = vld [vmem:[%s10547_s6 + $0x24] sm:$0xf] }
 0x542   : > { %v10265_v1 = vmul.f32 0.5, %v4907_v13  ;;  %v10278_v7 = vadd.f32 1e-05, %v4847_v56  ;;  %v4928_v13 = vmul.f32 %v4874_v38, %v9890_v5  ;;  %5407 = vmatpush.bf16.msra.mxu1 %v7505_v57  ;;  %v4930_v5 = vmul.f32 %v4884_v41, %v9912_v18  ;;  %v7416_v56 = vld [vmem:[%s10547_s6 + $0x30] sm:$0xf] }
 0x543   : > { %v4900_v4 = vmul.f32 %v10198_v23, %v4899_v27  ;;  %v7955_v18 = vld [vmem:[%s10547_s6 + $0x34] sm:$0xf0]  ;;  %5433 = vmatpush.bf16.msrb.mxu3 %v7509_v6  ;;  %v7497_v19 = vor.u32 %v7975_v11, %v7496_v10  ;;  %v7489_v38 = vor.u32 %v7973_v28, %v7488_v17  ;;  %v4932_v27 = vmul.f32 %v4894_v49, %v9919_v42  ;;  %v7970_v57 = vld [vmem:[%s10547_s6 + $0xb4] sm:$0xf]  ;;  %v7482_v58 = vld [vmem:[%s10547_s6 + $0xb8] sm:$0xf0] }
 0x544   : > { %v4909_v43 = vsub.f32 1.5, %v10265_v1  ;;  %8110 = vrsqrt.f32 %v10278_v7  ;;  %v4945_v30 = vadd.f32 %v4928_v13, %v4926_v0  ;;  %5396 = vmatpush.bf16.msra.mxu0 %v7425_v60  ;;  %v7417_v63 = vor.u32 %v7955_v18, %v7416_v56  ;;  %5422 = vmatpush.bf16.msrb.mxu2 %v7429_v39  ;;  %v7402_v56 = vld [vmem:[%s10547_s6 + $0x18] sm:$0xf0]  ;;  %v7472_v39 = vld [vmem:[%s10547_s6 + $0xa0] sm:$0xf] }
 0x545   : > { %v4904_v37 = vsel %vm10353_vm2, %v10198_v23, %v4900_v4  ;;  %v7480_v23 = vld [vmem:[%s10547_s6 + $0xb0] sm:$0xf]  ;;  %v7493_v42 = vor.u32 %v7972_v36, %v7490_v51  ;;  %v7409_v0 = vor.u32 %v7953_v48, %v7408_v47  ;;  %v7413_v6 = vor.u32 %v7952_v54, %v7410_v12  ;;  %v7474_v17 = vld [vmem:[%s10547_s6 + $0xa8] sm:$0xf0] }
 0x546   : > { %v4910_v40 = vmul.f32 %v10204_v50, %v4909_v43  ;;  %5408 = vmatpush.bf16.msra.mxu1 %v7497_v19  ;;  %v4946_v41 = vadd.f32 %v4945_v30, %v4930_v5  ;;  %v7971_v43 = vld [vmem:[%s10547_s6 + $0xb4] sm:$0xf0]  ;;  %v4933_v52 = vmul.f32 %v4904_v37, %v9931_v32  ;;  %v4934_v53 = vmul.f32 %v4904_v37, %v9934_v33  ;;  %v7969_v19 = vld [vmem:[%s10547_s6 + $0xa4] sm:$0xf0]  ;;  %v7394_v36 = vld [vmem:[%s10547_s6 + $0x8] sm:$0xf0] }
 0x547   : > { %5434 = vmatpush.bf16.msrb.mxu3 %v7501_v20  ;;  %v7481_v32 = vor.u32 %v7971_v43, %v7480_v23  ;;  %v4941_v33 = vadd.f32 %v4940_v31, %v4931_v29  ;;  %v7485_v8 = vor.u32 %v7970_v57, %v7482_v58  ;;  %vm4921_vm7 = vweird.f32 %v10278_v7  ;;  %v7968_v20 = vld [vmem:[%s10547_s6 + $0xa4] sm:$0xf]  ;;  %v7949_v30 = vld [vmem:[%s10547_s6 + $0x4] sm:$0xf0]  ;;  %v7464_v37 = vld [vmem:[%s10547_s6 + $0x90] sm:$0xf] }
 0x548   : > { %v4914_v59 = vsel %vm10392_vm5, %v10204_v50, %v4910_v40  ;;  %v4947_v61 = vadd.f32 %v4946_v41, %v4932_v27  ;;  %5397 = vmatpush.bf16.msra.mxu0 %v7417_v63  ;;  %5423 = vmatpush.bf16.msrb.mxu2 %v7421_v25  ;;  %v7405_v18 = vor.u32 %v7950_v15, %v7402_v56  ;;  %v7948_v31 = vld [vmem:[%s10547_s6 + $0x4] sm:$0xf]  ;;  %v7967_v40 = vld [vmem:[%s10547_s6 + $0x94] sm:$0xf0]  ;;  %v7466_v41 = vld [vmem:[%s10547_s6 + $0x98] sm:$0xf0] }
 0x549   : > { %v4942_v9 = vadd.f32 %v4941_v33, %v4933_v52  ;;  %v4935_v13 = vmul.f32 %v4914_v59, %v9938_v35  ;;  %v4936_v4 = vmul.f32 %v4914_v59, %v9941_v26  ;;  %v7473_v22 = vor.u32 %v7969_v19, %v7472_v39  ;;  %v7456_v27 = vld [vmem:[%s10547_s6 + $0x80] sm:$0xf]  ;;  %v7964_v63 = vld [vmem:[%s10547_s6 + $0x84] sm:$0xf]  ;;  %v7458_v43 = vld [vmem:[%s10547_s6 + $0x88] sm:$0xf0] }
 0x54a   : > { %v8111_v1 = vpop.eup %8110  ;;  %5409 = vmatpush.bf16.msra.mxu1 %v7489_v38  ;;  %v4948_v10 = vadd.f32 %v4947_v61, %v4934_v53  ;;  %v7477_v28 = vor.u32 %v7968_v20, %v7474_v17  ;;  %v7397_v51 = vor.u32 %v7948_v31, %v7394_v36  ;;  %v7465_v38 = vor.u32 %v7967_v40, %v7464_v37 }
 0x54b   : > { %v4916_v62 = vmul.f32 %v8111_v1, %v10278_v7  ;;  %vm4922_vm6 = vweird.f32 %v8111_v1  ;;  %5435 = vmatpush.bf16.msrb.mxu3 %v7493_v42  ;;  %v4943_v24 = vadd.f32 %v4942_v9, %v4935_v13  ;;  %v7457_v23 = vor.u32 %v7965_v46, %v7456_v27 }
 0x54c   : > { %vm4923_vm8 = vmor %vm4921_vm7, %vm4922_vm6  ;;  %5398 = vmatpush.bf16.msra.mxu0 %v7409_v0  ;;  %5424 = vmatpush.bf16.msrb.mxu2 %v7413_v6  ;;  %v4949_v14 = vadd.f32 %v4948_v10, %v4936_v4 }
 0x54d   : > { %v4917_v21 = vmul.f32 %v8111_v1, %v4916_v62  ;;  %v7966_v62 = vld [vmem:[%s10547_s6 + $0x94] sm:$0xf] }
 0x54e   : > { %5410 = vmatpush.bf16.msra.mxu1 %v7481_v32  ;;  %v7469_v29 = vor.u32 %v7966_v62, %v7466_v41 }
 0x54f   : > { %v4918_v16 = vmul.f32 0.5, %v4917_v21  ;;  %5436 = vmatpush.bf16.msrb.mxu3 %v7485_v8  ;;  %v7461_v21 = vor.u32 %v7964_v63, %v7458_v43 }
 0x550   : > { %5425 = vmatpush.bf16.msrb.mxu2 %v7405_v18 }
 0x551   : > { %v4919_v3 = vsub.f32 1.5, %v4918_v16 }
 0x552   : > { %5411 = vmatpush.bf16.msra.mxu1 %v7473_v22 }
 0x553   : > { %v4920_v50 = vmul.f32 %v8111_v1, %v4919_v3  ;;  %5437 = vmatpush.bf16.msrb.mxu3 %v7477_v28 }
 0x554   : > { %5426 = vmatpush.bf16.msrb.mxu2 %v7397_v51 }
 0x555   : > { %v4924_v11 = vsel %vm4923_vm8, %v8111_v1, %v4920_v50  ;;  %v7392_v1 = vld [vmem:[%s10547_s6] sm:$0xf] }
 0x556   : > { %v4937_v55 = vmul.f32 %v4924_v11, %v9953_v44  ;;  %v4938_v5 = vmul.f32 %v4924_v11, %v9956_v45  ;;  %v7400_v44 = vld [vmem:[%s10547_s6 + $0x10] sm:$0xf]  ;;  %v7951_v45 = vld [vmem:[%s10547_s6 + $0x14] sm:$0xf0]  ;;  %v7393_v34 = vor.u32 %v7949_v30, %v7392_v1  ;;  %5412 = vmatpush.bf16.msra.mxu1 %v7465_v38 }
 0x557   : > { %v7401_v60 = vor.u32 %v7951_v45, %v7400_v44  ;;  %5438 = vmatpush.bf16.msrb.mxu3 %v7469_v29 }
 0x558   : > { %v10430_v49 = vadd.f32 %v4943_v24, %v4937_v55  ;;  %v10432_v35 = vadd.f32 %v4949_v14, %v4938_v5 }
 0x559   : > { %5399 = vmatpush.bf16.msra.mxu0 %v7401_v60 }
 0x55a   : > { %v4951_v26 = vpack.c.bf16 %v10430_v49, %v10430_v49  ;;  %v4952_v7 = vpack.c.bf16 %v10432_v35, %v10432_v35  ;;  %5413 = vmatpush.bf16.msra.mxu1 %v7457_v23 }
 0x55b   : > { %5439 = vmatpush.bf16.msrb.mxu3 %v7461_v21 }
 0x55c   : > { %5153 = vmatmul.bf16.vlgmr.msrb.gmra.mxu0 %v4951_v26  ;;  %5166 = vmatmul.bf16.vlgmr.msrb.gmra.mxu1 %v4952_v7 }
 0x55d   : > { %5179 = vmatmul.bf16.vlgmr.msra.gmra.mxu2 %v4951_v26  ;;  %5192 = vmatmul.bf16.vlgmr.msra.gmra.mxu3 %v4952_v7 }
 0x55e   : > { %5400 = vmatpush.bf16.msra.mxu0 %v7393_v34 }
 0x5d9   : > { %v5154_v25 = vpop.f32.mrf.mxu0  ;;  %v5167_v42 = vpop.f32.mrf.mxu1 }
 0x5da   : > { %v5168_v47 = vadd.f32 %v5167_v42, %v5154_v25 }
 0x5dc   : > { %v5197_v48 = vmax.f32 %v5168_v47, 0.0 }
 0x5de   : > { %v5199_v54 = vpack.c.bf16 %v5197_v48, %v5197_v48 }
 0x5e0   : > { %v5180_v52 = vpop.f32.mrf.mxu2  ;;  %v5193_v53 = vpop.f32.mrf.mxu3  ;;  %5401 = vmatmul.bf16.vlgmr.msra.gmra.mxu0 %v5199_v54  ;;  %5427 = vmatmul.bf16.vlgmr.msrb.gmra.mxu2 %v5199_v54 }
 0x5e1   : > { %v5194_v12 = vadd.f32 %v5193_v53, %v5180_v52  ;;  %v5156_v57 = vpop.f32.mrf.mxu0  ;;  %v5169_v58 = vpop.f32.mrf.mxu1 }
 0x5e3   : > { %v5198_v59 = vmax.f32 %v5194_v12, 0.0 }
 0x5e5   : > { %v5200_v16 = vpack.c.bf16 %v5198_v59, %v5198_v59 }
 0x5e7   : > { %5414 = vmatmul.bf16.vlgmr.msra.gmra.mxu1 %v5200_v16  ;;  %5440 = vmatmul.bf16.vlgmr.msrb.gmra.mxu3 %v5200_v16 }
 0x5e8   : > { %v5182_v32 = vpop.f32.mrf.mxu2  ;;  %v5195_v33 = vpop.f32.mrf.mxu3 }
 0x65d   : > { %v5402_v61 = vpop.f32.mrf.mxu0 }
 0x65e   : > { %v5403_v8 = vadd.f32 %v5402_v61, %v10430_v49 }
 0x663   : > { %v5428_v0 = vpop.f32.mrf.mxu2 }
 0x664   : > { %v5415_v3 = vpop.f32.mrf.mxu1  ;;  %v5429_v9 = vadd.f32 %v5428_v0, %v10432_v35 }
 0x665   : > { %v5404_v6 = vpop.f32.mrf.mxu0  ;;  %v5416_v13 = vadd.f32 %v5415_v3, %v5403_v8 }
 0x66a   : > { %v5441_v10 = vpop.f32.mrf.mxu3 }
 0x66b   : > { %v5442_v4 = vadd.f32 %v5441_v10, %v5429_v9  ;;  %v5430_v50 = vpop.f32.mrf.mxu2 }
 0x66c   : > { %v5417_v11 = vpop.f32.mrf.mxu1 }
 0x66d   : > { %v5445_v24 = vadd.f32 %v5442_v4, %v5416_v13 }
 0x66f   : > { %5446 = vadd.xlane.f32.xlu1 %v5445_v24 }
 0x672   : > { %v5443_v14 = vpop.f32.mrf.mxu3 }
 0x6e2   : > { %v5447_v55 = vpop.xlane.xlu1 %5446 }
 0x6e3   : > { %v5448_v5 = vmul.f32 %v5447_v55, %v9883_v2 }
 0x6e5   : > { %v5449_v26 = vsub.f32 %v5416_v13, %v5448_v5  ;;  %v5450_v7 = vsub.f32 %v5442_v4, %v5448_v5 }
 0x6e7   : > { %v5451_v44 = vmul.f32 %v5449_v26, %v5449_v26  ;;  %v5452_v45 = vmul.f32 %v5450_v7, %v5450_v7 }
 0x6e9   : > { %v5453_v49 = vadd.f32 %v5452_v45, %v5451_v44 }
 0x6eb   : > { %5454 = vadd.xlane.f32.xlu2 %v5453_v49 }
 0x75e   : > { %v5455_v35 = vpop.xlane.xlu2 %5454 }
 0x75f   : > { %v5456_v15 = vmul.f32 %v5455_v35, %v9883_v2 }
 0x761   : > { %v5457_v60 = vadd.f32 1e-05, %v5456_v15 }
 0x763   : > { %8112 = vrsqrt.f32 %v5457_v60  ;;  %vm5464_vm10 = vweird.f32 %v5457_v60 }
 0x769   : > { %v8113_v56 = vpop.eup %8112 }
 0x76a   : > { %v5459_v18 = vmul.f32 %v8113_v56, %v5457_v60  ;;  %vm5465_vm9 = vweird.f32 %v8113_v56 }
 0x76b   : > { %vm5466_vm11 = vmor %vm5464_vm10, %vm5465_vm9 }
 0x76c   : > { %v5460_v39 = vmul.f32 %v8113_v56, %v5459_v18 }
 0x76e   : > { %v5461_v19 = vmul.f32 0.5, %v5460_v39 }
 0x770   : > { %v5462_v20 = vsub.f32 1.5, %v5461_v19 }
 0x772   : > { %v5463_v22 = vmul.f32 %v8113_v56, %v5462_v20 }
 0x774   : > { %v5467_v2 = vsel %vm5466_vm11, %v8113_v56, %v5463_v22 }
 0x775   : > { %v5468_v17 = vmul.f32 %v5467_v2, %v5449_v26  ;;  %v5469_v28 = vmul.f32 %v5467_v2, %v5450_v7 }
 0x777   : > { %5470 = vst [vmem:[%s517_s13] sm:$0xff] %v5468_v17 }
 0x778   : > { %5471 = vst [vmem:[%s517_s13 + $0x8] sm:$0xff] %v5469_v28 }
 0x779   : > { %8143 = shalt.err (!%p8140_p8)
}
 0x77a   : > { %8012 = dma.vmem_to_hbm [thread:$0]  (%p8280_p5), %s5487_s17, 256, %s5489_s21, %s5473_s27  }
 0x77b PF: > { %s5500_s19 = sand.u32 1, %s8174_s24   ;;  %p8015_p11 = pnand %p5659_p10, %p8291_p9 }
 0x77c   : > { %s5501_s8 = scalar_lea.sflag [#allocation5], %s5500_s19 }
 0x77d   : > { %p8016_p12 = pneg %p8015_p11 }
 0x77f   : > { %8169 = dma.done.wait (%p8016_p12), %s5501_s8, 256  }
 0x780   : > { %8171 = vsyncadd (%p8016_p12), %s5501_s8, 4294967040  ;;  %s20_s29 = sadd.s32 1, %s8194_s29   ;;  %s10562_s24 = smov %s8178_s25 }
 0x781   : > { %p17_p13 = scmp.ge.s32.totalorder %s20_s29, 4   ;;  %s10563_s25 = smov %s8182_s26 }
 0x782   : > { %s10564_s26 = smov %s8289_s14  ;;  %s10565_s27 = smov %s8190_s28 }
 0x783   : > { %s10566_s28 = smov %s10568_s9  ;;  %19 = sbr.rel (!%p17_p13) target bundleno = 6 (0x6), region = 193 }
 0x788   :  { %5507 = vsyncpa [#allocation5], 1 }
 0x789   :  { %5509 = vsyncpa [#allocation5 + $0x1], 1 }

</bundles_post_ra>
